<compile_context>
chip_gen: v7x
topology: tpu7x:2x2x1
jax: 0.10.0
libtpu: 0.0.40
codegen_flags: <defaults>
</compile_context>

<pallas_src>
import jax
import jax.numpy as jnp
import numpy as np
from jax import lax
from jax.experimental import pallas as pl
from jax.experimental.pallas import tpu as pltpu

# Sizes implied by the module: FC1 expects 1152 = 128 * 9, which forces the
# Conv/Pool chain input length L0 = 30 and in_channels (emb_dim) = 43.
EMB = 43          # Conv1d in_channels  (emb_dim)
FEA = 30          # sequence length fed to the CNN (fea_size)
H_FEAT = 128      # Net output / GRU input size
H_RNN = 128       # GRU hidden size
EPS = 1e-5
HIGHEST = jax.lax.Precision.HIGHEST


def _round_up(x, m):
    return ((x + m - 1) // m) * m


def _dot(a, b):
    # Native MXU fast path: bf16 operands, f32 accumulation.
    return jnp.dot(a.astype(jnp.bfloat16), b.astype(jnp.bfloat16),
                   preferred_element_type=jnp.float32)


def const_spec(shape):
    nd = len(shape)
    return pl.BlockSpec(shape, lambda i, nd=nd: (0,) * nd)


# ---------------------------------------------------------------------------
# Kernel 1: "Net" CNN feature extractor for a tile of TN samples.
# Layout: length-major slabs (L, TN, C); conv = sum over taps of one
# (Lout*TN, Cin) @ (Cin, Cout) matmul per tap; pools are slab maximums.
#   conv1(43->64,k3)+BN+ReLU -> maxpool(5,1) ->
#   conv2(64->64,k3)+BN+ReLU -> maxpool(2,2) ->
#   conv3(64->128,k3)+BN+ReLU -> flatten(1152) -> FC1(1152->128)+ReLU
# ---------------------------------------------------------------------------
def net_kernel(x_ref,
               w1_ref, b1_ref, s1_ref, t1_ref,
               w2_ref, b2_ref, s2_ref, t2_ref,
               w3_ref, b3_ref, s3_ref, t3_ref,
               wfc_ref, bfc_ref,
               out_ref):
    tn = x_ref.shape[1]

    def conv_bn_relu(slab, w_ref, b_ref, s_ref, t_ref):
        lin = slab.shape[0]
        ksz, cin, cout = w_ref.shape
        lout = lin - ksz + 1
        # One (lout*tn, cin) @ (cin, cout) matmul per tap, accumulated.
        acc = _dot(slab[0:lout].reshape(lout * tn, cin), w_ref[0])
        for k in range(1, ksz):
            acc = acc + _dot(slab[k:k + lout].reshape(lout * tn, cin), w_ref[k])
        acc = (acc + b_ref[...]) * s_ref[...] + t_ref[...]   # conv bias + BN(eval)
        return jnp.maximum(acc, 0.0).reshape(lout, tn, cout)  # ReLU, back to slab

    x = x_ref[...]                                           # (30, tn, 43)
    # conv1 + bn1 + relu: 30 -> 28
    h1 = conv_bn_relu(x, w1_ref, b1_ref, s1_ref, t1_ref)     # (28, tn, 64)
    # maxpool1 (k=5, s=1): 28 -> 24  (max of 5 shifted slabs)
    p1 = h1[0:24]
    for k in range(1, 5):
        p1 = jnp.maximum(p1, h1[k:k + 24])                   # (24, tn, 64)
    # conv2 + bn2 + relu: 24 -> 22
    h2 = conv_bn_relu(p1, w2_ref, b2_ref, s2_ref, t2_ref)    # (22, tn, 64)
    # maxpool2 (k=2, s=2): 22 -> 11  (pair the length axis into sublanes)
    h2p = h2.reshape(11, 2 * tn, 64)
    p2 = jnp.maximum(h2p[:, :tn, :], h2p[:, tn:, :])         # (11, tn, 64)
    # conv3 + bn3 + relu: 11 -> 9, 64 -> 128 channels
    h3 = conv_bn_relu(p2, w3_ref, b3_ref, s3_ref, t3_ref)    # (9, tn, 128)
    # flatten + FC1 + ReLU as ONE (tn, 1152) @ (1152, 128) matmul.
    # wfc_ref is pre-reordered so row index = l*128 + c matches this concat order.
    flat = jnp.concatenate([h3[l] for l in range(9)], axis=-1)   # (tn, 1152)
    out_ref[...] = jnp.maximum(_dot(flat, wfc_ref[...]) + bfc_ref[...], 0.0)


def run_net(xr_t, p, tn=None):
    # xr_t: (FEA, N, EMB) length-major layout.
    _, n, _ = xr_t.shape
    if tn is None:
        tn = min(128, _round_up(n, 8))       # fill MXU rows, amortize grid steps
    n_pad = _round_up(n, tn)
    if n_pad != n:
        xr_t = jnp.pad(xr_t, ((0, 0), (0, n_pad - n), (0, 0)))
    in_specs = [
        pl.BlockSpec((FEA, tn, EMB), lambda i: (0, i, 0)),
        const_spec(p["w1"].shape), const_spec(p["b1"].shape),
        const_spec(p["s1"].shape), const_spec(p["t1"].shape),
        const_spec(p["w2"].shape), const_spec(p["b2"].shape),
        const_spec(p["s2"].shape), const_spec(p["t2"].shape),
        const_spec(p["w3"].shape), const_spec(p["b3"].shape),
        const_spec(p["s3"].shape), const_spec(p["t3"].shape),
        const_spec(p["wfc"].shape), const_spec(p["bfc"].shape),
    ]
    out = pl.pallas_call(
        net_kernel,
        out_shape=jax.ShapeDtypeStruct((n_pad, H_FEAT), jnp.float32),
        grid=(n_pad // tn,),
        in_specs=in_specs,
        out_specs=pl.BlockSpec((tn, H_FEAT), lambda i: (i, 0)),
        compiler_params=pltpu.CompilerParams(dimension_semantics=("parallel",)),
    )(xr_t, p["w1"], p["b1"], p["s1"], p["t1"],
      p["w2"], p["b2"], p["s2"], p["t2"],
      p["w3"], p["b3"], p["s3"], p["t3"],
      p["wfc"], p["bfc"])
    return out[:n]


# ---------------------------------------------------------------------------
# Kernel 2: fused GRU (PyTorch gate order r,z,n) + lengths-1 gather +
# generater head (Linear(128,16)+ReLU+Linear(16,2)+Sigmoid).
# Single invocation; time recurrence is an in-kernel fori_loop; the input
# projection for all timesteps is one big matmul written to VMEM scratch.
# ---------------------------------------------------------------------------
def gru_head_kernel(len_ref, feats_ref, wih_ref, whh_ref, bih_ref, bhh_ref,
                    gw1_ref, gb1_ref, gw2_ref, gb2_ref, out_ref, gi_ref):
    S, Bp, G = gi_ref.shape            # G = 3*H
    H = whh_ref.shape[0]

    # Hoisted input projection for ALL timesteps: (S*Bp,128) @ (128,384).
    feats = feats_ref[...]                                   # time-major (S*Bp, H)
    gi_ref[...] = (_dot(feats, wih_ref[...]) + bih_ref[...]).reshape(S, Bp, G)

    lengths = len_ref[...]                                   # (Bp, 1) int32
    whh = whh_ref[...]                                       # resident across steps
    bhh = bhh_ref[...]

    def step(t, carry):
        h, last = carry
        gi = gi_ref[t]                                       # (Bp, 3H)
        gh = _dot(h, whh) + bhh                              # (Bp, 3H)
        r = jax.nn.sigmoid(gi[:, :H] + gh[:, :H])
        z = jax.nn.sigmoid(gi[:, H:2 * H] + gh[:, H:2 * H])
        n = jnp.tanh(gi[:, 2 * H:] + r * gh[:, 2 * H:])
        h_new = (1.0 - z) * n + z * h
        # select rnn_out[b, lengths[b]-1] on the fly (no HBM rnn_out materialized)
        last = jnp.where(lengths == t + 1, h_new, last)
        return h_new, last

    h0 = jnp.zeros((Bp, H), jnp.float32)
    _, last = lax.fori_loop(0, S, step, (h0, h0), unroll=True)

    # generater head
    hid = jnp.maximum(_dot(last, gw1_ref[...]) + gb1_ref[...], 0.0)
    out_ref[...] = jax.nn.sigmoid(_dot(hid, gw2_ref[...]) + gb2_ref[...])


def run_gru_head(feats, lengths, gru_p, gen_p, B, S):
    H = H_FEAT
    Bp = _round_up(B, 8)                 # pad batch to whole sublanes
    f = feats.reshape(B, S, H)
    if Bp != B:
        f = jnp.pad(f, ((0, Bp - B), (0, 0), (0, 0)))
    f_tm = jnp.transpose(f, (1, 0, 2)).reshape(S * Bp, H)    # time-major rows t*Bp+b
    lens = lengths.astype(jnp.int32)
    if Bp != B:
        lens = jnp.pad(lens, (0, Bp - B), constant_values=1)
    lens = lens.reshape(Bp, 1)

    in_specs = [
        const_spec((Bp, 1)), const_spec((S * Bp, H)),
        const_spec(gru_p["wihT"].shape), const_spec(gru_p["whhT"].shape),
        const_spec(gru_p["bih"].shape), const_spec(gru_p["bhh"].shape),
        const_spec(gen_p["w1T"].shape), const_spec(gen_p["b1"].shape),
        const_spec(gen_p["w2T"].shape), const_spec(gen_p["b2"].shape),
    ]
    out = pl.pallas_call(
        gru_head_kernel,
        out_shape=jax.ShapeDtypeStruct((Bp, 2), jnp.float32),
        grid=(1,),
        in_specs=in_specs,
        out_specs=pl.BlockSpec((Bp, 2), lambda i: (0, 0)),
        scratch_shapes=[pltpu.VMEM((S, Bp, 3 * H_RNN), jnp.float32)],
        compiler_params=pltpu.CompilerParams(dimension_semantics=("arbitrary",)),
    )(lens, f_tm, gru_p["wihT"], gru_p["whhT"], gru_p["bih"], gru_p["bhh"],
      gen_p["w1T"], gen_p["b1"], gen_p["w2T"], gen_p["b2"])
    return out[:B]


# ---------------------------------------------------------------------------
# Full ExpNet forward (glue: reshapes / transposes in plain JAX).
# ---------------------------------------------------------------------------
def expnet_forward(x, lengths, kp):
    B, S, fea, emb = x.shape
    # PyTorch: reshape(B*S, fea, emb).permute(0,2,1) -> (N, C=emb, L=fea);
    # the CNN kernel consumes the equivalent length-major (L, N, C) slab.
    xr_t = x.reshape(B * S, fea, emb).transpose(1, 0, 2)     # (fea, B*S, emb)
    feats = run_net(xr_t, kp["net"])                         # (B*S, 128), row=b*S+s
    return run_gru_head(feats, lengths, kp["gru"], kp["gen"], B, S)   # (B, 2)


# ---------------------------------------------------------------------------
# Pure-JAX f32 reference (PyTorch-layout weights) for correctness checking.
# ---------------------------------------------------------------------------
def reference_forward(x, lengths, rp):
    B, S, fea, emb = x.shape
    xi = x.reshape(B * S, fea, emb).transpose(0, 2, 1)       # (N, 43, 30) NCL

    def mm(a, b):
        return jnp.dot(a, b, precision=HIGHEST)

    def conv1d(h, w, b):
        y = lax.conv_general_dilated(h, w, (1,), "VALID",
                                     dimension_numbers=("NCH", "OIH", "NCH"),
                                     precision=HIGHEST)
        return y + b[None, :, None]

    def bn(h, params):
        g, be, rm, rv = params
        return (h - rm[None, :, None]) / jnp.sqrt(rv[None, :, None] + EPS) \
            * g[None, :, None] + be[None, :, None]

    def maxpool1d(h, k, s):
        L = h.shape[2]
        lout = (L - k) // s + 1
        return jnp.stack([jnp.max(h[:, :, i * s:i * s + k], axis=2)
                          for i in range(lout)], axis=2)

    h = jax.nn.relu(bn(conv1d(xi, rp["w1"], rp["b1"]), rp["bn1"]))
    h = maxpool1d(h, 5, 1)
    h = jax.nn.relu(bn(conv1d(h, rp["w2"], rp["b2"]), rp["bn2"]))
    h = maxpool1d(h, 2, 2)
    h = jax.nn.relu(bn(conv1d(h, rp["w3"], rp["b3"]), rp["bn3"]))
    h = h.reshape(h.shape[0], -1)                            # (N, 1152)
    feats = jax.nn.relu(mm(h, rp["wfc"].T) + rp["bfc"]).reshape(B, S, H_FEAT)

    wih, whh, bih, bhh = rp["gru"]
    hstate = jnp.zeros((B, H_RNN), jnp.float32)
    outs = []
    for t in range(S):
        gi = mm(feats[:, t, :], wih.T) + bih
        gh = mm(hstate, whh.T) + bhh
        r = jax.nn.sigmoid(gi[:, :H_RNN] + gh[:, :H_RNN])
        z = jax.nn.sigmoid(gi[:, H_RNN:2 * H_RNN] + gh[:, H_RNN:2 * H_RNN])
        n = jnp.tanh(gi[:, 2 * H_RNN:] + r * gh[:, 2 * H_RNN:])
        hstate = (1.0 - z) * n + z * hstate
        outs.append(hstate)
    rnn_out = jnp.stack(outs, axis=1)                        # (B, S, H)
    last = rnn_out[jnp.arange(B), lengths - 1, :]
    gw1, gb1, gw2, gb2 = rp["gen"]
    return jax.nn.sigmoid(mm(jax.nn.relu(mm(last, gw1.T) + gb1), gw2.T) + gb2)


# ---------------------------------------------------------------------------
# Deterministic parameter construction (PyTorch shapes) + kernel-layout packing.
# ---------------------------------------------------------------------------
def make_params(key):
    ks = list(jax.random.split(key, 32))

    def u(k, shape, fan_in):
        return jax.random.uniform(k, shape, jnp.float32, -1.0, 1.0) / np.sqrt(fan_in)

    def bn_params(k, c):
        k1, k2, k3, k4 = jax.random.split(k, 4)
        return (jax.random.uniform(k1, (c,), jnp.float32, 0.5, 1.5),
                jax.random.uniform(k2, (c,), jnp.float32, -0.1, 0.1),
                jax.random.uniform(k3, (c,), jnp.float32, -0.2, 0.2),
                jax.random.uniform(k4, (c,), jnp.float32, 0.5, 1.5))

    rp = {}
    rp["w1"] = u(ks[0], (64, EMB, 3), EMB * 3); rp["b1"] = u(ks[1], (64,), EMB * 3)
    rp["w2"] = u(ks[2], (64, 64, 3), 64 * 3);   rp["b2"] = u(ks[3], (64,), 64 * 3)
    rp["w3"] = u(ks[4], (128, 64, 3), 64 * 3);  rp["b3"] = u(ks[5], (128,), 64 * 3)
    rp["wfc"] = u(ks[6], (128, 1152), 1152);    rp["bfc"] = u(ks[7], (128,), 1152)
    rp["bn1"] = bn_params(ks[8], 64)
    rp["bn2"] = bn_params(ks[9], 64)
    rp["bn3"] = bn_params(ks[10], 128)
    # rnn assumed nn.GRU(128, 128, num_layers=1, batch_first=True)
    rp["gru"] = (u(ks[11], (3 * H_RNN, H_FEAT), H_FEAT),
                 u(ks[12], (3 * H_RNN, H_RNN), H_RNN),
                 u(ks[13], (3 * H_RNN,), H_RNN),
                 u(ks[14], (3 * H_RNN,), H_RNN))
    rp["gen"] = (u(ks[15], (16, 128), 128), u(ks[16], (16,), 128),
                 u(ks[17], (2, 16), 16),    u(ks[18], (2,), 16))
    return rp


def to_kernel_params(rp):
    def bn_scale_shift(bn):
        g, b, rm, rv = bn
        s = g / jnp.sqrt(rv + EPS)
        return s.reshape(1, -1), (b - rm * s).reshape(1, -1)

    s1, t1 = bn_scale_shift(rp["bn1"])
    s2, t2 = bn_scale_shift(rp["bn2"])
    s3, t3 = bn_scale_shift(rp["bn3"])
    net = dict(
        w1=jnp.transpose(rp["w1"], (2, 1, 0)), b1=rp["b1"].reshape(1, -1), s1=s1, t1=t1,
        w2=jnp.transpose(rp["w2"], (2, 1, 0)), b2=rp["b2"].reshape(1, -1), s2=s2, t2=t2,
        w3=jnp.transpose(rp["w3"], (2, 1, 0)), b3=rp["b3"].reshape(1, -1), s3=s3, t3=t3,
        # FC1.weight is (out, c*9+l); reorder so row index = l*128 + c matches the
        # in-kernel lane-concat flatten order.
        wfc=jnp.transpose(rp["wfc"].reshape(128, 128, 9), (2, 1, 0)).reshape(9 * 128, 128),
        bfc=rp["bfc"].reshape(1, -1),
    )
    wih, whh, bih, bhh = rp["gru"]
    gru = dict(wihT=wih.T, whhT=whh.T,
               bih=bih.reshape(1, -1), bhh=bhh.reshape(1, -1))
    gw1, gb1, gw2, gb2 = rp["gen"]
    gen = dict(w1T=gw1.T, b1=gb1.reshape(1, -1), w2T=gw2.T, b2=gb2.reshape(1, -1))
    return dict(net=net, gru=gru, gen=gen)


if __name__ == "__main__":
    B, S = 2, 8
    key = jax.random.PRNGKey(0)
    kx, kparam = jax.random.split(key)
    x = jax.random.normal(kx, (B, S, FEA, EMB), jnp.float32)
    lengths = jnp.array([8, 5], dtype=jnp.int32)

    rp = make_params(kparam)
    kp = to_kernel_params(rp)

    fwd = jax.jit(lambda xx, ll: expnet_forward(xx, ll, kp))
    out = jax.block_until_ready(fwd(x, lengths))
    assert out.shape == (B, 2), out.shape

    ref = jax.block_until_ready(reference_forward(x, lengths, rp))
    # Kernels run bf16-input / f32-accum matmuls (MXU fast path); reference is
    # full f32, so the comparison tolerance is loosened accordingly.
    if not np.allclose(np.asarray(out), np.asarray(ref), atol=2e-2, rtol=2e-2):
        diff = np.max(np.abs(np.asarray(out) - np.asarray(ref)))
        raise AssertionError(f"Pallas vs reference mismatch (max|d|={diff}):\n{out}\n{ref}")

    print("KERNEL_OK")
</pallas_src>

<mosaic_0001>
module attributes {stable_mosaic.version = 11 : i64} {
  func.func @net_kernel(%arg0: i32, %arg1: memref<30x16x43xf32, #tpu.memory_space<vmem>>, %arg2: memref<3x43x64xf32, #tpu.memory_space<vmem>>, %arg3: memref<1x64xf32, #tpu.memory_space<vmem>>, %arg4: memref<1x64xf32, #tpu.memory_space<vmem>>, %arg5: memref<1x64xf32, #tpu.memory_space<vmem>>, %arg6: memref<3x64x64xf32, #tpu.memory_space<vmem>>, %arg7: memref<1x64xf32, #tpu.memory_space<vmem>>, %arg8: memref<1x64xf32, #tpu.memory_space<vmem>>, %arg9: memref<1x64xf32, #tpu.memory_space<vmem>>, %arg10: memref<3x64x128xf32, #tpu.memory_space<vmem>>, %arg11: memref<1x128xf32, #tpu.memory_space<vmem>>, %arg12: memref<1x128xf32, #tpu.memory_space<vmem>>, %arg13: memref<1x128xf32, #tpu.memory_space<vmem>>, %arg14: memref<1152x128xf32, #tpu.memory_space<vmem>>, %arg15: memref<1x128xf32, #tpu.memory_space<vmem>>, %arg16: memref<16x128xf32, #tpu.memory_space<vmem>>) attributes {dimension_semantics = [#tpu.dimension_semantics<parallel>], iteration_bounds = array<i64: 1>, scalar_prefetch = 0 : i64, scratch_operands = 0 : i64, tpu.core_type = #tpu.core_type<tc>, window_params = [{transform_indices = @transform_0, window_bounds = array<i64: 30, 16, 43>}, {pipeline_mode = #tpu.pipeline_mode<synchronous>, transform_indices = @transform_1, window_bounds = array<i64: 3, 43, 64>}, {pipeline_mode = #tpu.pipeline_mode<synchronous>, transform_indices = @transform_2, window_bounds = array<i64: 1, 64>}, {pipeline_mode = #tpu.pipeline_mode<synchronous>, transform_indices = @transform_3, window_bounds = array<i64: 1, 64>}, {pipeline_mode = #tpu.pipeline_mode<synchronous>, transform_indices = @transform_4, window_bounds = array<i64: 1, 64>}, {pipeline_mode = #tpu.pipeline_mode<synchronous>, transform_indices = @transform_5, window_bounds = array<i64: 3, 64, 64>}, {pipeline_mode = #tpu.pipeline_mode<synchronous>, transform_indices = @transform_6, window_bounds = array<i64: 1, 64>}, {pipeline_mode = #tpu.pipeline_mode<synchronous>, transform_indices = @transform_7, window_bounds = array<i64: 1, 64>}, {pipeline_mode = #tpu.pipeline_mode<synchronous>, transform_indices = @transform_8, window_bounds = array<i64: 1, 64>}, {pipeline_mode = #tpu.pipeline_mode<synchronous>, transform_indices = @transform_9, window_bounds = array<i64: 3, 64, 128>}, {pipeline_mode = #tpu.pipeline_mode<synchronous>, transform_indices = @transform_10, window_bounds = array<i64: 1, 128>}, {pipeline_mode = #tpu.pipeline_mode<synchronous>, transform_indices = @transform_11, window_bounds = array<i64: 1, 128>}, {pipeline_mode = #tpu.pipeline_mode<synchronous>, transform_indices = @transform_12, window_bounds = array<i64: 1, 128>}, {pipeline_mode = #tpu.pipeline_mode<synchronous>, transform_indices = @transform_13, window_bounds = array<i64: 1152, 128>}, {pipeline_mode = #tpu.pipeline_mode<synchronous>, transform_indices = @transform_14, window_bounds = array<i64: 1, 128>}, {transform_indices = @transform_15, window_bounds = array<i64: 16, 128>}]} {
    %c0 = arith.constant 0 : index
    %c0_0 = arith.constant 0 : index
    %c0_1 = arith.constant 0 : index
    %0 = vector.load %arg1[%c0, %c0_0, %c0_1] : memref<30x16x43xf32, #tpu.memory_space<vmem>>, vector<30x16x43xf32>
    %1 = vector.extract_strided_slice %0 {offsets = [0, 0, 0], sizes = [28, 16, 43], strides = [1, 1, 1]} : vector<30x16x43xf32> to vector<28x16x43xf32>
    %2 = vector.shape_cast %1 : vector<28x16x43xf32> to vector<448x43xf32>
    %c0_2 = arith.constant 0 : index
    %c0_3 = arith.constant 0 : index
    %c0_4 = arith.constant 0 : index
    %3 = vector.load %arg2[%c0_2, %c0_3, %c0_4] : memref<3x43x64xf32, #tpu.memory_space<vmem>>, vector<1x43x64xf32>
    %4 = vector.shape_cast %3 : vector<1x43x64xf32> to vector<43x64xf32>
    %5 = arith.truncf %2 : vector<448x43xf32> to vector<448x43xbf16>
    %6 = arith.truncf %4 : vector<43x64xf32> to vector<43x64xbf16>
    %cst = arith.constant dense<0.000000e+00> : vector<448x64xf32>
    %7 = tpu.matmul %5, %6, %cst {dimension_numbers = #tpu.dot_dimension_numbers<[1], [0], [0], [1], [0, 0, 1, 1], [], []>} : vector<448x43xbf16>, vector<43x64xbf16>, vector<448x64xf32> -> vector<448x64xf32>
    %8 = vector.extract_strided_slice %0 {offsets = [1, 0, 0], sizes = [28, 16, 43], strides = [1, 1, 1]} : vector<30x16x43xf32> to vector<28x16x43xf32>
    %9 = vector.shape_cast %8 : vector<28x16x43xf32> to vector<448x43xf32>
    %c1 = arith.constant 1 : index
    %c0_5 = arith.constant 0 : index
    %c0_6 = arith.constant 0 : index
    %10 = vector.load %arg2[%c1, %c0_5, %c0_6] : memref<3x43x64xf32, #tpu.memory_space<vmem>>, vector<1x43x64xf32>
    %11 = vector.shape_cast %10 : vector<1x43x64xf32> to vector<43x64xf32>
    %12 = arith.truncf %9 : vector<448x43xf32> to vector<448x43xbf16>
    %13 = arith.truncf %11 : vector<43x64xf32> to vector<43x64xbf16>
    %cst_7 = arith.constant dense<0.000000e+00> : vector<448x64xf32>
    %14 = tpu.matmul %12, %13, %cst_7 {dimension_numbers = #tpu.dot_dimension_numbers<[1], [0], [0], [1], [0, 0, 1, 1], [], []>} : vector<448x43xbf16>, vector<43x64xbf16>, vector<448x64xf32> -> vector<448x64xf32>
    %15 = arith.addf %7, %14 : vector<448x64xf32>
    %16 = vector.extract_strided_slice %0 {offsets = [2, 0, 0], sizes = [28, 16, 43], strides = [1, 1, 1]} : vector<30x16x43xf32> to vector<28x16x43xf32>
    %17 = vector.shape_cast %16 : vector<28x16x43xf32> to vector<448x43xf32>
    %c2 = arith.constant 2 : index
    %c0_8 = arith.constant 0 : index
    %c0_9 = arith.constant 0 : index
    %18 = vector.load %arg2[%c2, %c0_8, %c0_9] : memref<3x43x64xf32, #tpu.memory_space<vmem>>, vector<1x43x64xf32>
    %19 = vector.shape_cast %18 : vector<1x43x64xf32> to vector<43x64xf32>
    %20 = arith.truncf %17 : vector<448x43xf32> to vector<448x43xbf16>
    %21 = arith.truncf %19 : vector<43x64xf32> to vector<43x64xbf16>
    %cst_10 = arith.constant dense<0.000000e+00> : vector<448x64xf32>
    %22 = tpu.matmul %20, %21, %cst_10 {dimension_numbers = #tpu.dot_dimension_numbers<[1], [0], [0], [1], [0, 0, 1, 1], [], []>} : vector<448x43xbf16>, vector<43x64xbf16>, vector<448x64xf32> -> vector<448x64xf32>
    %23 = arith.addf %15, %22 : vector<448x64xf32>
    %c0_11 = arith.constant 0 : index
    %c0_12 = arith.constant 0 : index
    %24 = vector.load %arg3[%c0_11, %c0_12] : memref<1x64xf32, #tpu.memory_space<vmem>>, vector<1x64xf32>
    %25 = vector.broadcast %24 : vector<1x64xf32> to vector<448x64xf32>
    %26 = arith.addf %23, %25 : vector<448x64xf32>
    %c0_13 = arith.constant 0 : index
    %c0_14 = arith.constant 0 : index
    %27 = vector.load %arg4[%c0_13, %c0_14] : memref<1x64xf32, #tpu.memory_space<vmem>>, vector<1x64xf32>
    %28 = vector.broadcast %27 : vector<1x64xf32> to vector<448x64xf32>
    %29 = arith.mulf %26, %28 : vector<448x64xf32>
    %c0_15 = arith.constant 0 : index
    %c0_16 = arith.constant 0 : index
    %30 = vector.load %arg5[%c0_15, %c0_16] : memref<1x64xf32, #tpu.memory_space<vmem>>, vector<1x64xf32>
    %31 = vector.broadcast %30 : vector<1x64xf32> to vector<448x64xf32>
    %32 = arith.addf %29, %31 : vector<448x64xf32>
    %cst_17 = arith.constant 0.000000e+00 : f32
    %33 = vector.broadcast %cst_17 : f32 to vector<448x64xf32>
    %34 = arith.maximumf %32, %33 : vector<448x64xf32>
    %35 = vector.shape_cast %34 : vector<448x64xf32> to vector<28x16x64xf32>
    %36 = vector.extract_strided_slice %35 {offsets = [0, 0, 0], sizes = [24, 16, 64], strides = [1, 1, 1]} : vector<28x16x64xf32> to vector<24x16x64xf32>
    %37 = vector.extract_strided_slice %35 {offsets = [1, 0, 0], sizes = [24, 16, 64], strides = [1, 1, 1]} : vector<28x16x64xf32> to vector<24x16x64xf32>
    %38 = arith.maximumf %36, %37 : vector<24x16x64xf32>
    %39 = vector.extract_strided_slice %35 {offsets = [2, 0, 0], sizes = [24, 16, 64], strides = [1, 1, 1]} : vector<28x16x64xf32> to vector<24x16x64xf32>
    %40 = arith.maximumf %38, %39 : vector<24x16x64xf32>
    %41 = vector.extract_strided_slice %35 {offsets = [3, 0, 0], sizes = [24, 16, 64], strides = [1, 1, 1]} : vector<28x16x64xf32> to vector<24x16x64xf32>
    %42 = arith.maximumf %40, %41 : vector<24x16x64xf32>
    %43 = vector.extract_strided_slice %35 {offsets = [4, 0, 0], sizes = [24, 16, 64], strides = [1, 1, 1]} : vector<28x16x64xf32> to vector<24x16x64xf32>
    %44 = arith.maximumf %42, %43 : vector<24x16x64xf32>
    %45 = vector.extract_strided_slice %44 {offsets = [0, 0, 0], sizes = [22, 16, 64], strides = [1, 1, 1]} : vector<24x16x64xf32> to vector<22x16x64xf32>
    %46 = vector.shape_cast %45 : vector<22x16x64xf32> to vector<352x64xf32>
    %c0_18 = arith.constant 0 : index
    %c0_19 = arith.constant 0 : index
    %c0_20 = arith.constant 0 : index
    %47 = vector.load %arg6[%c0_18, %c0_19, %c0_20] : memref<3x64x64xf32, #tpu.memory_space<vmem>>, vector<1x64x64xf32>
    %48 = vector.shape_cast %47 : vector<1x64x64xf32> to vector<64x64xf32>
    %49 = arith.truncf %46 : vector<352x64xf32> to vector<352x64xbf16>
    %50 = arith.truncf %48 : vector<64x64xf32> to vector<64x64xbf16>
    %cst_21 = arith.constant dense<0.000000e+00> : vector<352x64xf32>
    %51 = tpu.matmul %49, %50, %cst_21 {dimension_numbers = #tpu.dot_dimension_numbers<[1], [0], [0], [1], [0, 0, 1, 1], [], []>} : vector<352x64xbf16>, vector<64x64xbf16>, vector<352x64xf32> -> vector<352x64xf32>
    %52 = vector.extract_strided_slice %44 {offsets = [1, 0, 0], sizes = [22, 16, 64], strides = [1, 1, 1]} : vector<24x16x64xf32> to vector<22x16x64xf32>
    %53 = vector.shape_cast %52 : vector<22x16x64xf32> to vector<352x64xf32>
    %c1_22 = arith.constant 1 : index
    %c0_23 = arith.constant 0 : index
    %c0_24 = arith.constant 0 : index
    %54 = vector.load %arg6[%c1_22, %c0_23, %c0_24] : memref<3x64x64xf32, #tpu.memory_space<vmem>>, vector<1x64x64xf32>
    %55 = vector.shape_cast %54 : vector<1x64x64xf32> to vector<64x64xf32>
    %56 = arith.truncf %53 : vector<352x64xf32> to vector<352x64xbf16>
    %57 = arith.truncf %55 : vector<64x64xf32> to vector<64x64xbf16>
    %cst_25 = arith.constant dense<0.000000e+00> : vector<352x64xf32>
    %58 = tpu.matmul %56, %57, %cst_25 {dimension_numbers = #tpu.dot_dimension_numbers<[1], [0], [0], [1], [0, 0, 1, 1], [], []>} : vector<352x64xbf16>, vector<64x64xbf16>, vector<352x64xf32> -> vector<352x64xf32>
    %59 = arith.addf %51, %58 : vector<352x64xf32>
    %60 = vector.extract_strided_slice %44 {offsets = [2, 0, 0], sizes = [22, 16, 64], strides = [1, 1, 1]} : vector<24x16x64xf32> to vector<22x16x64xf32>
    %61 = vector.shape_cast %60 : vector<22x16x64xf32> to vector<352x64xf32>
    %c2_26 = arith.constant 2 : index
    %c0_27 = arith.constant 0 : index
    %c0_28 = arith.constant 0 : index
    %62 = vector.load %arg6[%c2_26, %c0_27, %c0_28] : memref<3x64x64xf32, #tpu.memory_space<vmem>>, vector<1x64x64xf32>
    %63 = vector.shape_cast %62 : vector<1x64x64xf32> to vector<64x64xf32>
    %64 = arith.truncf %61 : vector<352x64xf32> to vector<352x64xbf16>
    %65 = arith.truncf %63 : vector<64x64xf32> to vector<64x64xbf16>
    %cst_29 = arith.constant dense<0.000000e+00> : vector<352x64xf32>
    %66 = tpu.matmul %64, %65, %cst_29 {dimension_numbers = #tpu.dot_dimension_numbers<[1], [0], [0], [1], [0, 0, 1, 1], [], []>} : vector<352x64xbf16>, vector<64x64xbf16>, vector<352x64xf32> -> vector<352x64xf32>
    %67 = arith.addf %59, %66 : vector<352x64xf32>
    %c0_30 = arith.constant 0 : index
    %c0_31 = arith.constant 0 : index
    %68 = vector.load %arg7[%c0_30, %c0_31] : memref<1x64xf32, #tpu.memory_space<vmem>>, vector<1x64xf32>
    %69 = vector.broadcast %68 : vector<1x64xf32> to vector<352x64xf32>
    %70 = arith.addf %67, %69 : vector<352x64xf32>
    %c0_32 = arith.constant 0 : index
    %c0_33 = arith.constant 0 : index
    %71 = vector.load %arg8[%c0_32, %c0_33] : memref<1x64xf32, #tpu.memory_space<vmem>>, vector<1x64xf32>
    %72 = vector.broadcast %71 : vector<1x64xf32> to vector<352x64xf32>
    %73 = arith.mulf %70, %72 : vector<352x64xf32>
    %c0_34 = arith.constant 0 : index
    %c0_35 = arith.constant 0 : index
    %74 = vector.load %arg9[%c0_34, %c0_35] : memref<1x64xf32, #tpu.memory_space<vmem>>, vector<1x64xf32>
    %75 = vector.broadcast %74 : vector<1x64xf32> to vector<352x64xf32>
    %76 = arith.addf %73, %75 : vector<352x64xf32>
    %cst_36 = arith.constant 0.000000e+00 : f32
    %77 = vector.broadcast %cst_36 : f32 to vector<352x64xf32>
    %78 = arith.maximumf %76, %77 : vector<352x64xf32>
    %79 = vector.shape_cast %78 : vector<352x64xf32> to vector<22x16x64xf32>
    %80 = vector.shape_cast %79 : vector<22x16x64xf32> to vector<11x32x64xf32>
    %81 = vector.extract_strided_slice %80 {offsets = [0, 0, 0], sizes = [11, 16, 64], strides = [1, 1, 1]} : vector<11x32x64xf32> to vector<11x16x64xf32>
    %82 = vector.extract_strided_slice %80 {offsets = [0, 16, 0], sizes = [11, 16, 64], strides = [1, 1, 1]} : vector<11x32x64xf32> to vector<11x16x64xf32>
    %83 = arith.maximumf %81, %82 : vector<11x16x64xf32>
    %84 = vector.extract_strided_slice %83 {offsets = [0, 0, 0], sizes = [9, 16, 64], strides = [1, 1, 1]} : vector<11x16x64xf32> to vector<9x16x64xf32>
    %85 = vector.shape_cast %84 : vector<9x16x64xf32> to vector<144x64xf32>
    %c0_37 = arith.constant 0 : index
    %c0_38 = arith.constant 0 : index
    %c0_39 = arith.constant 0 : index
    %86 = vector.load %arg10[%c0_37, %c0_38, %c0_39] : memref<3x64x128xf32, #tpu.memory_space<vmem>>, vector<1x64x128xf32>
    %87 = vector.shape_cast %86 : vector<1x64x128xf32> to vector<64x128xf32>
    %88 = arith.truncf %85 : vector<144x64xf32> to vector<144x64xbf16>
    %89 = arith.truncf %87 : vector<64x128xf32> to vector<64x128xbf16>
    %cst_40 = arith.constant dense<0.000000e+00> : vector<144x128xf32>
    %90 = tpu.matmul %88, %89, %cst_40 {dimension_numbers = #tpu.dot_dimension_numbers<[1], [0], [0], [1], [0, 0, 1, 1], [], []>} : vector<144x64xbf16>, vector<64x128xbf16>, vector<144x128xf32> -> vector<144x128xf32>
    %91 = vector.extract_strided_slice %83 {offsets = [1, 0, 0], sizes = [9, 16, 64], strides = [1, 1, 1]} : vector<11x16x64xf32> to vector<9x16x64xf32>
    %92 = vector.shape_cast %91 : vector<9x16x64xf32> to vector<144x64xf32>
    %c1_41 = arith.constant 1 : index
    %c0_42 = arith.constant 0 : index
    %c0_43 = arith.constant 0 : index
    %93 = vector.load %arg10[%c1_41, %c0_42, %c0_43] : memref<3x64x128xf32, #tpu.memory_space<vmem>>, vector<1x64x128xf32>
    %94 = vector.shape_cast %93 : vector<1x64x128xf32> to vector<64x128xf32>
    %95 = arith.truncf %92 : vector<144x64xf32> to vector<144x64xbf16>
    %96 = arith.truncf %94 : vector<64x128xf32> to vector<64x128xbf16>
    %cst_44 = arith.constant dense<0.000000e+00> : vector<144x128xf32>
    %97 = tpu.matmul %95, %96, %cst_44 {dimension_numbers = #tpu.dot_dimension_numbers<[1], [0], [0], [1], [0, 0, 1, 1], [], []>} : vector<144x64xbf16>, vector<64x128xbf16>, vector<144x128xf32> -> vector<144x128xf32>
    %98 = arith.addf %90, %97 : vector<144x128xf32>
    %99 = vector.extract_strided_slice %83 {offsets = [2, 0, 0], sizes = [9, 16, 64], strides = [1, 1, 1]} : vector<11x16x64xf32> to vector<9x16x64xf32>
    %100 = vector.shape_cast %99 : vector<9x16x64xf32> to vector<144x64xf32>
    %c2_45 = arith.constant 2 : index
    %c0_46 = arith.constant 0 : index
    %c0_47 = arith.constant 0 : index
    %101 = vector.load %arg10[%c2_45, %c0_46, %c0_47] : memref<3x64x128xf32, #tpu.memory_space<vmem>>, vector<1x64x128xf32>
    %102 = vector.shape_cast %101 : vector<1x64x128xf32> to vector<64x128xf32>
    %103 = arith.truncf %100 : vector<144x64xf32> to vector<144x64xbf16>
    %104 = arith.truncf %102 : vector<64x128xf32> to vector<64x128xbf16>
    %cst_48 = arith.constant dense<0.000000e+00> : vector<144x128xf32>
    %105 = tpu.matmul %103, %104, %cst_48 {dimension_numbers = #tpu.dot_dimension_numbers<[1], [0], [0], [1], [0, 0, 1, 1], [], []>} : vector<144x64xbf16>, vector<64x128xbf16>, vector<144x128xf32> -> vector<144x128xf32>
    %106 = arith.addf %98, %105 : vector<144x128xf32>
    %c0_49 = arith.constant 0 : index
    %c0_50 = arith.constant 0 : index
    %107 = vector.load %arg11[%c0_49, %c0_50] : memref<1x128xf32, #tpu.memory_space<vmem>>, vector<1x128xf32>
    %108 = vector.broadcast %107 : vector<1x128xf32> to vector<144x128xf32>
    %109 = arith.addf %106, %108 : vector<144x128xf32>
    %c0_51 = arith.constant 0 : index
    %c0_52 = arith.constant 0 : index
    %110 = vector.load %arg12[%c0_51, %c0_52] : memref<1x128xf32, #tpu.memory_space<vmem>>, vector<1x128xf32>
    %111 = vector.broadcast %110 : vector<1x128xf32> to vector<144x128xf32>
    %112 = arith.mulf %109, %111 : vector<144x128xf32>
    %c0_53 = arith.constant 0 : index
    %c0_54 = arith.constant 0 : index
    %113 = vector.load %arg13[%c0_53, %c0_54] : memref<1x128xf32, #tpu.memory_space<vmem>>, vector<1x128xf32>
    %114 = vector.broadcast %113 : vector<1x128xf32> to vector<144x128xf32>
    %115 = arith.addf %112, %114 : vector<144x128xf32>
    %cst_55 = arith.constant 0.000000e+00 : f32
    %116 = vector.broadcast %cst_55 : f32 to vector<144x128xf32>
    %117 = arith.maximumf %115, %116 : vector<144x128xf32>
    %118 = vector.shape_cast %117 : vector<144x128xf32> to vector<9x16x128xf32>
    %119 = vector.extract_strided_slice %118 {offsets = [0, 0, 0], sizes = [1, 16, 128], strides = [1, 1, 1]} : vector<9x16x128xf32> to vector<1x16x128xf32>
    %120 = vector.shape_cast %119 : vector<1x16x128xf32> to vector<16x128xf32>
    %121 = vector.extract_strided_slice %118 {offsets = [1, 0, 0], sizes = [1, 16, 128], strides = [1, 1, 1]} : vector<9x16x128xf32> to vector<1x16x128xf32>
    %122 = vector.shape_cast %121 : vector<1x16x128xf32> to vector<16x128xf32>
    %123 = vector.extract_strided_slice %118 {offsets = [2, 0, 0], sizes = [1, 16, 128], strides = [1, 1, 1]} : vector<9x16x128xf32> to vector<1x16x128xf32>
    %124 = vector.shape_cast %123 : vector<1x16x128xf32> to vector<16x128xf32>
    %125 = vector.extract_strided_slice %118 {offsets = [3, 0, 0], sizes = [1, 16, 128], strides = [1, 1, 1]} : vector<9x16x128xf32> to vector<1x16x128xf32>
    %126 = vector.shape_cast %125 : vector<1x16x128xf32> to vector<16x128xf32>
    %127 = vector.extract_strided_slice %118 {offsets = [4, 0, 0], sizes = [1, 16, 128], strides = [1, 1, 1]} : vector<9x16x128xf32> to vector<1x16x128xf32>
    %128 = vector.shape_cast %127 : vector<1x16x128xf32> to vector<16x128xf32>
    %129 = vector.extract_strided_slice %118 {offsets = [5, 0, 0], sizes = [1, 16, 128], strides = [1, 1, 1]} : vector<9x16x128xf32> to vector<1x16x128xf32>
    %130 = vector.shape_cast %129 : vector<1x16x128xf32> to vector<16x128xf32>
    %131 = vector.extract_strided_slice %118 {offsets = [6, 0, 0], sizes = [1, 16, 128], strides = [1, 1, 1]} : vector<9x16x128xf32> to vector<1x16x128xf32>
    %132 = vector.shape_cast %131 : vector<1x16x128xf32> to vector<16x128xf32>
    %133 = vector.extract_strided_slice %118 {offsets = [7, 0, 0], sizes = [1, 16, 128], strides = [1, 1, 1]} : vector<9x16x128xf32> to vector<1x16x128xf32>
    %134 = vector.shape_cast %133 : vector<1x16x128xf32> to vector<16x128xf32>
    %135 = vector.extract_strided_slice %118 {offsets = [8, 0, 0], sizes = [1, 16, 128], strides = [1, 1, 1]} : vector<9x16x128xf32> to vector<1x16x128xf32>
    %136 = vector.shape_cast %135 : vector<1x16x128xf32> to vector<16x128xf32>
    %137 = tpu.concatenate %120, %122, %124, %126, %128, %130, %132, %134, %136 in 1 : vector<16x128xf32>, vector<16x128xf32>, vector<16x128xf32>, vector<16x128xf32>, vector<16x128xf32>, vector<16x128xf32>, vector<16x128xf32>, vector<16x128xf32>, vector<16x128xf32> -> vector<16x1152xf32>
    %c0_56 = arith.constant 0 : index
    %c0_57 = arith.constant 0 : index
    %138 = vector.load %arg14[%c0_56, %c0_57] : memref<1152x128xf32, #tpu.memory_space<vmem>>, vector<1152x128xf32>
    %139 = arith.truncf %137 : vector<16x1152xf32> to vector<16x1152xbf16>
    %140 = arith.truncf %138 : vector<1152x128xf32> to vector<1152x128xbf16>
    %cst_58 = arith.constant dense<0.000000e+00> : vector<16x128xf32>
    %141 = tpu.matmul %139, %140, %cst_58 {dimension_numbers = #tpu.dot_dimension_numbers<[1], [0], [0], [1], [0, 0, 1, 1], [], []>} : vector<16x1152xbf16>, vector<1152x128xbf16>, vector<16x128xf32> -> vector<16x128xf32>
    %c0_59 = arith.constant 0 : index
    %c0_60 = arith.constant 0 : index
    %142 = vector.load %arg15[%c0_59, %c0_60] : memref<1x128xf32, #tpu.memory_space<vmem>>, vector<1x128xf32>
    %143 = vector.broadcast %142 : vector<1x128xf32> to vector<16x128xf32>
    %144 = arith.addf %141, %143 : vector<16x128xf32>
    %cst_61 = arith.constant 0.000000e+00 : f32
    %145 = vector.broadcast %cst_61 : f32 to vector<16x128xf32>
    %146 = arith.maximumf %144, %145 : vector<16x128xf32>
    %c0_62 = arith.constant 0 : index
    %c0_63 = arith.constant 0 : index
    %147 = vector.load %arg16[%c0_62, %c0_63] : memref<16x128xf32, #tpu.memory_space<vmem>>, vector<16x128xf32>
    tpu.vector_store %arg16[%c0_62, %c0_63], %146 {strides = array<i32>} : memref<16x128xf32, #tpu.memory_space<vmem>>, vector<16x128xf32>,
    return
  }
  func.func @transform_0(%arg0: i32) -> (i32, i32, i32) {
    %c0_i32 = arith.constant 0 : i32
    %c0_i32_0 = arith.constant 0 : i32
    %c0_i32_1 = arith.constant 0 : i32
    return %c0_i32, %arg0, %c0_i32_0 : i32, i32, i32
  }
  func.func @transform_1(%arg0: i32) -> (i32, i32, i32) {
    %c0_i32 = arith.constant 0 : i32
    %c0_i32_0 = arith.constant 0 : i32
    %c0_i32_1 = arith.constant 0 : i32
    %c0_i32_2 = arith.constant 0 : i32
    return %c0_i32, %c0_i32_0, %c0_i32_1 : i32, i32, i32
  }
  func.func @transform_2(%arg0: i32) -> (i32, i32) {
    %c0_i32 = arith.constant 0 : i32
    %c0_i32_0 = arith.constant 0 : i32
    %c0_i32_1 = arith.constant 0 : i32
    return %c0_i32, %c0_i32_0 : i32, i32
  }
  func.func @transform_3(%arg0: i32) -> (i32, i32) {
    %c0_i32 = arith.constant 0 : i32
    %c0_i32_0 = arith.constant 0 : i32
    %c0_i32_1 = arith.constant 0 : i32
    return %c0_i32, %c0_i32_0 : i32, i32
  }
  func.func @transform_4(%arg0: i32) -> (i32, i32) {
    %c0_i32 = arith.constant 0 : i32
    %c0_i32_0 = arith.constant 0 : i32
    %c0_i32_1 = arith.constant 0 : i32
    return %c0_i32, %c0_i32_0 : i32, i32
  }
  func.func @transform_5(%arg0: i32) -> (i32, i32, i32) {
    %c0_i32 = arith.constant 0 : i32
    %c0_i32_0 = arith.constant 0 : i32
    %c0_i32_1 = arith.constant 0 : i32
    %c0_i32_2 = arith.constant 0 : i32
    return %c0_i32, %c0_i32_0, %c0_i32_1 : i32, i32, i32
  }
  func.func @transform_6(%arg0: i32) -> (i32, i32) {
    %c0_i32 = arith.constant 0 : i32
    %c0_i32_0 = arith.constant 0 : i32
    %c0_i32_1 = arith.constant 0 : i32
    return %c0_i32, %c0_i32_0 : i32, i32
  }
  func.func @transform_7(%arg0: i32) -> (i32, i32) {
    %c0_i32 = arith.constant 0 : i32
    %c0_i32_0 = arith.constant 0 : i32
    %c0_i32_1 = arith.constant 0 : i32
    return %c0_i32, %c0_i32_0 : i32, i32
  }
  func.func @transform_8(%arg0: i32) -> (i32, i32) {
    %c0_i32 = arith.constant 0 : i32
    %c0_i32_0 = arith.constant 0 : i32
    %c0_i32_1 = arith.constant 0 : i32
    return %c0_i32, %c0_i32_0 : i32, i32
  }
  func.func @transform_9(%arg0: i32) -> (i32, i32, i32) {
    %c0_i32 = arith.constant 0 : i32
    %c0_i32_0 = arith.constant 0 : i32
    %c0_i32_1 = arith.constant 0 : i32
    %c0_i32_2 = arith.constant 0 : i32
    return %c0_i32, %c0_i32_0, %c0_i32_1 : i32, i32, i32
  }
  func.func @transform_10(%arg0: i32) -> (i32, i32) {
    %c0_i32 = arith.constant 0 : i32
    %c0_i32_0 = arith.constant 0 : i32
    %c0_i32_1 = arith.constant 0 : i32
    return %c0_i32, %c0_i32_0 : i32, i32
  }
  func.func @transform_11(%arg0: i32) -> (i32, i32) {
    %c0_i32 = arith.constant 0 : i32
    %c0_i32_0 = arith.constant 0 : i32
    %c0_i32_1 = arith.constant 0 : i32
    return %c0_i32, %c0_i32_0 : i32, i32
  }
  func.func @transform_12(%arg0: i32) -> (i32, i32) {
    %c0_i32 = arith.constant 0 : i32
    %c0_i32_0 = arith.constant 0 : i32
    %c0_i32_1 = arith.constant 0 : i32
    return %c0_i32, %c0_i32_0 : i32, i32
  }
  func.func @transform_13(%arg0: i32) -> (i32, i32) {
    %c0_i32 = arith.constant 0 : i32
    %c0_i32_0 = arith.constant 0 : i32
    %c0_i32_1 = arith.constant 0 : i32
    return %c0_i32, %c0_i32_0 : i32, i32
  }
  func.func @transform_14(%arg0: i32) -> (i32, i32) {
    %c0_i32 = arith.constant 0 : i32
    %c0_i32_0 = arith.constant 0 : i32
    %c0_i32_1 = arith.constant 0 : i32
    return %c0_i32, %c0_i32_0 : i32, i32
  }
  func.func @transform_15(%arg0: i32) -> (i32, i32) {
    %c0_i32 = arith.constant 0 : i32
    %c0_i32_0 = arith.constant 0 : i32
    return %arg0, %c0_i32 : i32, i32
  }
}

module attributes {stable_mosaic.version = 11 : i64} {
  func.func @gru_head_kernel(%arg0: i32, %arg1: memref<8x1xi32, #tpu.memory_space<vmem>>, %arg2: memref<64x128xf32, #tpu.memory_space<vmem>>, %arg3: memref<128x384xf32, #tpu.memory_space<vmem>>, %arg4: memref<128x384xf32, #tpu.memory_space<vmem>>, %arg5: memref<1x384xf32, #tpu.memory_space<vmem>>, %arg6: memref<1x384xf32, #tpu.memory_space<vmem>>, %arg7: memref<128x16xf32, #tpu.memory_space<vmem>>, %arg8: memref<1x16xf32, #tpu.memory_space<vmem>>, %arg9: memref<16x2xf32, #tpu.memory_space<vmem>>, %arg10: memref<1x2xf32, #tpu.memory_space<vmem>>, %arg11: memref<8x2xf32, #tpu.memory_space<vmem>>, %arg12: memref<8x8x384xf32, #tpu.memory_space<vmem>>) attributes {dimension_semantics = [#tpu.dimension_semantics<arbitrary>], iteration_bounds = array<i64: 1>, scalar_prefetch = 0 : i64, scratch_operands = 1 : i64, tpu.core_type = #tpu.core_type<tc>, window_params = [{pipeline_mode = #tpu.pipeline_mode<synchronous>, transform_indices = @transform_0, window_bounds = array<i64: 8, 1>}, {pipeline_mode = #tpu.pipeline_mode<synchronous>, transform_indices = @transform_1, window_bounds = array<i64: 64, 128>}, {pipeline_mode = #tpu.pipeline_mode<synchronous>, transform_indices = @transform_2, window_bounds = array<i64: 128, 384>}, {pipeline_mode = #tpu.pipeline_mode<synchronous>, transform_indices = @transform_3, window_bounds = array<i64: 128, 384>}, {pipeline_mode = #tpu.pipeline_mode<synchronous>, transform_indices = @transform_4, window_bounds = array<i64: 1, 384>}, {pipeline_mode = #tpu.pipeline_mode<synchronous>, transform_indices = @transform_5, window_bounds = array<i64: 1, 384>}, {pipeline_mode = #tpu.pipeline_mode<synchronous>, transform_indices = @transform_6, window_bounds = array<i64: 128, 16>}, {pipeline_mode = #tpu.pipeline_mode<synchronous>, transform_indices = @transform_7, window_bounds = array<i64: 1, 16>}, {pipeline_mode = #tpu.pipeline_mode<synchronous>, transform_indices = @transform_8, window_bounds = array<i64: 16, 2>}, {pipeline_mode = #tpu.pipeline_mode<synchronous>, transform_indices = @transform_9, window_bounds = array<i64: 1, 2>}, {pipeline_mode = #tpu.pipeline_mode<synchronous>, transform_indices = @transform_10, window_bounds = array<i64: 8, 2>}]} {
    %c0 = arith.constant 0 : index
    %c0_0 = arith.constant 0 : index
    %0 = vector.load %arg2[%c0, %c0_0] : memref<64x128xf32, #tpu.memory_space<vmem>>, vector<64x128xf32>
    %c0_1 = arith.constant 0 : index
    %c0_2 = arith.constant 0 : index
    %1 = vector.load %arg3[%c0_1, %c0_2] : memref<128x384xf32, #tpu.memory_space<vmem>>, vector<128x384xf32>
    %2 = arith.truncf %0 : vector<64x128xf32> to vector<64x128xbf16>
    %3 = arith.truncf %1 : vector<128x384xf32> to vector<128x384xbf16>
    %cst = arith.constant dense<0.000000e+00> : vector<64x384xf32>
    %4 = tpu.matmul %2, %3, %cst {dimension_numbers = #tpu.dot_dimension_numbers<[1], [0], [0], [1], [0, 0, 1, 1], [], []>} : vector<64x128xbf16>, vector<128x384xbf16>, vector<64x384xf32> -> vector<64x384xf32>
    %c0_3 = arith.constant 0 : index
    %c0_4 = arith.constant 0 : index
    %5 = vector.load %arg5[%c0_3, %c0_4] : memref<1x384xf32, #tpu.memory_space<vmem>>, vector<1x384xf32>
    %6 = vector.broadcast %5 : vector<1x384xf32> to vector<64x384xf32>
    %7 = arith.addf %4, %6 : vector<64x384xf32>
    %8 = vector.shape_cast %7 : vector<64x384xf32> to vector<8x8x384xf32>
    %c0_5 = arith.constant 0 : index
    %c0_6 = arith.constant 0 : index
    %c0_7 = arith.constant 0 : index
    %9 = vector.load %arg12[%c0_5, %c0_6, %c0_7] : memref<8x8x384xf32, #tpu.memory_space<vmem>>, vector<8x8x384xf32>
    tpu.vector_store %arg12[%c0_5, %c0_6, %c0_7], %8 {strides = array<i32>} : memref<8x8x384xf32, #tpu.memory_space<vmem>>, vector<8x8x384xf32>,
    %c0_8 = arith.constant 0 : index
    %c0_9 = arith.constant 0 : index
    %10 = vector.load %arg1[%c0_8, %c0_9] : memref<8x1xi32, #tpu.memory_space<vmem>>, vector<8x1xi32>
    %c0_10 = arith.constant 0 : index
    %c0_11 = arith.constant 0 : index
    %11 = vector.load %arg4[%c0_10, %c0_11] : memref<128x384xf32, #tpu.memory_space<vmem>>, vector<128x384xf32>
    %c0_12 = arith.constant 0 : index
    %c0_13 = arith.constant 0 : index
    %12 = vector.load %arg6[%c0_12, %c0_13] : memref<1x384xf32, #tpu.memory_space<vmem>>, vector<1x384xf32>
    %cst_14 = arith.constant 0.000000e+00 : f32
    %13 = vector.broadcast %cst_14 : f32 to vector<8x128xf32>
    %c0_i32 = arith.constant 0 : i32
    %14 = arith.index_cast %c0_i32 : i32 to index
    %c0_15 = arith.constant 0 : index
    %c0_16 = arith.constant 0 : index
    %15 = vector.load %arg12[%14, %c0_15, %c0_16] : memref<8x8x384xf32, #tpu.memory_space<vmem>>, vector<1x8x384xf32>
    %16 = vector.shape_cast %15 : vector<1x8x384xf32> to vector<8x384xf32>
    %17 = arith.truncf %13 : vector<8x128xf32> to vector<8x128xbf16>
    %18 = arith.truncf %11 : vector<128x384xf32> to vector<128x384xbf16>
    %cst_17 = arith.constant dense<0.000000e+00> : vector<8x384xf32>
    %19 = tpu.matmul %17, %18, %cst_17 {dimension_numbers = #tpu.dot_dimension_numbers<[1], [0], [0], [1], [0, 0, 1, 1], [], []>} : vector<8x128xbf16>, vector<128x384xbf16>, vector<8x384xf32> -> vector<8x384xf32>
    %20 = vector.broadcast %12 : vector<1x384xf32> to vector<8x384xf32>
    %21 = arith.addf %19, %20 : vector<8x384xf32>
    %22 = vector.extract_strided_slice %16 {offsets = [0, 0], sizes = [8, 128], strides = [1, 1]} : vector<8x384xf32> to vector<8x128xf32>
    %23 = vector.extract_strided_slice %21 {offsets = [0, 0], sizes = [8, 128], strides = [1, 1]} : vector<8x384xf32> to vector<8x128xf32>
    %24 = arith.addf %22, %23 : vector<8x128xf32>
    %25 = arith.negf %24 : vector<8x128xf32>
    %26 = math.exp %25 : vector<8x128xf32>
    %cst_18 = arith.constant 1.000000e+00 : f32
    %27 = vector.broadcast %cst_18 : f32 to vector<8x128xf32>
    %28 = arith.addf %27, %26 : vector<8x128xf32>
    %29 = arith.divf %27, %28 : vector<8x128xf32>
    %30 = vector.extract_strided_slice %16 {offsets = [0, 128], sizes = [8, 128], strides = [1, 1]} : vector<8x384xf32> to vector<8x128xf32>
    %31 = vector.extract_strided_slice %21 {offsets = [0, 128], sizes = [8, 128], strides = [1, 1]} : vector<8x384xf32> to vector<8x128xf32>
    %32 = arith.addf %30, %31 : vector<8x128xf32>
    %33 = arith.negf %32 : vector<8x128xf32>
    %34 = math.exp %33 : vector<8x128xf32>
    %cst_19 = arith.constant 1.000000e+00 : f32
    %35 = vector.broadcast %cst_19 : f32 to vector<8x128xf32>
    %36 = arith.addf %35, %34 : vector<8x128xf32>
    %37 = arith.divf %35, %36 : vector<8x128xf32>
    %38 = vector.extract_strided_slice %16 {offsets = [0, 256], sizes = [8, 128], strides = [1, 1]} : vector<8x384xf32> to vector<8x128xf32>
    %39 = vector.extract_strided_slice %21 {offsets = [0, 256], sizes = [8, 128], strides = [1, 1]} : vector<8x384xf32> to vector<8x128xf32>
    %40 = arith.mulf %29, %39 : vector<8x128xf32>
    %41 = arith.addf %38, %40 : vector<8x128xf32>
    %42 = math.tanh %41 : vector<8x128xf32>
    %cst_20 = arith.constant 1.000000e+00 : f32
    %43 = vector.broadcast %cst_20 : f32 to vector<8x128xf32>
    %44 = arith.subf %43, %37 : vector<8x128xf32>
    %45 = arith.mulf %44, %42 : vector<8x128xf32>
    %46 = arith.mulf %37, %13 : vector<8x128xf32>
    %47 = arith.addf %45, %46 : vector<8x128xf32>
    %c1_i32 = arith.constant 1 : i32
    %48 = arith.addi %c0_i32, %c1_i32 : i32
    %49 = vector.broadcast %48 : i32 to vector<8x1xi32>
    %50 = arith.cmpi eq, %10, %49 : vector<8x1xi32>
    %51 = vector.shape_cast %50 : vector<8x1xi1> to vector<8x1xi1>
    %52 = vector.broadcast %51 : vector<8x1xi1> to vector<8x128xi1>
    %53 = arith.select %52, %47, %13 : vector<8x128xi1>, vector<8x128xf32>
    %c1_i32_21 = arith.constant 1 : i32
    %54 = arith.index_cast %c1_i32_21 : i32 to index
    %c0_22 = arith.constant 0 : index
    %c0_23 = arith.constant 0 : index
    %55 = vector.load %arg12[%54, %c0_22, %c0_23] : memref<8x8x384xf32, #tpu.memory_space<vmem>>, vector<1x8x384xf32>
    %56 = vector.shape_cast %55 : vector<1x8x384xf32> to vector<8x384xf32>
    %57 = arith.truncf %47 : vector<8x128xf32> to vector<8x128xbf16>
    %58 = arith.truncf %11 : vector<128x384xf32> to vector<128x384xbf16>
    %cst_24 = arith.constant dense<0.000000e+00> : vector<8x384xf32>
    %59 = tpu.matmul %57, %58, %cst_24 {dimension_numbers = #tpu.dot_dimension_numbers<[1], [0], [0], [1], [0, 0, 1, 1], [], []>} : vector<8x128xbf16>, vector<128x384xbf16>, vector<8x384xf32> -> vector<8x384xf32>
    %60 = vector.broadcast %12 : vector<1x384xf32> to vector<8x384xf32>
    %61 = arith.addf %59, %60 : vector<8x384xf32>
    %62 = vector.extract_strided_slice %56 {offsets = [0, 0], sizes = [8, 128], strides = [1, 1]} : vector<8x384xf32> to vector<8x128xf32>
    %63 = vector.extract_strided_slice %61 {offsets = [0, 0], sizes = [8, 128], strides = [1, 1]} : vector<8x384xf32> to vector<8x128xf32>
    %64 = arith.addf %62, %63 : vector<8x128xf32>
    %65 = arith.negf %64 : vector<8x128xf32>
    %66 = math.exp %65 : vector<8x128xf32>
    %cst_25 = arith.constant 1.000000e+00 : f32
    %67 = vector.broadcast %cst_25 : f32 to vector<8x128xf32>
    %68 = arith.addf %67, %66 : vector<8x128xf32>
    %69 = arith.divf %67, %68 : vector<8x128xf32>
    %70 = vector.extract_strided_slice %56 {offsets = [0, 128], sizes = [8, 128], strides = [1, 1]} : vector<8x384xf32> to vector<8x128xf32>
    %71 = vector.extract_strided_slice %61 {offsets = [0, 128], sizes = [8, 128], strides = [1, 1]} : vector<8x384xf32> to vector<8x128xf32>
    %72 = arith.addf %70, %71 : vector<8x128xf32>
    %73 = arith.negf %72 : vector<8x128xf32>
    %74 = math.exp %73 : vector<8x128xf32>
    %cst_26 = arith.constant 1.000000e+00 : f32
    %75 = vector.broadcast %cst_26 : f32 to vector<8x128xf32>
    %76 = arith.addf %75, %74 : vector<8x128xf32>
    %77 = arith.divf %75, %76 : vector<8x128xf32>
    %78 = vector.extract_strided_slice %56 {offsets = [0, 256], sizes = [8, 128], strides = [1, 1]} : vector<8x384xf32> to vector<8x128xf32>
    %79 = vector.extract_strided_slice %61 {offsets = [0, 256], sizes = [8, 128], strides = [1, 1]} : vector<8x384xf32> to vector<8x128xf32>
    %80 = arith.mulf %69, %79 : vector<8x128xf32>
    %81 = arith.addf %78, %80 : vector<8x128xf32>
    %82 = math.tanh %81 : vector<8x128xf32>
    %cst_27 = arith.constant 1.000000e+00 : f32
    %83 = vector.broadcast %cst_27 : f32 to vector<8x128xf32>
    %84 = arith.subf %83, %77 : vector<8x128xf32>
    %85 = arith.mulf %84, %82 : vector<8x128xf32>
    %86 = arith.mulf %77, %47 : vector<8x128xf32>
    %87 = arith.addf %85, %86 : vector<8x128xf32>
    %c1_i32_28 = arith.constant 1 : i32
    %88 = arith.addi %c1_i32_21, %c1_i32_28 : i32
    %89 = vector.broadcast %88 : i32 to vector<8x1xi32>
    %90 = arith.cmpi eq, %10, %89 : vector<8x1xi32>
    %91 = vector.shape_cast %90 : vector<8x1xi1> to vector<8x1xi1>
    %92 = vector.broadcast %91 : vector<8x1xi1> to vector<8x128xi1>
    %93 = arith.select %92, %87, %53 : vector<8x128xi1>, vector<8x128xf32>
    %c2_i32 = arith.constant 2 : i32
    %94 = arith.index_cast %c2_i32 : i32 to index
    %c0_29 = arith.constant 0 : index
    %c0_30 = arith.constant 0 : index
    %95 = vector.load %arg12[%94, %c0_29, %c0_30] : memref<8x8x384xf32, #tpu.memory_space<vmem>>, vector<1x8x384xf32>
    %96 = vector.shape_cast %95 : vector<1x8x384xf32> to vector<8x384xf32>
    %97 = arith.truncf %87 : vector<8x128xf32> to vector<8x128xbf16>
    %98 = arith.truncf %11 : vector<128x384xf32> to vector<128x384xbf16>
    %cst_31 = arith.constant dense<0.000000e+00> : vector<8x384xf32>
    %99 = tpu.matmul %97, %98, %cst_31 {dimension_numbers = #tpu.dot_dimension_numbers<[1], [0], [0], [1], [0, 0, 1, 1], [], []>} : vector<8x128xbf16>, vector<128x384xbf16>, vector<8x384xf32> -> vector<8x384xf32>
    %100 = vector.broadcast %12 : vector<1x384xf32> to vector<8x384xf32>
    %101 = arith.addf %99, %100 : vector<8x384xf32>
    %102 = vector.extract_strided_slice %96 {offsets = [0, 0], sizes = [8, 128], strides = [1, 1]} : vector<8x384xf32> to vector<8x128xf32>
    %103 = vector.extract_strided_slice %101 {offsets = [0, 0], sizes = [8, 128], strides = [1, 1]} : vector<8x384xf32> to vector<8x128xf32>
    %104 = arith.addf %102, %103 : vector<8x128xf32>
    %105 = arith.negf %104 : vector<8x128xf32>
    %106 = math.exp %105 : vector<8x128xf32>
    %cst_32 = arith.constant 1.000000e+00 : f32
    %107 = vector.broadcast %cst_32 : f32 to vector<8x128xf32>
    %108 = arith.addf %107, %106 : vector<8x128xf32>
    %109 = arith.divf %107, %108 : vector<8x128xf32>
    %110 = vector.extract_strided_slice %96 {offsets = [0, 128], sizes = [8, 128], strides = [1, 1]} : vector<8x384xf32> to vector<8x128xf32>
    %111 = vector.extract_strided_slice %101 {offsets = [0, 128], sizes = [8, 128], strides = [1, 1]} : vector<8x384xf32> to vector<8x128xf32>
    %112 = arith.addf %110, %111 : vector<8x128xf32>
    %113 = arith.negf %112 : vector<8x128xf32>
    %114 = math.exp %113 : vector<8x128xf32>
    %cst_33 = arith.constant 1.000000e+00 : f32
    %115 = vector.broadcast %cst_33 : f32 to vector<8x128xf32>
    %116 = arith.addf %115, %114 : vector<8x128xf32>
    %117 = arith.divf %115, %116 : vector<8x128xf32>
    %118 = vector.extract_strided_slice %96 {offsets = [0, 256], sizes = [8, 128], strides = [1, 1]} : vector<8x384xf32> to vector<8x128xf32>
    %119 = vector.extract_strided_slice %101 {offsets = [0, 256], sizes = [8, 128], strides = [1, 1]} : vector<8x384xf32> to vector<8x128xf32>
    %120 = arith.mulf %109, %119 : vector<8x128xf32>
    %121 = arith.addf %118, %120 : vector<8x128xf32>
    %122 = math.tanh %121 : vector<8x128xf32>
    %cst_34 = arith.constant 1.000000e+00 : f32
    %123 = vector.broadcast %cst_34 : f32 to vector<8x128xf32>
    %124 = arith.subf %123, %117 : vector<8x128xf32>
    %125 = arith.mulf %124, %122 : vector<8x128xf32>
    %126 = arith.mulf %117, %87 : vector<8x128xf32>
    %127 = arith.addf %125, %126 : vector<8x128xf32>
    %c1_i32_35 = arith.constant 1 : i32
    %128 = arith.addi %c2_i32, %c1_i32_35 : i32
    %129 = vector.broadcast %128 : i32 to vector<8x1xi32>
    %130 = arith.cmpi eq, %10, %129 : vector<8x1xi32>
    %131 = vector.shape_cast %130 : vector<8x1xi1> to vector<8x1xi1>
    %132 = vector.broadcast %131 : vector<8x1xi1> to vector<8x128xi1>
    %133 = arith.select %132, %127, %93 : vector<8x128xi1>, vector<8x128xf32>
    %c3_i32 = arith.constant 3 : i32
    %134 = arith.index_cast %c3_i32 : i32 to index
    %c0_36 = arith.constant 0 : index
    %c0_37 = arith.constant 0 : index
    %135 = vector.load %arg12[%134, %c0_36, %c0_37] : memref<8x8x384xf32, #tpu.memory_space<vmem>>, vector<1x8x384xf32>
    %136 = vector.shape_cast %135 : vector<1x8x384xf32> to vector<8x384xf32>
    %137 = arith.truncf %127 : vector<8x128xf32> to vector<8x128xbf16>
    %138 = arith.truncf %11 : vector<128x384xf32> to vector<128x384xbf16>
    %cst_38 = arith.constant dense<0.000000e+00> : vector<8x384xf32>
    %139 = tpu.matmul %137, %138, %cst_38 {dimension_numbers = #tpu.dot_dimension_numbers<[1], [0], [0], [1], [0, 0, 1, 1], [], []>} : vector<8x128xbf16>, vector<128x384xbf16>, vector<8x384xf32> -> vector<8x384xf32>
    %140 = vector.broadcast %12 : vector<1x384xf32> to vector<8x384xf32>
    %141 = arith.addf %139, %140 : vector<8x384xf32>
    %142 = vector.extract_strided_slice %136 {offsets = [0, 0], sizes = [8, 128], strides = [1, 1]} : vector<8x384xf32> to vector<8x128xf32>
    %143 = vector.extract_strided_slice %141 {offsets = [0, 0], sizes = [8, 128], strides = [1, 1]} : vector<8x384xf32> to vector<8x128xf32>
    %144 = arith.addf %142, %143 : vector<8x128xf32>
    %145 = arith.negf %144 : vector<8x128xf32>
    %146 = math.exp %145 : vector<8x128xf32>
    %cst_39 = arith.constant 1.000000e+00 : f32
    %147 = vector.broadcast %cst_39 : f32 to vector<8x128xf32>
    %148 = arith.addf %147, %146 : vector<8x128xf32>
    %149 = arith.divf %147, %148 : vector<8x128xf32>
    %150 = vector.extract_strided_slice %136 {offsets = [0, 128], sizes = [8, 128], strides = [1, 1]} : vector<8x384xf32> to vector<8x128xf32>
    %151 = vector.extract_strided_slice %141 {offsets = [0, 128], sizes = [8, 128], strides = [1, 1]} : vector<8x384xf32> to vector<8x128xf32>
    %152 = arith.addf %150, %151 : vector<8x128xf32>
    %153 = arith.negf %152 : vector<8x128xf32>
    %154 = math.exp %153 : vector<8x128xf32>
    %cst_40 = arith.constant 1.000000e+00 : f32
    %155 = vector.broadcast %cst_40 : f32 to vector<8x128xf32>
    %156 = arith.addf %155, %154 : vector<8x128xf32>
    %157 = arith.divf %155, %156 : vector<8x128xf32>
    %158 = vector.extract_strided_slice %136 {offsets = [0, 256], sizes = [8, 128], strides = [1, 1]} : vector<8x384xf32> to vector<8x128xf32>
    %159 = vector.extract_strided_slice %141 {offsets = [0, 256], sizes = [8, 128], strides = [1, 1]} : vector<8x384xf32> to vector<8x128xf32>
    %160 = arith.mulf %149, %159 : vector<8x128xf32>
    %161 = arith.addf %158, %160 : vector<8x128xf32>
    %162 = math.tanh %161 : vector<8x128xf32>
    %cst_41 = arith.constant 1.000000e+00 : f32
    %163 = vector.broadcast %cst_41 : f32 to vector<8x128xf32>
    %164 = arith.subf %163, %157 : vector<8x128xf32>
    %165 = arith.mulf %164, %162 : vector<8x128xf32>
    %166 = arith.mulf %157, %127 : vector<8x128xf32>
    %167 = arith.addf %165, %166 : vector<8x128xf32>
    %c1_i32_42 = arith.constant 1 : i32
    %168 = arith.addi %c3_i32, %c1_i32_42 : i32
    %169 = vector.broadcast %168 : i32 to vector<8x1xi32>
    %170 = arith.cmpi eq, %10, %169 : vector<8x1xi32>
    %171 = vector.shape_cast %170 : vector<8x1xi1> to vector<8x1xi1>
    %172 = vector.broadcast %171 : vector<8x1xi1> to vector<8x128xi1>
    %173 = arith.select %172, %167, %133 : vector<8x128xi1>, vector<8x128xf32>
    %c4_i32 = arith.constant 4 : i32
    %174 = arith.index_cast %c4_i32 : i32 to index
    %c0_43 = arith.constant 0 : index
    %c0_44 = arith.constant 0 : index
    %175 = vector.load %arg12[%174, %c0_43, %c0_44] : memref<8x8x384xf32, #tpu.memory_space<vmem>>, vector<1x8x384xf32>
    %176 = vector.shape_cast %175 : vector<1x8x384xf32> to vector<8x384xf32>
    %177 = arith.truncf %167 : vector<8x128xf32> to vector<8x128xbf16>
    %178 = arith.truncf %11 : vector<128x384xf32> to vector<128x384xbf16>
    %cst_45 = arith.constant dense<0.000000e+00> : vector<8x384xf32>
    %179 = tpu.matmul %177, %178, %cst_45 {dimension_numbers = #tpu.dot_dimension_numbers<[1], [0], [0], [1], [0, 0, 1, 1], [], []>} : vector<8x128xbf16>, vector<128x384xbf16>, vector<8x384xf32> -> vector<8x384xf32>
    %180 = vector.broadcast %12 : vector<1x384xf32> to vector<8x384xf32>
    %181 = arith.addf %179, %180 : vector<8x384xf32>
    %182 = vector.extract_strided_slice %176 {offsets = [0, 0], sizes = [8, 128], strides = [1, 1]} : vector<8x384xf32> to vector<8x128xf32>
    %183 = vector.extract_strided_slice %181 {offsets = [0, 0], sizes = [8, 128], strides = [1, 1]} : vector<8x384xf32> to vector<8x128xf32>
    %184 = arith.addf %182, %183 : vector<8x128xf32>
    %185 = arith.negf %184 : vector<8x128xf32>
    %186 = math.exp %185 : vector<8x128xf32>
    %cst_46 = arith.constant 1.000000e+00 : f32
    %187 = vector.broadcast %cst_46 : f32 to vector<8x128xf32>
    %188 = arith.addf %187, %186 : vector<8x128xf32>
    %189 = arith.divf %187, %188 : vector<8x128xf32>
    %190 = vector.extract_strided_slice %176 {offsets = [0, 128], sizes = [8, 128], strides = [1, 1]} : vector<8x384xf32> to vector<8x128xf32>
    %191 = vector.extract_strided_slice %181 {offsets = [0, 128], sizes = [8, 128], strides = [1, 1]} : vector<8x384xf32> to vector<8x128xf32>
    %192 = arith.addf %190, %191 : vector<8x128xf32>
    %193 = arith.negf %192 : vector<8x128xf32>
    %194 = math.exp %193 : vector<8x128xf32>
    %cst_47 = arith.constant 1.000000e+00 : f32
    %195 = vector.broadcast %cst_47 : f32 to vector<8x128xf32>
    %196 = arith.addf %195, %194 : vector<8x128xf32>
    %197 = arith.divf %195, %196 : vector<8x128xf32>
    %198 = vector.extract_strided_slice %176 {offsets = [0, 256], sizes = [8, 128], strides = [1, 1]} : vector<8x384xf32> to vector<8x128xf32>
    %199 = vector.extract_strided_slice %181 {offsets = [0, 256], sizes = [8, 128], strides = [1, 1]} : vector<8x384xf32> to vector<8x128xf32>
    %200 = arith.mulf %189, %199 : vector<8x128xf32>
    %201 = arith.addf %198, %200 : vector<8x128xf32>
    %202 = math.tanh %201 : vector<8x128xf32>
    %cst_48 = arith.constant 1.000000e+00 : f32
    %203 = vector.broadcast %cst_48 : f32 to vector<8x128xf32>
    %204 = arith.subf %203, %197 : vector<8x128xf32>
    %205 = arith.mulf %204, %202 : vector<8x128xf32>
    %206 = arith.mulf %197, %167 : vector<8x128xf32>
    %207 = arith.addf %205, %206 : vector<8x128xf32>
    %c1_i32_49 = arith.constant 1 : i32
    %208 = arith.addi %c4_i32, %c1_i32_49 : i32
    %209 = vector.broadcast %208 : i32 to vector<8x1xi32>
    %210 = arith.cmpi eq, %10, %209 : vector<8x1xi32>
    %211 = vector.shape_cast %210 : vector<8x1xi1> to vector<8x1xi1>
    %212 = vector.broadcast %211 : vector<8x1xi1> to vector<8x128xi1>
    %213 = arith.select %212, %207, %173 : vector<8x128xi1>, vector<8x128xf32>
    %c5_i32 = arith.constant 5 : i32
    %214 = arith.index_cast %c5_i32 : i32 to index
    %c0_50 = arith.constant 0 : index
    %c0_51 = arith.constant 0 : index
    %215 = vector.load %arg12[%214, %c0_50, %c0_51] : memref<8x8x384xf32, #tpu.memory_space<vmem>>, vector<1x8x384xf32>
    %216 = vector.shape_cast %215 : vector<1x8x384xf32> to vector<8x384xf32>
    %217 = arith.truncf %207 : vector<8x128xf32> to vector<8x128xbf16>
    %218 = arith.truncf %11 : vector<128x384xf32> to vector<128x384xbf16>
    %cst_52 = arith.constant dense<0.000000e+00> : vector<8x384xf32>
    %219 = tpu.matmul %217, %218, %cst_52 {dimension_numbers = #tpu.dot_dimension_numbers<[1], [0], [0], [1], [0, 0, 1, 1], [], []>} : vector<8x128xbf16>, vector<128x384xbf16>, vector<8x384xf32> -> vector<8x384xf32>
    %220 = vector.broadcast %12 : vector<1x384xf32> to vector<8x384xf32>
    %221 = arith.addf %219, %220 : vector<8x384xf32>
    %222 = vector.extract_strided_slice %216 {offsets = [0, 0], sizes = [8, 128], strides = [1, 1]} : vector<8x384xf32> to vector<8x128xf32>
    %223 = vector.extract_strided_slice %221 {offsets = [0, 0], sizes = [8, 128], strides = [1, 1]} : vector<8x384xf32> to vector<8x128xf32>
    %224 = arith.addf %222, %223 : vector<8x128xf32>
    %225 = arith.negf %224 : vector<8x128xf32>
    %226 = math.exp %225 : vector<8x128xf32>
    %cst_53 = arith.constant 1.000000e+00 : f32
    %227 = vector.broadcast %cst_53 : f32 to vector<8x128xf32>
    %228 = arith.addf %227, %226 : vector<8x128xf32>
    %229 = arith.divf %227, %228 : vector<8x128xf32>
    %230 = vector.extract_strided_slice %216 {offsets = [0, 128], sizes = [8, 128], strides = [1, 1]} : vector<8x384xf32> to vector<8x128xf32>
    %231 = vector.extract_strided_slice %221 {offsets = [0, 128], sizes = [8, 128], strides = [1, 1]} : vector<8x384xf32> to vector<8x128xf32>
    %232 = arith.addf %230, %231 : vector<8x128xf32>
    %233 = arith.negf %232 : vector<8x128xf32>
    %234 = math.exp %233 : vector<8x128xf32>
    %cst_54 = arith.constant 1.000000e+00 : f32
    %235 = vector.broadcast %cst_54 : f32 to vector<8x128xf32>
    %236 = arith.addf %235, %234 : vector<8x128xf32>
    %237 = arith.divf %235, %236 : vector<8x128xf32>
    %238 = vector.extract_strided_slice %216 {offsets = [0, 256], sizes = [8, 128], strides = [1, 1]} : vector<8x384xf32> to vector<8x128xf32>
    %239 = vector.extract_strided_slice %221 {offsets = [0, 256], sizes = [8, 128], strides = [1, 1]} : vector<8x384xf32> to vector<8x128xf32>
    %240 = arith.mulf %229, %239 : vector<8x128xf32>
    %241 = arith.addf %238, %240 : vector<8x128xf32>
    %242 = math.tanh %241 : vector<8x128xf32>
    %cst_55 = arith.constant 1.000000e+00 : f32
    %243 = vector.broadcast %cst_55 : f32 to vector<8x128xf32>
    %244 = arith.subf %243, %237 : vector<8x128xf32>
    %245 = arith.mulf %244, %242 : vector<8x128xf32>
    %246 = arith.mulf %237, %207 : vector<8x128xf32>
    %247 = arith.addf %245, %246 : vector<8x128xf32>
    %c1_i32_56 = arith.constant 1 : i32
    %248 = arith.addi %c5_i32, %c1_i32_56 : i32
    %249 = vector.broadcast %248 : i32 to vector<8x1xi32>
    %250 = arith.cmpi eq, %10, %249 : vector<8x1xi32>
    %251 = vector.shape_cast %250 : vector<8x1xi1> to vector<8x1xi1>
    %252 = vector.broadcast %251 : vector<8x1xi1> to vector<8x128xi1>
    %253 = arith.select %252, %247, %213 : vector<8x128xi1>, vector<8x128xf32>
    %c6_i32 = arith.constant 6 : i32
    %254 = arith.index_cast %c6_i32 : i32 to index
    %c0_57 = arith.constant 0 : index
    %c0_58 = arith.constant 0 : index
    %255 = vector.load %arg12[%254, %c0_57, %c0_58] : memref<8x8x384xf32, #tpu.memory_space<vmem>>, vector<1x8x384xf32>
    %256 = vector.shape_cast %255 : vector<1x8x384xf32> to vector<8x384xf32>
    %257 = arith.truncf %247 : vector<8x128xf32> to vector<8x128xbf16>
    %258 = arith.truncf %11 : vector<128x384xf32> to vector<128x384xbf16>
    %cst_59 = arith.constant dense<0.000000e+00> : vector<8x384xf32>
    %259 = tpu.matmul %257, %258, %cst_59 {dimension_numbers = #tpu.dot_dimension_numbers<[1], [0], [0], [1], [0, 0, 1, 1], [], []>} : vector<8x128xbf16>, vector<128x384xbf16>, vector<8x384xf32> -> vector<8x384xf32>
    %260 = vector.broadcast %12 : vector<1x384xf32> to vector<8x384xf32>
    %261 = arith.addf %259, %260 : vector<8x384xf32>
    %262 = vector.extract_strided_slice %256 {offsets = [0, 0], sizes = [8, 128], strides = [1, 1]} : vector<8x384xf32> to vector<8x128xf32>
    %263 = vector.extract_strided_slice %261 {offsets = [0, 0], sizes = [8, 128], strides = [1, 1]} : vector<8x384xf32> to vector<8x128xf32>
    %264 = arith.addf %262, %263 : vector<8x128xf32>
    %265 = arith.negf %264 : vector<8x128xf32>
    %266 = math.exp %265 : vector<8x128xf32>
    %cst_60 = arith.constant 1.000000e+00 : f32
    %267 = vector.broadcast %cst_60 : f32 to vector<8x128xf32>
    %268 = arith.addf %267, %266 : vector<8x128xf32>
    %269 = arith.divf %267, %268 : vector<8x128xf32>
    %270 = vector.extract_strided_slice %256 {offsets = [0, 128], sizes = [8, 128], strides = [1, 1]} : vector<8x384xf32> to vector<8x128xf32>
    %271 = vector.extract_strided_slice %261 {offsets = [0, 128], sizes = [8, 128], strides = [1, 1]} : vector<8x384xf32> to vector<8x128xf32>
    %272 = arith.addf %270, %271 : vector<8x128xf32>
    %273 = arith.negf %272 : vector<8x128xf32>
    %274 = math.exp %273 : vector<8x128xf32>
    %cst_61 = arith.constant 1.000000e+00 : f32
    %275 = vector.broadcast %cst_61 : f32 to vector<8x128xf32>
    %276 = arith.addf %275, %274 : vector<8x128xf32>
    %277 = arith.divf %275, %276 : vector<8x128xf32>
    %278 = vector.extract_strided_slice %256 {offsets = [0, 256], sizes = [8, 128], strides = [1, 1]} : vector<8x384xf32> to vector<8x128xf32>
    %279 = vector.extract_strided_slice %261 {offsets = [0, 256], sizes = [8, 128], strides = [1, 1]} : vector<8x384xf32> to vector<8x128xf32>
    %280 = arith.mulf %269, %279 : vector<8x128xf32>
    %281 = arith.addf %278, %280 : vector<8x128xf32>
    %282 = math.tanh %281 : vector<8x128xf32>
    %cst_62 = arith.constant 1.000000e+00 : f32
    %283 = vector.broadcast %cst_62 : f32 to vector<8x128xf32>
    %284 = arith.subf %283, %277 : vector<8x128xf32>
    %285 = arith.mulf %284, %282 : vector<8x128xf32>
    %286 = arith.mulf %277, %247 : vector<8x128xf32>
    %287 = arith.addf %285, %286 : vector<8x128xf32>
    %c1_i32_63 = arith.constant 1 : i32
    %288 = arith.addi %c6_i32, %c1_i32_63 : i32
    %289 = vector.broadcast %288 : i32 to vector<8x1xi32>
    %290 = arith.cmpi eq, %10, %289 : vector<8x1xi32>
    %291 = vector.shape_cast %290 : vector<8x1xi1> to vector<8x1xi1>
    %292 = vector.broadcast %291 : vector<8x1xi1> to vector<8x128xi1>
    %293 = arith.select %292, %287, %253 : vector<8x128xi1>, vector<8x128xf32>
    %c7_i32 = arith.constant 7 : i32
    %294 = arith.index_cast %c7_i32 : i32 to index
    %c0_64 = arith.constant 0 : index
    %c0_65 = arith.constant 0 : index
    %295 = vector.load %arg12[%294, %c0_64, %c0_65] : memref<8x8x384xf32, #tpu.memory_space<vmem>>, vector<1x8x384xf32>
    %296 = vector.shape_cast %295 : vector<1x8x384xf32> to vector<8x384xf32>
    %297 = arith.truncf %287 : vector<8x128xf32> to vector<8x128xbf16>
    %298 = arith.truncf %11 : vector<128x384xf32> to vector<128x384xbf16>
    %cst_66 = arith.constant dense<0.000000e+00> : vector<8x384xf32>
    %299 = tpu.matmul %297, %298, %cst_66 {dimension_numbers = #tpu.dot_dimension_numbers<[1], [0], [0], [1], [0, 0, 1, 1], [], []>} : vector<8x128xbf16>, vector<128x384xbf16>, vector<8x384xf32> -> vector<8x384xf32>
    %300 = vector.broadcast %12 : vector<1x384xf32> to vector<8x384xf32>
    %301 = arith.addf %299, %300 : vector<8x384xf32>
    %302 = vector.extract_strided_slice %296 {offsets = [0, 0], sizes = [8, 128], strides = [1, 1]} : vector<8x384xf32> to vector<8x128xf32>
    %303 = vector.extract_strided_slice %301 {offsets = [0, 0], sizes = [8, 128], strides = [1, 1]} : vector<8x384xf32> to vector<8x128xf32>
    %304 = arith.addf %302, %303 : vector<8x128xf32>
    %305 = arith.negf %304 : vector<8x128xf32>
    %306 = math.exp %305 : vector<8x128xf32>
    %cst_67 = arith.constant 1.000000e+00 : f32
    %307 = vector.broadcast %cst_67 : f32 to vector<8x128xf32>
    %308 = arith.addf %307, %306 : vector<8x128xf32>
    %309 = arith.divf %307, %308 : vector<8x128xf32>
    %310 = vector.extract_strided_slice %296 {offsets = [0, 128], sizes = [8, 128], strides = [1, 1]} : vector<8x384xf32> to vector<8x128xf32>
    %311 = vector.extract_strided_slice %301 {offsets = [0, 128], sizes = [8, 128], strides = [1, 1]} : vector<8x384xf32> to vector<8x128xf32>
    %312 = arith.addf %310, %311 : vector<8x128xf32>
    %313 = arith.negf %312 : vector<8x128xf32>
    %314 = math.exp %313 : vector<8x128xf32>
    %cst_68 = arith.constant 1.000000e+00 : f32
    %315 = vector.broadcast %cst_68 : f32 to vector<8x128xf32>
    %316 = arith.addf %315, %314 : vector<8x128xf32>
    %317 = arith.divf %315, %316 : vector<8x128xf32>
    %318 = vector.extract_strided_slice %296 {offsets = [0, 256], sizes = [8, 128], strides = [1, 1]} : vector<8x384xf32> to vector<8x128xf32>
    %319 = vector.extract_strided_slice %301 {offsets = [0, 256], sizes = [8, 128], strides = [1, 1]} : vector<8x384xf32> to vector<8x128xf32>
    %320 = arith.mulf %309, %319 : vector<8x128xf32>
    %321 = arith.addf %318, %320 : vector<8x128xf32>
    %322 = math.tanh %321 : vector<8x128xf32>
    %cst_69 = arith.constant 1.000000e+00 : f32
    %323 = vector.broadcast %cst_69 : f32 to vector<8x128xf32>
    %324 = arith.subf %323, %317 : vector<8x128xf32>
    %325 = arith.mulf %324, %322 : vector<8x128xf32>
    %326 = arith.mulf %317, %287 : vector<8x128xf32>
    %327 = arith.addf %325, %326 : vector<8x128xf32>
    %c1_i32_70 = arith.constant 1 : i32
    %328 = arith.addi %c7_i32, %c1_i32_70 : i32
    %329 = vector.broadcast %328 : i32 to vector<8x1xi32>
    %330 = arith.cmpi eq, %10, %329 : vector<8x1xi32>
    %331 = vector.shape_cast %330 : vector<8x1xi1> to vector<8x1xi1>
    %332 = vector.broadcast %331 : vector<8x1xi1> to vector<8x128xi1>
    %333 = arith.select %332, %327, %293 : vector<8x128xi1>, vector<8x128xf32>
    %c8_i32 = arith.constant 8 : i32
    %c0_71 = arith.constant 0 : index
    %c0_72 = arith.constant 0 : index
    %334 = vector.load %arg7[%c0_71, %c0_72] : memref<128x16xf32, #tpu.memory_space<vmem>>, vector<128x16xf32>
    %335 = arith.truncf %333 : vector<8x128xf32> to vector<8x128xbf16>
    %336 = arith.truncf %334 : vector<128x16xf32> to vector<128x16xbf16>
    %cst_73 = arith.constant dense<0.000000e+00> : vector<8x16xf32>
    %337 = tpu.matmul %335, %336, %cst_73 {dimension_numbers = #tpu.dot_dimension_numbers<[1], [0], [0], [1], [0, 0, 1, 1], [], []>} : vector<8x128xbf16>, vector<128x16xbf16>, vector<8x16xf32> -> vector<8x16xf32>
    %c0_74 = arith.constant 0 : index
    %c0_75 = arith.constant 0 : index
    %338 = vector.load %arg8[%c0_74, %c0_75] : memref<1x16xf32, #tpu.memory_space<vmem>>, vector<1x16xf32>
    %339 = vector.broadcast %338 : vector<1x16xf32> to vector<8x16xf32>
    %340 = arith.addf %337, %339 : vector<8x16xf32>
    %cst_76 = arith.constant 0.000000e+00 : f32
    %341 = vector.broadcast %cst_76 : f32 to vector<8x16xf32>
    %342 = arith.maximumf %340, %341 : vector<8x16xf32>
    %c0_77 = arith.constant 0 : index
    %c0_78 = arith.constant 0 : index
    %343 = vector.load %arg9[%c0_77, %c0_78] : memref<16x2xf32, #tpu.memory_space<vmem>>, vector<16x2xf32>
    %344 = arith.truncf %342 : vector<8x16xf32> to vector<8x16xbf16>
    %345 = arith.truncf %343 : vector<16x2xf32> to vector<16x2xbf16>
    %cst_79 = arith.constant dense<0.000000e+00> : vector<8x2xf32>
    %346 = tpu.matmul %344, %345, %cst_79 {dimension_numbers = #tpu.dot_dimension_numbers<[1], [0], [0], [1], [0, 0, 1, 1], [], []>} : vector<8x16xbf16>, vector<16x2xbf16>, vector<8x2xf32> -> vector<8x2xf32>
    %c0_80 = arith.constant 0 : index
    %c0_81 = arith.constant 0 : index
    %347 = vector.load %arg10[%c0_80, %c0_81] : memref<1x2xf32, #tpu.memory_space<vmem>>, vector<1x2xf32>
    %348 = vector.broadcast %347 : vector<1x2xf32> to vector<8x2xf32>
    %349 = arith.addf %346, %348 : vector<8x2xf32>
    %350 = arith.negf %349 : vector<8x2xf32>
    %351 = math.exp %350 : vector<8x2xf32>
    %cst_82 = arith.constant 1.000000e+00 : f32
    %352 = vector.broadcast %cst_82 : f32 to vector<8x2xf32>
    %353 = arith.addf %352, %351 : vector<8x2xf32>
    %354 = arith.divf %352, %353 : vector<8x2xf32>
    %c0_83 = arith.constant 0 : index
    %c0_84 = arith.constant 0 : index
    %355 = vector.load %arg11[%c0_83, %c0_84] : memref<8x2xf32, #tpu.memory_space<vmem>>, vector<8x2xf32>
    tpu.vector_store %arg11[%c0_83, %c0_84], %354 {strides = array<i32>} : memref<8x2xf32, #tpu.memory_space<vmem>>, vector<8x2xf32>,
    return
  }
  func.func @transform_0(%arg0: i32) -> (i32, i32) {
    %c0_i32 = arith.constant 0 : i32
    %c0_i32_0 = arith.constant 0 : i32
    %c0_i32_1 = arith.constant 0 : i32
    return %c0_i32, %c0_i32_0 : i32, i32
  }
  func.func @transform_1(%arg0: i32) -> (i32, i32) {
    %c0_i32 = arith.constant 0 : i32
    %c0_i32_0 = arith.constant 0 : i32
    %c0_i32_1 = arith.constant 0 : i32
    return %c0_i32, %c0_i32_0 : i32, i32
  }
  func.func @transform_2(%arg0: i32) -> (i32, i32) {
    %c0_i32 = arith.constant 0 : i32
    %c0_i32_0 = arith.constant 0 : i32
    %c0_i32_1 = arith.constant 0 : i32
    return %c0_i32, %c0_i32_0 : i32, i32
  }
  func.func @transform_3(%arg0: i32) -> (i32, i32) {
    %c0_i32 = arith.constant 0 : i32
    %c0_i32_0 = arith.constant 0 : i32
    %c0_i32_1 = arith.constant 0 : i32
    return %c0_i32, %c0_i32_0 : i32, i32
  }
  func.func @transform_4(%arg0: i32) -> (i32, i32) {
    %c0_i32 = arith.constant 0 : i32
    %c0_i32_0 = arith.constant 0 : i32
    %c0_i32_1 = arith.constant 0 : i32
    return %c0_i32, %c0_i32_0 : i32, i32
  }
  func.func @transform_5(%arg0: i32) -> (i32, i32) {
    %c0_i32 = arith.constant 0 : i32
    %c0_i32_0 = arith.constant 0 : i32
    %c0_i32_1 = arith.constant 0 : i32
    return %c0_i32, %c0_i32_0 : i32, i32
  }
  func.func @transform_6(%arg0: i32) -> (i32, i32) {
    %c0_i32 = arith.constant 0 : i32
    %c0_i32_0 = arith.constant 0 : i32
    %c0_i32_1 = arith.constant 0 : i32
    return %c0_i32, %c0_i32_0 : i32, i32
  }
  func.func @transform_7(%arg0: i32) -> (i32, i32) {
    %c0_i32 = arith.constant 0 : i32
    %c0_i32_0 = arith.constant 0 : i32
    %c0_i32_1 = arith.constant 0 : i32
    return %c0_i32, %c0_i32_0 : i32, i32
  }
  func.func @transform_8(%arg0: i32) -> (i32, i32) {
    %c0_i32 = arith.constant 0 : i32
    %c0_i32_0 = arith.constant 0 : i32
    %c0_i32_1 = arith.constant 0 : i32
    return %c0_i32, %c0_i32_0 : i32, i32
  }
  func.func @transform_9(%arg0: i32) -> (i32, i32) {
    %c0_i32 = arith.constant 0 : i32
    %c0_i32_0 = arith.constant 0 : i32
    %c0_i32_1 = arith.constant 0 : i32
    return %c0_i32, %c0_i32_0 : i32, i32
  }
  func.func @transform_10(%arg0: i32) -> (i32, i32) {
    %c0_i32 = arith.constant 0 : i32
    %c0_i32_0 = arith.constant 0 : i32
    %c0_i32_1 = arith.constant 0 : i32
    return %c0_i32, %c0_i32_0 : i32, i32
  }
}

</mosaic_0001>

<bundles_post_ra>
// kernel: _lambda_.3
= control target key start
LH: loop header
LB: loop body
LE: loop exit
PB: predicated region body
PF: predicated region fallthrough
CT: control target
= control target key end

     0   :  { %v2837_v3 = vmov 0   ;;  %vm1856_vm1 = vmmov 0   ;;  %s2826_s2 = inlined_call_operand.vmem [shape: f32[128,384], index: 2, kind: input, shape index: {}]   ;;  %s2827_s1 = inlined_call_operand.vmem [shape: f32[64,128], index: 1, kind: input, shape index: {}]   ;;  %s2828_s3 = inlined_call_operand.vmem [shape: f32[128,384], index: 3, kind: input, shape index: {}]   ;;  %s2829_s0 = inlined_call_operand.vmem [shape: s32[8,1], index: 0, kind: input, shape index: {}]   ;;  %s2830_s4 = inlined_call_operand.vmem [shape: f32[1,384], index: 4, kind: input, shape index: {}]   ;;  %s2831_s5 = inlined_call_operand.vmem [shape: f32[1,384], index: 5, kind: input, shape index: {}]   ;;  %s2832_s6 = inlined_call_operand.vmem [shape: f32[128,16], index: 6, kind: input, shape index: {}]   ;;  %s2833_s8 = inlined_call_operand.vmem [shape: f32[16,2], index: 8, kind: input, shape index: {}]   ;;  %s2834_s7 = inlined_call_operand.vmem [shape: f32[1,16], index: 7, kind: input, shape index: {}]   ;;  %s2835_s9 = inlined_call_operand.vmem [shape: f32[1,2], index: 9, kind: input, shape index: {}]   ;;  %s2836_s10 = inlined_call_operand.vmem [shape: f32[8,2], index: 10, kind: output, shape index: {}]  }
   0x1   :  { %v45_v0 = vld [vmem:[%s2826_s2 + $0x8] sm:$0xff]  ;;  %v48_v1 = vld [vmem:[%s2826_s2 + $0x20] sm:$0xff]  ;;  %169 = vmatprep.mubr.bf16.mxu0 %v2837_v3  ;;  %1767 = vset.pattern.permute.xlu0 %v2837_v3  ;;  %v47_v5 = vld [vmem:[%s2826_s2 + $0x18] sm:$0xff] }
   0x2   :  { %v44_v2 = vld [vmem:[%s2826_s2] sm:$0xff]  ;;  %v97_v4 = vpack.c.bf16 %v48_v1, %v45_v0  ;;  %v51_v6 = vld [vmem:[%s2826_s2 + $0x38] sm:$0xff]  ;;  %v54_v7 = vld [vmem:[%s2826_s2 + $0x50] sm:$0xff]  ;;  %1768 = vset.pattern.permute.xlu1 %v2837_v3 }
   0x3   :  { %v96_v8 = vpack.c.bf16 %v47_v5, %v44_v2  ;;  %v100_v9 = vpack.c.bf16 %v54_v7, %v51_v6  ;;  %v50_v10 = vld [vmem:[%s2826_s2 + $0x30] sm:$0xff]  ;;  %v53_v11 = vld [vmem:[%s2826_s2 + $0x48] sm:$0xff]  ;;  %v60_v13 = vld [vmem:[%s2826_s2 + $0x80] sm:$0xff] }
   0x4   :  { %v57_v12 = vld [vmem:[%s2826_s2 + $0x68] sm:$0xff]  ;;  %137 = vmatprep.subr.bf16.mxu0 %v97_v4  ;;  %v99_v14 = vpack.c.bf16 %v53_v11, %v50_v10  ;;  %v56_v16 = vld [vmem:[%s2826_s2 + $0x60] sm:$0xff]  ;;  %v59_v17 = vld [vmem:[%s2826_s2 + $0x78] sm:$0xff] }
   0x5   :  { %138 = vmatpush1.bf16.msra.mxu0 %v96_v8  ;;  %v103_v15 = vpack.c.bf16 %v60_v13, %v57_v12  ;;  %v63_v18 = vld [vmem:[%s2826_s2 + $0x98] sm:$0xff]  ;;  %v66_v19 = vld [vmem:[%s2826_s2 + $0xb0] sm:$0xff]  ;;  %v102_v20 = vpack.c.bf16 %v59_v17, %v56_v16  ;;  %v65_v23 = vld [vmem:[%s2826_s2 + $0xa8] sm:$0xff] }
   0x6   :  { %139 = vmatprep.subr.bf16.mxu0 %v100_v9  ;;  %v62_v21 = vld [vmem:[%s2826_s2 + $0x90] sm:$0xff]  ;;  %v106_v22 = vpack.c.bf16 %v66_v19, %v63_v18  ;;  %v49_v25 = vld [vmem:[%s2826_s2 + $0x28] sm:$0xff]  ;;  %v72_v27 = vld [vmem:[%s2826_s2 + $0xe0] sm:$0xff] }
   0x7   :  { %v46_v24 = vld [vmem:[%s2826_s2 + $0x10] sm:$0xff]  ;;  %v69_v26 = vld [vmem:[%s2826_s2 + $0xc8] sm:$0xff]  ;;  %v52_v29 = vld [vmem:[%s2826_s2 + $0x40] sm:$0xff]  ;;  %v105_v31 = vpack.c.bf16 %v65_v23, %v62_v21 }
   0x8   :  { %v98_v28 = vpack.c.bf16 %v49_v25, %v46_v24  ;;  %v55_v30 = vld [vmem:[%s2826_s2 + $0x58] sm:$0xff]  ;;  %v36_v33 = vld [vmem:[%s2827_s1] sm:$0xff]  ;;  %v37_v34 = vld [vmem:[%s2827_s1 + $0x8] sm:$0xff]  ;;  %v109_v35 = vpack.c.bf16 %v72_v27, %v69_v26 }
   0x9   :  { %140 = vmatpush1.bf16.msra.mxu0 %v99_v14  ;;  %v101_v32 = vpack.c.bf16 %v55_v30, %v52_v29  ;;  %v68_v36 = vld [vmem:[%s2826_s2 + $0xc0] sm:$0xff]  ;;  %v71_v37 = vld [vmem:[%s2826_s2 + $0xd8] sm:$0xff]  ;;  %v1996_v39 = vpack.c.bf16 %v37_v34, %v36_v33  ;;  %v78_v40 = vld [vmem:[%s2826_s2 + $0x110] sm:$0xff] }
   0xa   :  { %141 = vmatprep.subr.bf16.mxu0 %v103_v15  ;;  %1554 = vmatprep.subr.bf16.mxu1 %v98_v28  ;;  %v75_v38 = vld [vmem:[%s2826_s2 + $0xf8] sm:$0xff]  ;;  %v58_v41 = vld [vmem:[%s2826_s2 + $0x70] sm:$0xff]  ;;  %v61_v42 = vld [vmem:[%s2826_s2 + $0x88] sm:$0xff]  ;;  %v108_v44 = vpack.c.bf16 %v71_v37, %v68_v36 }
   0xb   :  { %1555 = vmatpush3.bf16.msra.mxu1 %v98_v28  ;;  %v104_v43 = vpack.c.bf16 %v61_v42, %v58_v41  ;;  %1570 = vmatprep.mubr.bf16.mxu1 %v1996_v39  ;;  %v64_v45 = vld [vmem:[%s2826_s2 + $0xa0] sm:$0xff]  ;;  %v67_v46 = vld [vmem:[%s2826_s2 + $0xb8] sm:$0xff]  ;;  %v112_v47 = vpack.c.bf16 %v78_v40, %v75_v38  ;;  %v74_v48 = vld [vmem:[%s2826_s2 + $0xf0] sm:$0xff] }
   0xc   :  { %1556 = vmatprep.subr.bf16.mxu1 %v101_v32  ;;  %v77_v49 = vld [vmem:[%s2826_s2 + $0x108] sm:$0xff]  ;;  %v84_v51 = vld [vmem:[%s2826_s2 + $0x140] sm:$0xff]  ;;  %v107_v52 = vpack.c.bf16 %v67_v46, %v64_v45  ;;  %v70_v53 = vld [vmem:[%s2826_s2 + $0xd0] sm:$0xff] }
   0xd   :  { %142 = vmatpush1.bf16.msra.mxu0 %v102_v20  ;;  %v81_v50 = vld [vmem:[%s2826_s2 + $0x128] sm:$0xff]  ;;  %v111_v55 = vpack.c.bf16 %v77_v49, %v74_v48  ;;  %v80_v57 = vld [vmem:[%s2826_s2 + $0x120] sm:$0xff]  ;;  %v83_v58 = vld [vmem:[%s2826_s2 + $0x138] sm:$0xff] }
   0xe   :  { %143 = vmatprep.subr.bf16.mxu0 %v106_v22  ;;  %v73_v54 = vld [vmem:[%s2826_s2 + $0xe8] sm:$0xff]  ;;  %v115_v56 = vpack.c.bf16 %v84_v51, %v81_v50  ;;  %v87_v59 = vld [vmem:[%s2826_s2 + $0x158] sm:$0xff]  ;;  %v90_v60 = vld [vmem:[%s2826_s2 + $0x170] sm:$0xff]  ;;  %v114_v0 = vpack.c.bf16 %v83_v58, %v80_v57 }
   0xf   :  { %1557 = vmatpush3.bf16.msra.mxu1 %v101_v32  ;;  %v110_v61 = vpack.c.bf16 %v73_v54, %v70_v53  ;;  %v76_v62 = vld [vmem:[%s2826_s2 + $0x100] sm:$0xff]  ;;  %v79_v63 = vld [vmem:[%s2826_s2 + $0x118] sm:$0xff]  ;;  %v118_v1 = vpack.c.bf16 %v90_v60, %v87_v59  ;;  %v86_v2 = vld [vmem:[%s2826_s2 + $0x150] sm:$0xff] }
  0x10   :  { %1558 = vmatprep.subr.bf16.mxu1 %v104_v43  ;;  %v89_v4 = vld [vmem:[%s2826_s2 + $0x168] sm:$0xff]  ;;  %v304_v6 = vld [vmem:[%s2828_s3 + $0x20] sm:$0xff]  ;;  %v113_v7 = vpack.c.bf16 %v79_v63, %v76_v62  ;;  %v82_v8 = vld [vmem:[%s2826_s2 + $0x130] sm:$0xff] }
  0x11   :  { %144 = vmatpush1.bf16.msra.mxu0 %v105_v31  ;;  %v301_v5 = vld [vmem:[%s2828_s3 + $0x8] sm:$0xff]  ;;  %v117_v10 = vpack.c.bf16 %v89_v4, %v86_v2  ;;  %v300_v12 = vld [vmem:[%s2828_s3] sm:$0xff]  ;;  %v303_v13 = vld [vmem:[%s2828_s3 + $0x18] sm:$0xff] }
  0x12   :  { %145 = vmatprep.subr.bf16.mxu0 %v109_v35  ;;  %v85_v9 = vld [vmem:[%s2826_s2 + $0x148] sm:$0xff]  ;;  %v2068_v11 = vpack.c.bf16 %v304_v6, %v301_v5  ;;  %v307_v14 = vld [vmem:[%s2828_s3 + $0x38] sm:$0xff]  ;;  %v310_v15 = vld [vmem:[%s2828_s3 + $0x50] sm:$0xff]  ;;  %v2088_v19 = vpack.c.bf16 %v303_v13, %v300_v12 }
  0x13   :  { %1559 = vmatpush3.bf16.msra.mxu1 %v104_v43  ;;  %v116_v16 = vpack.c.bf16 %v85_v9, %v82_v8  ;;  %v88_v17 = vld [vmem:[%s2826_s2 + $0x160] sm:$0xff]  ;;  %v91_v18 = vld [vmem:[%s2826_s2 + $0x178] sm:$0xff]  ;;  %v2091_v20 = vpack.c.bf16 %v310_v15, %v307_v14  ;;  %v306_v21 = vld [vmem:[%s2828_s3 + $0x30] sm:$0xff] }
  0x14   :  { %1560 = vmatprep.subr.bf16.mxu1 %v107_v52  ;;  %v309_v22 = vld [vmem:[%s2828_s3 + $0x48] sm:$0xff]  ;;  %v316_v24 = vld [vmem:[%s2828_s3 + $0x80] sm:$0xff]  ;;  %v119_v25 = vpack.c.bf16 %v91_v18, %v88_v17  ;;  %v38_v28 = vld [vmem:[%s2827_s1 + $0x10] sm:$0xff] }
  0x15   :  { %146 = vmatpush1.bf16.msra.mxu0 %v108_v44  ;;  %v313_v23 = vld [vmem:[%s2828_s3 + $0x68] sm:$0xff]  ;;  %v2108_v26 = vld [vmem:[%s2829_s0] sm:$0xff]  ;;  %v2113_v27 = vpack.c.bf16 %v309_v22, %v306_v21  ;;  %v39_v29 = vld [vmem:[%s2827_s1 + $0x18] sm:$0xff] }
  0x16   :  { %147 = vmatprep.subr.bf16.mxu0 %v112_v47  ;;  %vm494_vm0 = vcmp.eq.s32.totalorder %v2108_v26, 1  ;;  %v2124_v31 = vpack.c.bf16 %v316_v24, %v313_v23  ;;  %v312_v32 = vld [vmem:[%s2828_s3 + $0x60] sm:$0xff]  ;;  %v315_v33 = vld [vmem:[%s2828_s3 + $0x78] sm:$0xff]  ;;  %v322_v35 = vld [vmem:[%s2828_s3 + $0xb0] sm:$0xff]  ;;  %v93_v36 = vpack.c.bf16 %v39_v29, %v38_v28  ;;  %v2839_v47 = vmov 0.0  }
  0x17   :  { %1561 = vmatpush3.bf16.msra.mxu1 %v107_v52  ;;  %v495_v30 = vsel %vm494_vm0, 1, %v2837_v3  ;;  %v319_v34 = vld [vmem:[%s2828_s3 + $0x98] sm:$0xff]  ;;  %v302_v37 = vld [vmem:[%s2828_s3 + $0x10] sm:$0xff]  ;;  %v305_v38 = vld [vmem:[%s2828_s3 + $0x28] sm:$0xff]  ;;  %vm608_vm2 = vcmp.eq.s32.totalorder %v2108_v26, 2  ;;  %vm722_vm3 = vcmp.eq.s32.totalorder %v2108_v26, 3 }
  0x18   :  { %1562 = vmatprep.subr.bf16.mxu1 %v110_v61  ;;  %497 = vperm.xlu0 %1767, %v495_v30   ;;  %v318_v40 = vld [vmem:[%s2828_s3 + $0x90] sm:$0xff]  ;;  %v2151_v41 = vpack.c.bf16 %v322_v35, %v319_v34  ;;  %v321_v42 = vld [vmem:[%s2828_s3 + $0xa8] sm:$0xff]  ;;  %v40_v43 = vld [vmem:[%s2827_s1 + $0x20] sm:$0xff]  ;;  %v2169_v48 = vpack.c.bf16 %v305_v38, %v302_v37  ;;  %vm836_vm4 = vcmp.eq.s32.totalorder %v2108_v26, 4  ;;  %vm950_vm5 = vcmp.eq.s32.totalorder %v2108_v26, 5 }
  0x19   :  { %148 = vmatpush1.bf16.msra.mxu0 %v111_v55  ;;  %v41_v44 = vld [vmem:[%s2827_s1 + $0x28] sm:$0xff]  ;;  %v328_v46 = vld [vmem:[%s2828_s3 + $0xe0] sm:$0xff]  ;;  %v311_v50 = vld [vmem:[%s2828_s3 + $0x58] sm:$0xff]  ;;  %v2178_v51 = vpack.c.bf16 %v321_v42, %v318_v40  ;;  %v609_v42 = vsel %vm608_vm2, 1, %v2837_v3  ;;  %vm1433_vm2 = vcmask 15360  }
  0x1a   :  { %149 = vmatprep.subr.bf16.mxu0 %v115_v56  ;;  %v325_v45 = vld [vmem:[%s2828_s3 + $0xc8] sm:$0xff]  ;;  %v308_v49 = vld [vmem:[%s2828_s3 + $0x40] sm:$0xff]  ;;  %v94_v52 = vpack.c.bf16 %v41_v44, %v40_v43  ;;  %v327_v55 = vld [vmem:[%s2828_s3 + $0xd8] sm:$0xff]  ;;  %v122_v43 = vlaneseq }
  0x1b   :  { %1563 = vmatpush3.bf16.msra.mxu1 %v110_v61  ;;  %v2182_v53 = vpack.c.bf16 %v328_v46, %v325_v45  ;;  %v324_v54 = vld [vmem:[%s2828_s3 + $0xc0] sm:$0xff]  ;;  %v331_v56 = vld [vmem:[%s2828_s3 + $0xf8] sm:$0xff]  ;;  %v334_v57 = vld [vmem:[%s2828_s3 + $0x110] sm:$0xff]  ;;  %v2197_v58 = vpack.c.bf16 %v311_v50, %v308_v49 }
  0x1c   :  { %1564 = vmatprep.subr.bf16.mxu1 %v113_v7  ;;  %v314_v59 = vld [vmem:[%s2828_s3 + $0x70] sm:$0xff]  ;;  %v317_v60 = vld [vmem:[%s2828_s3 + $0x88] sm:$0xff]  ;;  %v2207_v61 = vpack.c.bf16 %v327_v55, %v324_v54  ;;  %v43_v63 = vld [vmem:[%s2827_s1 + $0x38] sm:$0xff]  ;;  %611 = vperm.xlu0 %1767, %v609_v42   ;;  %v2365_v44 = vshrl.u32 %v122_v43, 7 }
  0x1d   :  { %150 = vmatpush1.bf16.msra.mxu0 %v114_v0  ;;  %v42_v62 = vld [vmem:[%s2827_s1 + $0x30] sm:$0xff]  ;;  %v2216_v0 = vpack.c.bf16 %v334_v57, %v331_v56  ;;  %v333_v2 = vld [vmem:[%s2828_s3 + $0x108] sm:$0xff]  ;;  %v340_v5 = vld [vmem:[%s2828_s3 + $0x140] sm:$0xff]  ;;  %v2231_v6 = vpack.c.bf16 %v317_v60, %v314_v59 }
  0x1e   :  { %151 = vmatprep.subr.bf16.mxu0 %v118_v1  ;;  %v330_v1 = vld [vmem:[%s2828_s3 + $0xf0] sm:$0xff]  ;;  %v337_v4 = vld [vmem:[%s2828_s3 + $0x128] sm:$0xff]  ;;  %v320_v8 = vld [vmem:[%s2828_s3 + $0xa0] sm:$0xff]  ;;  %v124_v45 = vsub.s32 0, %v2365_v44  ;;  %v128_v49 = vsub.s32 1, %v2365_v44  ;;  %v2841_v60 = vsub.s32 2, %v2365_v44 }
  0x1f   :  { %1565 = vmatpush3.bf16.msra.mxu1 %v113_v7  ;;  %v95_v7 = vpack.c.bf16 %v43_v63, %v42_v62  ;;  %v323_v9 = vld [vmem:[%s2828_s3 + $0xb8] sm:$0xff]  ;;  %v2245_v12 = vpack.c.bf16 %v340_v5, %v337_v4  ;;  %v336_v13 = vld [vmem:[%s2828_s3 + $0x120] sm:$0xff]  ;;  %v326_v18 = vld [vmem:[%s2828_s3 + $0xd0] sm:$0xff] }
  0x20   :  { %1566 = vmatprep.subr.bf16.mxu1 %v116_v16  ;;  %v339_v14 = vld [vmem:[%s2828_s3 + $0x138] sm:$0xff]  ;;  %v2260_v17 = vpack.c.bf16 %v323_v9, %v320_v8  ;;  %v329_v21 = vld [vmem:[%s2828_s3 + $0xe8] sm:$0xff]  ;;  %v342_v24 = vld [vmem:[%s2828_s3 + $0x150] sm:$0xff] }
  0x21   :  { %152 = vmatpush1.bf16.msra.mxu0 %v117_v10  ;;  %v2241_v10 = vpack.c.bf16 %v333_v2, %v330_v1  ;;  %v343_v15 = vld [vmem:[%s2828_s3 + $0x158] sm:$0xff]  ;;  %v2272_v22 = vpack.c.bf16 %v339_v14, %v336_v13  ;;  %v2284_v28 = vpack.c.bf16 %v329_v21, %v326_v18  ;;  %v332_v29 = vld [vmem:[%s2828_s3 + $0x100] sm:$0xff]  ;;  %v338_v34 = vld [vmem:[%s2828_s3 + $0x130] sm:$0xff] }
  0x22   :  { %392 = vmatprep.subr.bf16.mxu0 %v2068_v11  ;;  %v335_v30 = vld [vmem:[%s2828_s3 + $0x118] sm:$0xff]  ;;  %v341_v35 = vld [vmem:[%s2828_s3 + $0x148] sm:$0xff]  ;;  %v344_v37 = vld [vmem:[%s2828_s3 + $0x160] sm:$0xff] }
  0x23   :  { %1567 = vmatpush3.bf16.msra.mxu1 %v116_v16  ;;  %v346_v16 = vld [vmem:[%s2828_s3 + $0x170] sm:$0xff]  ;;  %v347_v38 = vld [vmem:[%s2828_s3 + $0x178] sm:$0xff]  ;;  %v120_v46 = vld [vmem:[%s2830_s4] sm:$0x7] }
  0x24   :  { %170 = vmatmul.mubr.bf16.vlgmr.msra.gmra.mrb[0].mxu0 %v1996_v39  ;;  %1568 = vmatprep.subr.bf16.mxu1 %v119_v25  ;;  %v2145_v39 = vpack.c.bf16 %v315_v33, %v312_v32  ;;  %v2275_v23 = vpack.c.bf16 %v346_v16, %v343_v15  ;;  %v2299_v33 = vpack.c.bf16 %v335_v30, %v332_v29 }
  0x25   :  { %393 = vmatpush1.bf16.msra.mxu0 %v2088_v19  ;;  %179 = vmatprep.mubr.bf16.mxu0 %v2837_v3  ;;  %v2325_v40 = vpack.c.bf16 %v347_v38, %v344_v37  ;;  %v129_v55 = vrot.slane %v120_v46, %v128_v49  ;;  %v2379_v63 = vrot.slane %v120_v46, %v2841_v60 }
  0x26   :  { %394 = vmatprep.subr.bf16.mxu0 %v2091_v20 }
  0x27   :  { %1569 = vmatpush3.bf16.msra.mxu1 %v119_v25  ;;  %v345_v25 = vld [vmem:[%s2828_s3 + $0x168] sm:$0xff] }
  0x28   :  { %1578 = vmatprep.subr.bf16.mxu1 %v2839_v47  ;;  %v2294_v32 = vpack.c.bf16 %v345_v25, %v342_v24 }
  0x29   :  { %395 = vmatpush1.bf16.msra.mxu0 %v2113_v27 }
  0x2a   :  { %396 = vmatprep.subr.bf16.mxu0 %v2124_v31  ;;  %1571 = vmatmul.mubr.bf16.vlgmr.msra.gmra.mrb[0].mxu1 %v93_v36 }
  0x2b   :  { %1579 = vmatpush3.bf16.msra.mxu1 %v2169_v48  ;;  %1574 = vmatprep.mubr.bf16.mxu1 %v94_v52 }
  0x2c   :  { %180 = vmatmul.mubr.bf16.gmra.mrb[4].mxu0 %v93_v36  ;;  %1580 = vmatprep.subr.bf16.mxu1 %v2839_v47  ;;  %v2311_v36 = vpack.c.bf16 %v341_v35, %v338_v34 }
  0x2d   :  { %397 = vmatpush1.bf16.msra.mxu0 %v2145_v39  ;;  %189 = vmatprep.mubr.bf16.mxu0 %v2837_v3 }
  0x2e   :  { %398 = vmatprep.subr.bf16.mxu0 %v2151_v41 }
  0x2f   :  { %1581 = vmatpush3.bf16.msra.mxu1 %v2197_v58 }
  0x30   :  { %1582 = vmatprep.subr.bf16.mxu1 %v2839_v47 }
  0x31   :  { %399 = vmatpush1.bf16.msra.mxu0 %v2178_v51 }
  0x32   :  { %400 = vmatprep.subr.bf16.mxu0 %v2182_v53  ;;  %1575 = vmatmul.mubr.bf16.gmra.mrb[4].mxu1 %v95_v7 }
  0x33   :  { %1583 = vmatpush3.bf16.msra.mxu1 %v2231_v6  ;;  %1594 = vmatprep.mubr.msk.bf16.mxu1 %vm1856_vm1, %v2839_v47 }
  0x34   :  { %190 = vmatmul.mubr.bf16.gmra.mrb[8].mxu0 %v94_v52  ;;  %1584 = vmatprep.subr.bf16.mxu1 %v2839_v47  ;;  %v125_v52 = vrot.slane %v120_v46, %v124_v45 }
  0x35   :  { %401 = vmatpush1.bf16.msra.mxu0 %v2207_v61  ;;  %199 = vmatprep.mubr.bf16.mxu0 %v2837_v3 }
  0x36   :  { %402 = vmatprep.subr.bf16.mxu0 %v2216_v0 }
  0x37   :  { %1585 = vmatpush3.bf16.msra.mxu1 %v2260_v17 }
  0x38   :  { %1586 = vmatprep.subr.bf16.mxu1 %v2839_v47 }
  0x39   :  { %403 = vmatpush1.bf16.msra.mxu0 %v2241_v10 }
  0x3a   :  { %404 = vmatprep.subr.bf16.mxu0 %v2245_v12 }
  0x3b   :  { %1587 = vmatpush3.bf16.msra.mxu1 %v2284_v28 }
  0x3c   :  { %200 = vmatmul.mubr.bf16.gmra.mrb[12].mxu0 %v95_v7  ;;  %1588 = vmatprep.subr.bf16.mxu1 %v2839_v47 }
  0x3d   :  { %405 = vmatpush1.bf16.msra.mxu0 %v2272_v22  ;;  %424 = vmatprep.mubr.bf16.mxu0 %v2837_v3 }
  0x3e   :  { %406 = vmatprep.subr.bf16.mxu0 %v2275_v23 }
  0x3f   :  { %1589 = vmatpush3.bf16.msra.mxu1 %v2299_v33 }
  0x40   :  { %1590 = vmatprep.subr.bf16.mxu1 %v2839_v47 }
  0x41   :  { %407 = vmatpush1.bf16.msra.mxu0 %v2294_v32 }
  0x42   :  { %506 = vmatprep.subr.bf16.mxu0 %v2068_v11 }
  0x43   :  { %1591 = vmatpush3.bf16.msra.mxu1 %v2311_v36 }
  0x44   :  { %425 = vmatmul.mubr.bf16.vlgmr.msra.gmra.mrb[16].mxu0 %v2837_v3  ;;  %1592 = vmatprep.subr.bf16.mxu1 %v2839_v47 }
  0x45   :  { %507 = vmatpush1.bf16.msra.mxu0 %v2088_v19  ;;  %538 = vmatprep.mubr.bf16.mxu0 %v2837_v3 }
  0x46   :  { %508 = vmatprep.subr.bf16.mxu0 %v2091_v20 }
  0x47   :  { %1593 = vmatpush3.bf16.msra.mxu1 %v2325_v40 }
  0x48   :  { %1598 = vmatprep.subr.bf16.mxu1 %v2839_v47 }
  0x49   :  { %509 = vmatpush1.bf16.msra.mxu0 %v2113_v27 }
  0x4a   :  { %510 = vmatprep.subr.bf16.mxu0 %v2124_v31  ;;  %1595 = vmatmul.mubr.bf16.vlgmr.msra.gmra.mrb[8].mxu1 %v2837_v3 }
  0x4b   :  { %1599 = vmatpush3.bf16.msra.mxu1 %v2169_v48  ;;  %1614 = vmatprep.mubr.msk.bf16.mxu1 %vm1856_vm1, %v2839_v47 }
  0x4c   :  { %1600 = vmatprep.subr.bf16.mxu1 %v2839_v47 }
  0x4d   :  { %511 = vmatpush1.bf16.msra.mxu0 %v2145_v39 }
  0x4e   :  { %512 = vmatprep.subr.bf16.mxu0 %v2151_v41 }
  0x4f   :  { %1601 = vmatpush3.bf16.msra.mxu1 %v2197_v58 }
  0x50   :  { %1602 = vmatprep.subr.bf16.mxu1 %v2839_v47 }
  0x51   :  { %513 = vmatpush1.bf16.msra.mxu0 %v2178_v51 }
  0x52   :  { %514 = vmatprep.subr.bf16.mxu0 %v2182_v53 }
  0x53   :  { %1603 = vmatpush3.bf16.msra.mxu1 %v2231_v6 }
  0x54   :  { %1604 = vmatprep.subr.bf16.mxu1 %v2839_v47 }
  0x55   :  { %515 = vmatpush1.bf16.msra.mxu0 %v2207_v61 }
  0x56   :  { %516 = vmatprep.subr.bf16.mxu0 %v2216_v0 }
  0x57   :  { %1605 = vmatpush3.bf16.msra.mxu1 %v2260_v17 }
  0x58   :  { %1606 = vmatprep.subr.bf16.mxu1 %v2839_v47 }
  0x59   :  { %517 = vmatpush1.bf16.msra.mxu0 %v2241_v10 }
  0x5a   :  { %518 = vmatprep.subr.bf16.mxu0 %v2245_v12 }
  0x5b   :  { %1607 = vmatpush3.bf16.msra.mxu1 %v2284_v28 }
  0x5c   :  { %1608 = vmatprep.subr.bf16.mxu1 %v2839_v47 }
  0x5d   :  { %519 = vmatpush1.bf16.msra.mxu0 %v2272_v22 }
  0x5e   :  { %520 = vmatprep.subr.bf16.mxu0 %v2275_v23 }
  0x5f   :  { %1609 = vmatpush3.bf16.msra.mxu1 %v2299_v33 }
  0x60   :  { %1610 = vmatprep.subr.bf16.mxu1 %v2839_v47 }
  0x61   :  { %521 = vmatpush1.bf16.msra.mxu0 %v2294_v32 }
  0x62   :  { %620 = vmatprep.subr.bf16.mxu0 %v2068_v11 }
  0x63   :  { %1611 = vmatpush3.bf16.msra.mxu1 %v2311_v36 }
  0x64   :  { %1612 = vmatprep.subr.bf16.mxu1 %v2839_v47 }
  0x67   :  { %1613 = vmatpush3.bf16.msra.mxu1 %v2325_v40 }
  0x68   :  { %1618 = vmatprep.subr.bf16.mxu1 %v2839_v47 }
  0xf7   :  { %v171_v50 = vpop.f32.mrb[0].mxu0 }
  0xf8   :  { %v173_v54 = vpop.f32.mrb[1].mxu0 }
  0xf9   :  { %v175_v56 = vpop.f32.mrb[2].mxu0 }
  0xfa   :  { %v2372_v57 = vadd.f32 %v175_v56, %v125_v52  ;;  %v177_v59 = vpop.f32.mrb[3].mxu0 }
  0xfb   :  { %v2375_v62 = vadd.f32 %v177_v59, %v129_v55 }
  0xfd   :  { %v1572_v8 = vpop.f32.mrb[0].mxu1 }
  0xfe   :  { %v2388_v14 = vadd.f32 %v1572_v8, %v2379_v63  ;;  %v244_v15 = vpop.f32.mrb[1].mxu1 }
  0xff   :  { %v181_v1 = vpop.f32.mrb[4].mxu0  ;;  %v1573_v18 = vpop.f32.mrb[2].mxu1 }
 0x100   :  { %v2381_v2 = vadd.f32 %v181_v1, %v125_v52  ;;  %v183_v4 = vpop.f32.mrb[5].mxu0  ;;  %v2393_v21 = vadd.f32 %v1573_v18, %v2379_v63  ;;  %v247_v24 = vpop.f32.mrb[3].mxu1 }
 0x101   :  { %v2383_v5 = vadd.f32 %v183_v4, %v129_v55  ;;  %v185_v7 = vpop.f32.mrb[6].mxu0  ;;  %v2396_v25 = vadd.f32 %v247_v24, %v2379_v63 }
 0x102   :  { %v2385_v9 = vadd.f32 %v185_v7, %v125_v52  ;;  %v187_v13 = vpop.f32.mrb[7].mxu0 }
 0x103   :  { %v2390_v16 = vadd.f32 %v187_v13, %v129_v55 }
 0x105   :  { %v1576_v38 = vpop.f32.mrb[4].mxu1 }
 0x106   :  { %v2405_v46 = vadd.f32 %v1576_v38, %v2379_v63  ;;  %v260_v56 = vpop.f32.mrb[5].mxu1  ;;  %v348_v38 = vld [vmem:[%s2831_s5] sm:$0x7] }
 0x107   :  { %v191_v29 = vpop.f32.mrb[8].mxu0  ;;  %v2410_v1 = vadd.f32 %v260_v56, %v2379_v63  ;;  %v1577_v4 = vpop.f32.mrb[6].mxu1  ;;  %v2429_v3 = vrot.slane %v348_v38, %v124_v45 }
 0x108   :  { %v2398_v30 = vadd.f32 %v191_v29, %v125_v52  ;;  %v193_v34 = vpop.f32.mrb[9].mxu0  ;;  %2843 = vst [vmem:[#allocation4_spill] sm:$0xff] %v2405_v46  ;;  %v2413_v7 = vadd.f32 %v1577_v4, %v2379_v63  ;;  %v263_v8 = vpop.f32.mrb[7].mxu1 }
 0x109   :  { %v2400_v35 = vadd.f32 %v193_v34, %v129_v55  ;;  %v195_v37 = vpop.f32.mrb[10].mxu0  ;;  %v2416_v13 = vadd.f32 %v263_v8, %v2379_v63  ;;  %v2431_v8 = vrot.slane %v348_v38, %v128_v49 }
 0x10a   :  { %v2402_v42 = vadd.f32 %v195_v37, %v125_v52  ;;  %v197_v43 = vpop.f32.mrb[11].mxu0  ;;  %2845 = vst [vmem:[#allocation6_spill] sm:$0xff] %v2413_v7  ;;  %v174_v7 = vadd.f32 %v173_v54, %v129_v55 }
 0x10b   :  { %v2407_v59 = vadd.f32 %v197_v43, %v129_v55  ;;  %2846 = vst [vmem:[#allocation7_spill] sm:$0xff] %v2416_v13 }
 0x10c   :  { %2842 = vst [vmem:[#allocation3_spill] sm:$0xff] %v2402_v42 }
 0x10d   :  { %2844 = vst [vmem:[#allocation5_spill] sm:$0xff] %v2407_v59 }
 0x10f   :  { %v201_v18 = vpop.f32.mrb[12].mxu0 }
 0x110   :  { %v2418_v24 = vadd.f32 %v201_v18, %v125_v52  ;;  %v203_v29 = vpop.f32.mrb[13].mxu0  ;;  %v172_v18 = vadd.f32 %v171_v50, %v125_v52 }
 0x111   :  { %v2420_v34 = vadd.f32 %v203_v29, %v129_v55  ;;  %v205_v37 = vpop.f32.mrb[14].mxu0 }
 0x112   :  { %2847 = vst [vmem:[#allocation8_spill] sm:$0xff] %v2418_v24  ;;  %v2425_v43 = vadd.f32 %v205_v37, %v125_v52  ;;  %v207_v56 = vpop.f32.mrb[15].mxu0 }
 0x113   :  { %2848 = vst [vmem:[#allocation9_spill] sm:$0xff] %v2420_v34  ;;  %v2427_v4 = vadd.f32 %v207_v56, %v129_v55 }
 0x114   :  { %2849 = vst [vmem:[#allocation10_spill] sm:$0xff] %v2425_v43 }
 0x115   :  { %2850 = vst [vmem:[#allocation11_spill] sm:$0xff] %v2427_v4 }
 0x117   :  { %v426_v47 = vpop.f32.mrb[16].mxu0 }
 0x118   :  { %v427_v60 = vadd.f32 %v426_v47, %v2429_v3  ;;  %v428_v29 = vpop.f32.mrb[17].mxu0  ;;  %v2851_v47 = vsub.s32 2, %v2365_v44 }
 0x119   :  { %v429_v46 = vadd.f32 %v428_v29, %v2431_v8  ;;  %v430_v34 = vpop.f32.mrb[18].mxu0 }
 0x11a   :  { %v473_v24 = vadd.f32 %v427_v60, %v172_v18  ;;  %v431_v13 = vpop.f32.mrb[19].mxu0  ;;  %v2437_v52 = vrot.slane %v348_v38, %v2851_v47 }
 0x11b   :  { %v480_v37 = vadd.f32 %v429_v46, %v174_v7  ;;  %v245_v7 = vadd.f32 %v244_v15, %v2379_v63  ;;  %v2852_v63 = vmov 0.0   ;;  %v2853_v15 = vmov 0  }
 0x11c   :  { %v1439_v43 = vmul.f32 -1.442695, %v473_v24  ;;  %v723_v38 = vsel %vm722_vm3, 1, %v2853_v15 }
 0x11d   :  { %v1440_v56 = vmul.f32 -1.442695, %v480_v37  ;;  %v467_v4 = vpop.f32.mrb[8].mxu1  ;;  %725 = vperm.xlu1 %1768, %v723_v38  }
 0x11e   :  { %1769 = vpow2.f32 %v1439_v43  ;;  %v1596_v45 = vpop.f32.mrb[9].mxu1  ;;  %v468_v60 = vadd.f32 %v467_v4, %v2437_v52 }
 0x11f   :  { %v470_v59 = vpop.f32.mrb[10].mxu1  ;;  %1771 = vpow2.f32 %v1440_v56 }
 0x120   :  { %v1597_v49 = vpop.f32.mrb[11].mxu1 }
 0x128   :  { %v1770_v42 = vpop.eup %1769 }
 0x129   :  { %v477_v50 = vadd.f32 1.0, %v1770_v42  ;;  %v1772_v54 = vpop.eup %1771 }
 0x12a   :  { %v484_v55 = vadd.f32 1.0, %v1772_v54 }
 0x12b   :  { %1773 = vrcp.f32 %v477_v50 }
 0x12c   :  { %1775 = vrcp.f32 %v484_v55 }
 0x135   :  { %v1774_v46 = vpop.eup %1773 }
 0x136   :  { %v487_v13 = vmul.f32 %v1774_v46, %v468_v60  ;;  %v1776_v59 = vpop.eup %1775 }
 0x137   :  { %v490_v34 = vsub.f32 1.0, %v1776_v59  ;;  %v492_v18 = vmul.f32 0.0, %v1776_v59 }
 0x138   :  { %v488_v24 = vadd.f32 %v487_v13, %v245_v7 }
 0x13a   :  { %1777 = vtanh.f32 %v488_v24 }
 0x144   :  { %v1778_v43 = vpop.eup %1777 }
 0x145   :  { %v491_v42 = vmul.f32 %v1778_v43, %v490_v34 }
 0x147   :  { %v2441_v29 = vadd.f32 %v492_v18, %v491_v42 }
 0x149   :  { %v505_v44 = vpack.c.bf16 %v2441_v29, %v2441_v29 }
 0x14b   :  { %539 = vmatmul.mubr.bf16.vlgmr.msra.gmra.mrb[20].mxu0 %v505_v44  ;;  %1615 = vmatmul.mubr.bf16.vlgmr.msra.gmra.mrb[12].mxu1 %v505_v44 }
 0x14c   :  { %621 = vmatpush1.bf16.msra.mxu0 %v2088_v19  ;;  %1619 = vmatpush3.bf16.msra.mxu1 %v2169_v48 }
 0x14d   :  { %622 = vmatprep.subr.bf16.mxu0 %v2091_v20  ;;  %1620 = vmatprep.subr.bf16.mxu1 %v2852_v63 }
 0x14e   :  { %652 = vmatprep.mubr.bf16.mxu0 %v2853_v15  ;;  %1634 = vmatprep.mubr.msk.bf16.mxu1 %vm1856_vm1, %v2852_v63 }
 0x150   :  { %623 = vmatpush1.bf16.msra.mxu0 %v2113_v27  ;;  %1621 = vmatpush3.bf16.msra.mxu1 %v2197_v58 }
 0x151   :  { %624 = vmatprep.subr.bf16.mxu0 %v2124_v31  ;;  %1622 = vmatprep.subr.bf16.mxu1 %v2852_v63 }
 0x154   :  { %625 = vmatpush1.bf16.msra.mxu0 %v2145_v39  ;;  %1623 = vmatpush3.bf16.msra.mxu1 %v2231_v6 }
 0x155   :  { %626 = vmatprep.subr.bf16.mxu0 %v2151_v41  ;;  %1624 = vmatprep.subr.bf16.mxu1 %v2852_v63 }
 0x158   :  { %627 = vmatpush1.bf16.msra.mxu0 %v2178_v51  ;;  %1625 = vmatpush3.bf16.msra.mxu1 %v2260_v17 }
 0x159   :  { %628 = vmatprep.subr.bf16.mxu0 %v2182_v53  ;;  %1626 = vmatprep.subr.bf16.mxu1 %v2852_v63 }
 0x15c   :  { %629 = vmatpush1.bf16.msra.mxu0 %v2207_v61  ;;  %1627 = vmatpush3.bf16.msra.mxu1 %v2284_v28 }
 0x15d   :  { %630 = vmatprep.subr.bf16.mxu0 %v2216_v0  ;;  %1628 = vmatprep.subr.bf16.mxu1 %v2852_v63 }
 0x160   :  { %631 = vmatpush1.bf16.msra.mxu0 %v2241_v10  ;;  %1629 = vmatpush3.bf16.msra.mxu1 %v2299_v33 }
 0x161   :  { %632 = vmatprep.subr.bf16.mxu0 %v2245_v12  ;;  %1630 = vmatprep.subr.bf16.mxu1 %v2852_v63 }
 0x164   :  { %633 = vmatpush1.bf16.msra.mxu0 %v2272_v22  ;;  %1631 = vmatpush3.bf16.msra.mxu1 %v2311_v36 }
 0x165   :  { %634 = vmatprep.subr.bf16.mxu0 %v2275_v23  ;;  %1632 = vmatprep.subr.bf16.mxu1 %v2852_v63 }
 0x168   :  { %635 = vmatpush1.bf16.msra.mxu0 %v2294_v32  ;;  %1633 = vmatpush3.bf16.msra.mxu1 %v2325_v40 }
 0x169   :  { %734 = vmatprep.subr.bf16.mxu0 %v2068_v11  ;;  %1638 = vmatprep.subr.bf16.mxu1 %v2852_v63 }
 0x21e   :  { %v540_v4 = vpop.f32.mrb[20].mxu0  ;;  %v581_v37 = vpop.f32.mrb[12].mxu1 }
 0x21f   :  { %v541_v56 = vadd.f32 %v540_v4, %v2429_v3  ;;  %v542_v45 = vpop.f32.mrb[21].mxu0  ;;  %v1616_v49 = vpop.f32.mrb[13].mxu1  ;;  %v582_v18 = vadd.f32 %v581_v37, %v2437_v52 }
 0x220   :  { %v543_v50 = vadd.f32 %v542_v45, %v2431_v8  ;;  %v544_v47 = vpop.f32.mrb[22].mxu0  ;;  %v584_v54 = vpop.f32.mrb[14].mxu1 }
 0x221   :  { %v587_v55 = vadd.f32 %v541_v56, %v2372_v57  ;;  %v545_v60 = vpop.f32.mrb[23].mxu0  ;;  %v1617_v46 = vpop.f32.mrb[15].mxu1 }
 0x222   :  { %v594_v7 = vadd.f32 %v543_v50, %v2375_v62 }
 0x223   :  { %v1441_v13 = vmul.f32 -1.442695, %v587_v55 }
 0x224   :  { %v1442_v24 = vmul.f32 -1.442695, %v594_v7 }
 0x225   :  { %1779 = vpow2.f32 %v1441_v13 }
 0x226   :  { %1781 = vpow2.f32 %v1442_v24 }
 0x22f   :  { %v1780_v59 = vpop.eup %1779 }
 0x230   :  { %v591_v34 = vadd.f32 1.0, %v1780_v59  ;;  %v1782_v43 = vpop.eup %1781 }
 0x231   :  { %v598_v42 = vadd.f32 1.0, %v1782_v43 }
 0x232   :  { %1783 = vrcp.f32 %v591_v34 }
 0x233   :  { %1785 = vrcp.f32 %v598_v42 }
 0x23c   :  { %v1784_v44 = vpop.eup %1783 }
 0x23d   :  { %v601_v38 = vmul.f32 %v1784_v44, %v582_v18  ;;  %v1786_v4 = vpop.eup %1785 }
 0x23e   :  { %v604_v56 = vsub.f32 1.0, %v1786_v4  ;;  %v606_v49 = vmul.f32 %v1786_v4, %v2441_v29 }
 0x23f   :  { %v602_v57 = vadd.f32 %v601_v38, %v2396_v25  ;;  %v837_v25 = vsel %vm836_vm4, 1, %v2853_v15 }
 0x240   :  { %839 = vperm.xlu1 %1768, %v837_v25  }
 0x241   :  { %1787 = vtanh.f32 %v602_v57 }
 0x24b   :  { %v1788_v62 = vpop.eup %1787 }
 0x24c   :  { %v605_v45 = vmul.f32 %v1788_v62, %v604_v56 }
 0x24e   :  { %v2489_v50 = vadd.f32 %v606_v49, %v605_v45 }
 0x250   :  { %v619_v47 = vpack.c.bf16 %v2489_v50, %v2489_v50 }
 0x252   :  { %653 = vmatmul.mubr.bf16.vlgmr.msra.gmra.mrb[24].mxu0 %v619_v47  ;;  %1635 = vmatmul.mubr.bf16.vlgmr.msra.gmra.mrb[16].mxu1 %v619_v47 }
 0x253   :  { %735 = vmatpush1.bf16.msra.mxu0 %v2088_v19  ;;  %1639 = vmatpush3.bf16.msra.mxu1 %v2169_v48 }
 0x254   :  { %736 = vmatprep.subr.bf16.mxu0 %v2091_v20  ;;  %1640 = vmatprep.subr.bf16.mxu1 %v2852_v63 }
 0x255   :  { %766 = vmatprep.mubr.bf16.mxu0 %v2853_v15  ;;  %1654 = vmatprep.mubr.msk.bf16.mxu1 %vm1856_vm1, %v2852_v63 }
 0x257   :  { %737 = vmatpush1.bf16.msra.mxu0 %v2113_v27  ;;  %1641 = vmatpush3.bf16.msra.mxu1 %v2197_v58 }
 0x258   :  { %738 = vmatprep.subr.bf16.mxu0 %v2124_v31  ;;  %1642 = vmatprep.subr.bf16.mxu1 %v2852_v63 }
 0x25b   :  { %739 = vmatpush1.bf16.msra.mxu0 %v2145_v39  ;;  %1643 = vmatpush3.bf16.msra.mxu1 %v2231_v6 }
 0x25c   :  { %740 = vmatprep.subr.bf16.mxu0 %v2151_v41  ;;  %1644 = vmatprep.subr.bf16.mxu1 %v2852_v63 }
 0x25f   :  { %741 = vmatpush1.bf16.msra.mxu0 %v2178_v51  ;;  %1645 = vmatpush3.bf16.msra.mxu1 %v2260_v17 }
 0x260   :  { %742 = vmatprep.subr.bf16.mxu0 %v2182_v53  ;;  %1646 = vmatprep.subr.bf16.mxu1 %v2852_v63 }
 0x263   :  { %743 = vmatpush1.bf16.msra.mxu0 %v2207_v61  ;;  %1647 = vmatpush3.bf16.msra.mxu1 %v2284_v28 }
 0x264   :  { %744 = vmatprep.subr.bf16.mxu0 %v2216_v0  ;;  %1648 = vmatprep.subr.bf16.mxu1 %v2852_v63 }
 0x267   :  { %745 = vmatpush1.bf16.msra.mxu0 %v2241_v10  ;;  %1649 = vmatpush3.bf16.msra.mxu1 %v2299_v33 }
 0x268   :  { %746 = vmatprep.subr.bf16.mxu0 %v2245_v12  ;;  %1650 = vmatprep.subr.bf16.mxu1 %v2852_v63 }
 0x26b   :  { %747 = vmatpush1.bf16.msra.mxu0 %v2272_v22  ;;  %1651 = vmatpush3.bf16.msra.mxu1 %v2311_v36 }
 0x26c   :  { %748 = vmatprep.subr.bf16.mxu0 %v2275_v23  ;;  %1652 = vmatprep.subr.bf16.mxu1 %v2852_v63 }
 0x26f   :  { %749 = vmatpush1.bf16.msra.mxu0 %v2294_v32  ;;  %1653 = vmatpush3.bf16.msra.mxu1 %v2325_v40 }
 0x270   :  { %848 = vmatprep.subr.bf16.mxu0 %v2068_v11  ;;  %1658 = vmatprep.subr.bf16.mxu1 %v2852_v63 }
 0x325   :  { %v654_v37 = vpop.f32.mrb[24].mxu0  ;;  %v695_v54 = vpop.f32.mrb[16].mxu1 }
 0x326   :  { %v655_v55 = vadd.f32 %v654_v37, %v2429_v3  ;;  %v656_v60 = vpop.f32.mrb[25].mxu0  ;;  %v1636_v46 = vpop.f32.mrb[17].mxu1  ;;  %v696_v62 = vadd.f32 %v695_v54, %v2437_v52 }
 0x327   :  { %v657_v7 = vadd.f32 %v656_v60, %v2431_v8  ;;  %v658_v13 = vpop.f32.mrb[26].mxu0  ;;  %v698_v24 = vpop.f32.mrb[18].mxu1 }
 0x328   :  { %v701_v59 = vadd.f32 %v655_v55, %v2381_v2  ;;  %v659_v34 = vpop.f32.mrb[27].mxu0  ;;  %v1637_v43 = vpop.f32.mrb[19].mxu1 }
 0x329   :  { %v708_v42 = vadd.f32 %v657_v7, %v2383_v5 }
 0x32a   :  { %v1443_v18 = vmul.f32 -1.442695, %v701_v59 }
 0x32b   :  { %v1444_v44 = vmul.f32 -1.442695, %v708_v42 }
 0x32c   :  { %1789 = vpow2.f32 %v1443_v18 }
 0x32d   :  { %1791 = vpow2.f32 %v1444_v44 }
 0x336   :  { %v1790_v38 = vpop.eup %1789 }
 0x337   :  { %v705_v57 = vadd.f32 1.0, %v1790_v38  ;;  %v1792_v4 = vpop.eup %1791 }
 0x338   :  { %v712_v56 = vadd.f32 1.0, %v1792_v4 }
 0x339   :  { %1793 = vrcp.f32 %v705_v57 }
 0x33a   :  { %1795 = vrcp.f32 %v712_v56 }
 0x343   :  { %v1794_v45 = vpop.eup %1793 }
 0x344   :  { %v715_v49 = vmul.f32 %v1794_v45, %v696_v62  ;;  %v1796_v47 = vpop.eup %1795 }
 0x345   :  { %v718_v25 = vsub.f32 1.0, %v1796_v47  ;;  %v720_v55 = vmul.f32 %v1796_v47, %v2489_v50 }
 0x346   :  { %v716_v2 = vadd.f32 %v715_v49, %v2388_v14  ;;  %v951_v14 = vsel %vm950_vm5, 1, %v2853_v15 }
 0x347   :  { %953 = vperm.xlu0 %1767, %v951_v14  }
 0x348   :  { %1797 = vtanh.f32 %v716_v2 }
 0x352   :  { %v1798_v5 = vpop.eup %1797 }
 0x353   :  { %v719_v37 = vmul.f32 %v1798_v5, %v718_v25 }
 0x355   :  { %v2537_v60 = vadd.f32 %v720_v55, %v719_v37 }
 0x357   :  { %v733_v46 = vpack.c.bf16 %v2537_v60, %v2537_v60 }
 0x359   :  { %767 = vmatmul.mubr.bf16.vlgmr.msra.gmra.mrb[28].mxu0 %v733_v46  ;;  %1655 = vmatmul.mubr.bf16.vlgmr.msra.gmra.mrb[20].mxu1 %v733_v46 }
 0x35a   :  { %849 = vmatpush1.bf16.msra.mxu0 %v2088_v19  ;;  %1659 = vmatpush3.bf16.msra.mxu1 %v2169_v48 }
 0x35b   :  { %850 = vmatprep.subr.bf16.mxu0 %v2091_v20  ;;  %1660 = vmatprep.subr.bf16.mxu1 %v2852_v63 }
 0x35c   :  { %880 = vmatprep.mubr.bf16.mxu0 %v2853_v15  ;;  %1674 = vmatprep.mubr.msk.bf16.mxu1 %vm1856_vm1, %v2852_v63 }
 0x35e   :  { %851 = vmatpush1.bf16.msra.mxu0 %v2113_v27  ;;  %1661 = vmatpush3.bf16.msra.mxu1 %v2197_v58 }
 0x35f   :  { %852 = vmatprep.subr.bf16.mxu0 %v2124_v31  ;;  %1662 = vmatprep.subr.bf16.mxu1 %v2852_v63 }
 0x362   :  { %853 = vmatpush1.bf16.msra.mxu0 %v2145_v39  ;;  %1663 = vmatpush3.bf16.msra.mxu1 %v2231_v6 }
 0x363   :  { %854 = vmatprep.subr.bf16.mxu0 %v2151_v41  ;;  %1664 = vmatprep.subr.bf16.mxu1 %v2852_v63 }
 0x366   :  { %855 = vmatpush1.bf16.msra.mxu0 %v2178_v51  ;;  %1665 = vmatpush3.bf16.msra.mxu1 %v2260_v17 }
 0x367   :  { %856 = vmatprep.subr.bf16.mxu0 %v2182_v53  ;;  %1666 = vmatprep.subr.bf16.mxu1 %v2852_v63 }
 0x36a   :  { %857 = vmatpush1.bf16.msra.mxu0 %v2207_v61  ;;  %1667 = vmatpush3.bf16.msra.mxu1 %v2284_v28 }
 0x36b   :  { %858 = vmatprep.subr.bf16.mxu0 %v2216_v0  ;;  %1668 = vmatprep.subr.bf16.mxu1 %v2852_v63 }
 0x36e   :  { %859 = vmatpush1.bf16.msra.mxu0 %v2241_v10  ;;  %1669 = vmatpush3.bf16.msra.mxu1 %v2299_v33 }
 0x36f   :  { %860 = vmatprep.subr.bf16.mxu0 %v2245_v12  ;;  %1670 = vmatprep.subr.bf16.mxu1 %v2852_v63 }
 0x372   :  { %861 = vmatpush1.bf16.msra.mxu0 %v2272_v22  ;;  %1671 = vmatpush3.bf16.msra.mxu1 %v2311_v36 }
 0x373   :  { %862 = vmatprep.subr.bf16.mxu0 %v2275_v23  ;;  %1672 = vmatprep.subr.bf16.mxu1 %v2852_v63 }
 0x376   :  { %863 = vmatpush1.bf16.msra.mxu0 %v2294_v32  ;;  %1673 = vmatpush3.bf16.msra.mxu1 %v2325_v40 }
 0x377   :  { %962 = vmatprep.subr.bf16.mxu0 %v2068_v11  ;;  %1678 = vmatprep.subr.bf16.mxu1 %v2852_v63 }
 0x42c   :  { %v768_v54 = vpop.f32.mrb[28].mxu0  ;;  %v809_v7 = vpop.f32.mrb[20].mxu1 }
 0x42d   :  { %v769_v13 = vadd.f32 %v768_v54, %v2429_v3  ;;  %v770_v24 = vpop.f32.mrb[29].mxu0  ;;  %v1656_v59 = vpop.f32.mrb[21].mxu1  ;;  %v810_v2 = vadd.f32 %v809_v7, %v2437_v52 }
 0x42e   :  { %v771_v34 = vadd.f32 %v770_v24, %v2431_v8  ;;  %v772_v43 = vpop.f32.mrb[30].mxu0  ;;  %v812_v42 = vpop.f32.mrb[22].mxu1 }
 0x42f   :  { %v815_v18 = vadd.f32 %v769_v13, %v2385_v9  ;;  %v773_v44 = vpop.f32.mrb[31].mxu0  ;;  %v1657_v38 = vpop.f32.mrb[23].mxu1 }
 0x430   :  { %v822_v57 = vadd.f32 %v771_v34, %v2390_v16 }
 0x431   :  { %v1445_v26 = vmul.f32 -1.442695, %v815_v18 }
 0x432   :  { %v1446_v4 = vmul.f32 -1.442695, %v822_v57 }
 0x433   :  { %1799 = vpow2.f32 %v1445_v26 }
 0x434   :  { %1801 = vpow2.f32 %v1446_v4 }
 0x43d   :  { %v1800_v56 = vpop.eup %1799 }
 0x43e   :  { %v819_v62 = vadd.f32 1.0, %v1800_v56  ;;  %v1802_v45 = vpop.eup %1801 }
 0x43f   :  { %v826_v49 = vadd.f32 1.0, %v1802_v45 }
 0x440   :  { %1803 = vrcp.f32 %v819_v62 }
 0x441   :  { %1805 = vrcp.f32 %v826_v49 }
 0x44a   :  { %v1804_v47 = vpop.eup %1803 }
 0x44b   :  { %v829_v25 = vmul.f32 %v1804_v47, %v810_v2  ;;  %v1806_v5 = vpop.eup %1805 }
 0x44c   :  { %v832_v37 = vsub.f32 1.0, %v1806_v5  ;;  %v834_v46 = vmul.f32 %v1806_v5, %v2537_v60 }
 0x44d   :  { %v830_v9 = vadd.f32 %v829_v25, %v2393_v21  ;;  %v2627_v21 = vld [vmem:[%s2829_s0] sm:$0xff] }
 0x44e   :  { %vm1064_vm6 = vcmp.eq.s32.totalorder %v2627_v21, 6  ;;  %vm1178_vm7 = vcmp.eq.s32.totalorder %v2627_v21, 7  ;;  %vm1292_vm8 = vcmp.eq.s32.totalorder %v2627_v21, 8  ;;  %v2859_v21 = vld [vmem:[#allocation4_spill] sm:$0xff] }
 0x44f   :  { %1807 = vtanh.f32 %v830_v9  ;;  %v1065_v7 = vsel %vm1064_vm6, 1, %v2853_v15 }
 0x450   :  { %1067 = vperm.xlu1 %1768, %v1065_v7  }
 0x459   :  { %v1808_v16 = vpop.eup %1807 }
 0x45a   :  { %v833_v55 = vmul.f32 %v1808_v16, %v832_v37 }
 0x45c   :  { %v2585_v14 = vadd.f32 %v834_v46, %v833_v55 }
 0x45e   :  { %v847_v54 = vpack.c.bf16 %v2585_v14, %v2585_v14 }
 0x460   :  { %881 = vmatmul.mubr.bf16.vlgmr.msra.gmra.mrb[32].mxu0 %v847_v54  ;;  %1675 = vmatmul.mubr.bf16.vlgmr.msra.gmra.mrb[24].mxu1 %v847_v54 }
 0x461   :  { %963 = vmatpush1.bf16.msra.mxu0 %v2088_v19  ;;  %1679 = vmatpush3.bf16.msra.mxu1 %v2169_v48 }
 0x462   :  { %964 = vmatprep.subr.bf16.mxu0 %v2091_v20  ;;  %1680 = vmatprep.subr.bf16.mxu1 %v2852_v63 }
 0x463   :  { %994 = vmatprep.mubr.bf16.mxu0 %v2853_v15  ;;  %1694 = vmatprep.mubr.msk.bf16.mxu1 %vm1856_vm1, %v2852_v63 }
 0x465   :  { %965 = vmatpush1.bf16.msra.mxu0 %v2113_v27  ;;  %1681 = vmatpush3.bf16.msra.mxu1 %v2197_v58 }
 0x466   :  { %966 = vmatprep.subr.bf16.mxu0 %v2124_v31  ;;  %1682 = vmatprep.subr.bf16.mxu1 %v2852_v63 }
 0x469   :  { %967 = vmatpush1.bf16.msra.mxu0 %v2145_v39  ;;  %1683 = vmatpush3.bf16.msra.mxu1 %v2231_v6 }
 0x46a   :  { %968 = vmatprep.subr.bf16.mxu0 %v2151_v41  ;;  %1684 = vmatprep.subr.bf16.mxu1 %v2852_v63 }
 0x46d   :  { %969 = vmatpush1.bf16.msra.mxu0 %v2178_v51  ;;  %1685 = vmatpush3.bf16.msra.mxu1 %v2260_v17 }
 0x46e   :  { %970 = vmatprep.subr.bf16.mxu0 %v2182_v53  ;;  %1686 = vmatprep.subr.bf16.mxu1 %v2852_v63 }
 0x471   :  { %971 = vmatpush1.bf16.msra.mxu0 %v2207_v61  ;;  %1687 = vmatpush3.bf16.msra.mxu1 %v2284_v28 }
 0x472   :  { %972 = vmatprep.subr.bf16.mxu0 %v2216_v0  ;;  %1688 = vmatprep.subr.bf16.mxu1 %v2852_v63 }
 0x475   :  { %973 = vmatpush1.bf16.msra.mxu0 %v2241_v10  ;;  %1689 = vmatpush3.bf16.msra.mxu1 %v2299_v33 }
 0x476   :  { %974 = vmatprep.subr.bf16.mxu0 %v2245_v12  ;;  %1690 = vmatprep.subr.bf16.mxu1 %v2852_v63 }
 0x479   :  { %975 = vmatpush1.bf16.msra.mxu0 %v2272_v22  ;;  %1691 = vmatpush3.bf16.msra.mxu1 %v2311_v36 }
 0x47a   :  { %976 = vmatprep.subr.bf16.mxu0 %v2275_v23  ;;  %1692 = vmatprep.subr.bf16.mxu1 %v2852_v63 }
 0x47d   :  { %977 = vmatpush1.bf16.msra.mxu0 %v2294_v32  ;;  %1693 = vmatpush3.bf16.msra.mxu1 %v2325_v40 }
 0x47e   :  { %1076 = vmatprep.subr.bf16.mxu0 %v2068_v11  ;;  %1698 = vmatprep.subr.bf16.mxu1 %v2852_v63 }
 0x533   :  { %v882_v13 = vpop.f32.mrb[32].mxu0  ;;  %v923_v24 = vpop.f32.mrb[24].mxu1 }
 0x534   :  { %v883_v59 = vadd.f32 %v882_v13, %v2429_v3  ;;  %v884_v34 = vpop.f32.mrb[33].mxu0  ;;  %v1676_v43 = vpop.f32.mrb[25].mxu1  ;;  %v924_v25 = vadd.f32 %v923_v24, %v2437_v52 }
 0x535   :  { %v885_v42 = vadd.f32 %v884_v34, %v2431_v8  ;;  %v886_v18 = vpop.f32.mrb[34].mxu0  ;;  %v926_v44 = vpop.f32.mrb[26].mxu1 }
 0x536   :  { %v929_v38 = vadd.f32 %v883_v59, %v2398_v30  ;;  %v887_v57 = vpop.f32.mrb[35].mxu0  ;;  %v1677_v26 = vpop.f32.mrb[27].mxu1 }
 0x537   :  { %v936_v4 = vadd.f32 %v885_v42, %v2400_v35 }
 0x538   :  { %v1447_v56 = vmul.f32 -1.442695, %v929_v38  ;;  %v2854_v38 = vld [vmem:[#allocation3_spill] sm:$0xff] }
 0x539   :  { %v1448_v62 = vmul.f32 -1.442695, %v936_v4  ;;  %v2855_v4 = vld [vmem:[#allocation5_spill] sm:$0xff] }
 0x53a   :  { %1809 = vpow2.f32 %v1447_v56 }
 0x53b   :  { %1811 = vpow2.f32 %v1448_v62 }
 0x544   :  { %v1810_v45 = vpop.eup %1809 }
 0x545   :  { %v933_v49 = vadd.f32 1.0, %v1810_v45  ;;  %v1812_v2 = vpop.eup %1811 }
 0x546   :  { %v940_v47 = vadd.f32 1.0, %v1812_v2 }
 0x547   :  { %1813 = vrcp.f32 %v933_v49 }
 0x548   :  { %1815 = vrcp.f32 %v940_v47 }
 0x551   :  { %v1814_v9 = vpop.eup %1813 }
 0x552   :  { %v943_v5 = vmul.f32 %v1814_v9, %v924_v25  ;;  %v1816_v37 = vpop.eup %1815 }
 0x553   :  { %v946_v16 = vsub.f32 1.0, %v1816_v37  ;;  %v948_v46 = vmul.f32 %v1816_v37, %v2585_v14  ;;  %v2856_v37 = vld [vmem:[#allocation7_spill] sm:$0xff] }
 0x554   :  { %v944_v30 = vadd.f32 %v943_v5, %v2410_v1  ;;  %v1179_v1 = vsel %vm1178_vm7, 1, %v2853_v15 }
 0x555   :  { %1181 = vperm.xlu0 %1767, %v1179_v1  }
 0x556   :  { %1817 = vtanh.f32 %v944_v30 }
 0x560   :  { %v1818_v35 = vpop.eup %1817 }
 0x561   :  { %v947_v55 = vmul.f32 %v1818_v35, %v946_v16 }
 0x563   :  { %v2638_v54 = vadd.f32 %v948_v46, %v947_v55 }
 0x565   :  { %v961_v7 = vpack.c.bf16 %v2638_v54, %v2638_v54 }
 0x567   :  { %995 = vmatmul.mubr.bf16.vlgmr.msra.gmra.mrb[36].mxu0 %v961_v7  ;;  %1695 = vmatmul.mubr.bf16.vlgmr.msra.gmra.mrb[28].mxu1 %v961_v7 }
 0x568   :  { %1077 = vmatpush1.bf16.msra.mxu0 %v2088_v19  ;;  %1699 = vmatpush3.bf16.msra.mxu1 %v2169_v48 }
 0x569   :  { %1078 = vmatprep.subr.bf16.mxu0 %v2091_v20  ;;  %1700 = vmatprep.subr.bf16.mxu1 %v2852_v63 }
 0x56a   :  { %1108 = vmatprep.mubr.bf16.mxu0 %v2853_v15  ;;  %1714 = vmatprep.mubr.msk.bf16.mxu1 %vm1856_vm1, %v2852_v63 }
 0x56c   :  { %1079 = vmatpush1.bf16.msra.mxu0 %v2113_v27  ;;  %1701 = vmatpush3.bf16.msra.mxu1 %v2197_v58 }
 0x56d   :  { %1080 = vmatprep.subr.bf16.mxu0 %v2124_v31  ;;  %1702 = vmatprep.subr.bf16.mxu1 %v2852_v63 }
 0x570   :  { %1081 = vmatpush1.bf16.msra.mxu0 %v2145_v39  ;;  %1703 = vmatpush3.bf16.msra.mxu1 %v2231_v6 }
 0x571   :  { %1082 = vmatprep.subr.bf16.mxu0 %v2151_v41  ;;  %1704 = vmatprep.subr.bf16.mxu1 %v2852_v63 }
 0x574   :  { %1083 = vmatpush1.bf16.msra.mxu0 %v2178_v51  ;;  %1705 = vmatpush3.bf16.msra.mxu1 %v2260_v17 }
 0x575   :  { %1084 = vmatprep.subr.bf16.mxu0 %v2182_v53  ;;  %1706 = vmatprep.subr.bf16.mxu1 %v2852_v63 }
 0x578   :  { %1085 = vmatpush1.bf16.msra.mxu0 %v2207_v61  ;;  %1707 = vmatpush3.bf16.msra.mxu1 %v2284_v28 }
 0x579   :  { %1086 = vmatprep.subr.bf16.mxu0 %v2216_v0  ;;  %1708 = vmatprep.subr.bf16.mxu1 %v2852_v63 }
 0x57c   :  { %1087 = vmatpush1.bf16.msra.mxu0 %v2241_v10  ;;  %1709 = vmatpush3.bf16.msra.mxu1 %v2299_v33 }
 0x57d   :  { %1088 = vmatprep.subr.bf16.mxu0 %v2245_v12  ;;  %1710 = vmatprep.subr.bf16.mxu1 %v2852_v63 }
 0x580   :  { %1089 = vmatpush1.bf16.msra.mxu0 %v2272_v22  ;;  %1711 = vmatpush3.bf16.msra.mxu1 %v2311_v36 }
 0x581   :  { %1090 = vmatprep.subr.bf16.mxu0 %v2275_v23  ;;  %1712 = vmatprep.subr.bf16.mxu1 %v2852_v63 }
 0x584   :  { %1091 = vmatpush1.bf16.msra.mxu0 %v2294_v32  ;;  %1713 = vmatpush3.bf16.msra.mxu1 %v2325_v40 }
 0x585   :  { %1190 = vmatprep.subr.bf16.mxu0 %v2068_v11  ;;  %1718 = vmatprep.subr.bf16.mxu1 %v2852_v63 }
 0x63a   :  { %v996_v13 = vpop.f32.mrb[36].mxu0  ;;  %v1037_v24 = vpop.f32.mrb[28].mxu1 }
 0x63b   :  { %v997_v59 = vadd.f32 %v996_v13, %v2429_v3  ;;  %v998_v34 = vpop.f32.mrb[37].mxu0  ;;  %v1696_v43 = vpop.f32.mrb[29].mxu1  ;;  %v1038_v9 = vadd.f32 %v1037_v24, %v2437_v52 }
 0x63c   :  { %v999_v42 = vadd.f32 %v998_v34, %v2431_v8  ;;  %v1000_v18 = vpop.f32.mrb[38].mxu0  ;;  %v1040_v44 = vpop.f32.mrb[30].mxu1 }
 0x63d   :  { %v1043_v57 = vadd.f32 %v997_v59, %v2854_v38  ;;  %v1001_v11 = vpop.f32.mrb[39].mxu0  ;;  %v1697_v26 = vpop.f32.mrb[31].mxu1 }
 0x63e   :  { %v1050_v56 = vadd.f32 %v999_v42, %v2855_v4  ;;  %v1299_v11 = vld [vmem:[%s2832_s6] sm:$0xff]  ;;  %v1300_v26 = vld [vmem:[%s2832_s6 + $0x8] sm:$0xff] }
 0x63f   :  { %v1449_v62 = vmul.f32 -1.442695, %v1043_v57  ;;  %v1316_v4 = vpack.c.bf16 %v1300_v26, %v1299_v11 }
 0x640   :  { %v1450_v45 = vmul.f32 -1.442695, %v1050_v56  ;;  %v1301_v56 = vld [vmem:[%s2832_s6 + $0x10] sm:$0xff] }
 0x641   :  { %1819 = vpow2.f32 %v1449_v62  ;;  %v1302_v62 = vld [vmem:[%s2832_s6 + $0x18] sm:$0xff] }
 0x642   :  { %1821 = vpow2.f32 %v1450_v45  ;;  %v1317_v45 = vpack.c.bf16 %v1302_v62, %v1301_v56 }
 0x64b   :  { %v1820_v49 = vpop.eup %1819 }
 0x64c   :  { %v1047_v2 = vadd.f32 1.0, %v1820_v49  ;;  %v1822_v47 = vpop.eup %1821  ;;  %v1303_v49 = vld [vmem:[%s2832_s6 + $0x20] sm:$0xff] }
 0x64d   :  { %v1054_v25 = vadd.f32 1.0, %v1822_v47 }
 0x64e   :  { %1823 = vrcp.f32 %v1047_v2  ;;  %v1304_v2 = vld [vmem:[%s2832_s6 + $0x28] sm:$0xff] }
 0x64f   :  { %1825 = vrcp.f32 %v1054_v25  ;;  %v1318_v47 = vpack.c.bf16 %v1304_v2, %v1303_v49  ;;  %v1305_v25 = vld [vmem:[%s2832_s6 + $0x30] sm:$0xff] }
 0x658   :  { %v1824_v5 = vpop.eup %1823 }
 0x659   :  { %v1057_v30 = vmul.f32 %v1824_v5, %v1038_v9  ;;  %v1826_v35 = vpop.eup %1825  ;;  %v1306_v9 = vld [vmem:[%s2832_s6 + $0x38] sm:$0xff] }
 0x65a   :  { %v1060_v55 = vsub.f32 1.0, %v1826_v35  ;;  %v1062_v1 = vmul.f32 %v1826_v35, %v2638_v54  ;;  %v1319_v5 = vpack.c.bf16 %v1306_v9, %v1305_v25  ;;  %v1309_v35 = vld [vmem:[%s2832_s6 + $0x50] sm:$0xff] }
 0x65b   :  { %v1058_v16 = vadd.f32 %v1057_v30, %v2856_v37  ;;  %v1307_v30 = vld [vmem:[%s2832_s6 + $0x40] sm:$0xff]  ;;  %v1308_v37 = vld [vmem:[%s2832_s6 + $0x48] sm:$0xff] }
 0x65d   :  { %1827 = vtanh.f32 %v1058_v16  ;;  %v1320_v16 = vpack.c.bf16 %v1308_v37, %v1307_v30 }
 0x667   :  { %v1828_v46 = vpop.eup %1827 }
 0x668   :  { %v1061_v7 = vmul.f32 %v1828_v46, %v1060_v55  ;;  %v1310_v55 = vld [vmem:[%s2832_s6 + $0x58] sm:$0xff] }
 0x669   :  { %v1321_v46 = vpack.c.bf16 %v1310_v55, %v1309_v35 }
 0x66a   :  { %v2686_v13 = vadd.f32 %v1062_v1, %v1061_v7  ;;  %v1311_v7 = vld [vmem:[%s2832_s6 + $0x60] sm:$0xff]  ;;  %v1312_v1 = vld [vmem:[%s2832_s6 + $0x68] sm:$0xff] }
 0x66c   :  { %v1075_v59 = vpack.c.bf16 %v2686_v13, %v2686_v13 }
 0x66e   :  { %1109 = vmatmul.mubr.bf16.vlgmr.msra.gmra.mrb[40].mxu0 %v1075_v59  ;;  %1715 = vmatmul.mubr.bf16.vlgmr.msra.gmra.mrb[32].mxu1 %v1075_v59  ;;  %v1322_v59 = vpack.c.bf16 %v1312_v1, %v1311_v7  ;;  %v1456_v1 = vld [vmem:[%s2835_s9] ss:$0 sm:$0xff] }
 0x66f   :  { %1191 = vmatpush1.bf16.msra.mxu0 %v2088_v19  ;;  %1719 = vmatpush3.bf16.msra.mxu1 %v2169_v48  ;;  %v1293_v19 = vsel %vm1292_vm8, 1, %v2853_v15 }
 0x670   :  { %1192 = vmatprep.subr.bf16.mxu0 %v2091_v20  ;;  %1720 = vmatprep.subr.bf16.mxu1 %v2852_v63 }
 0x671   :  { %1222 = vmatprep.mubr.bf16.mxu0 %v2853_v15  ;;  %1734 = vmatprep.mubr.msk.bf16.mxu1 %vm1856_vm1, %v2852_v63 }
 0x672   :  { %1295 = vperm.xlu1 %1768, %v1293_v19   ;;  %v1313_v19 = vld [vmem:[%s2832_s6 + $0x70] sm:$0xff] }
 0x673   :  { %1193 = vmatpush1.bf16.msra.mxu0 %v2113_v27  ;;  %1721 = vmatpush3.bf16.msra.mxu1 %v2197_v58  ;;  %v2857_v58 = vld [vmem:[#allocation8_spill] sm:$0xff] }
 0x674   :  { %1194 = vmatprep.subr.bf16.mxu0 %v2124_v31  ;;  %1722 = vmatprep.subr.bf16.mxu1 %v2852_v63 }
 0x677   :  { %1195 = vmatpush1.bf16.msra.mxu0 %v2145_v39  ;;  %1723 = vmatpush3.bf16.msra.mxu1 %v2231_v6 }
 0x678   :  { %1196 = vmatprep.subr.bf16.mxu0 %v2151_v41  ;;  %1724 = vmatprep.subr.bf16.mxu1 %v2852_v63 }
 0x67b   :  { %1197 = vmatpush1.bf16.msra.mxu0 %v2178_v51  ;;  %1725 = vmatpush3.bf16.msra.mxu1 %v2260_v17 }
 0x67c   :  { %1198 = vmatprep.subr.bf16.mxu0 %v2182_v53  ;;  %1726 = vmatprep.subr.bf16.mxu1 %v2852_v63 }
 0x67f   :  { %1199 = vmatpush1.bf16.msra.mxu0 %v2207_v61  ;;  %1727 = vmatpush3.bf16.msra.mxu1 %v2284_v28 }
 0x680   :  { %1200 = vmatprep.subr.bf16.mxu0 %v2216_v0  ;;  %1728 = vmatprep.subr.bf16.mxu1 %v2852_v63 }
 0x683   :  { %1201 = vmatpush1.bf16.msra.mxu0 %v2241_v10  ;;  %1729 = vmatpush3.bf16.msra.mxu1 %v2299_v33  ;;  %v2858_v10 = vld [vmem:[#allocation9_spill] sm:$0xff] }
 0x684   :  { %1202 = vmatprep.subr.bf16.mxu0 %v2245_v12  ;;  %1730 = vmatprep.subr.bf16.mxu1 %v2852_v63 }
 0x687   :  { %1203 = vmatpush1.bf16.msra.mxu0 %v2272_v22  ;;  %1731 = vmatpush3.bf16.msra.mxu1 %v2311_v36 }
 0x688   :  { %1204 = vmatprep.subr.bf16.mxu0 %v2275_v23  ;;  %1732 = vmatprep.subr.bf16.mxu1 %v2852_v63 }
 0x68b   :  { %1205 = vmatpush1.bf16.msra.mxu0 %v2294_v32  ;;  %1733 = vmatpush3.bf16.msra.mxu1 %v2325_v40 }
 0x68c   :  { %1738 = vmatprep.subr.bf16.mxu0 %v2852_v63  ;;  %1758 = vmatprep.subr.bf16.mxu1 %v2852_v63 }
 0x741   :  { %v1110_v20 = vpop.f32.mrb[40].mxu0  ;;  %v1151_v27 = vpop.f32.mrb[32].mxu1 }
 0x742   :  { %v1111_v31 = vadd.f32 %v1110_v20, %v2429_v3  ;;  %v1112_v39 = vpop.f32.mrb[41].mxu0  ;;  %v1716_v41 = vpop.f32.mrb[33].mxu1  ;;  %v1152_v36 = vadd.f32 %v1151_v27, %v2437_v52  ;;  %v1314_v20 = vld [vmem:[%s2832_s6 + $0x78] sm:$0xff] }
 0x743   :  { %v1113_v48 = vadd.f32 %v1112_v39, %v2431_v8  ;;  %v1114_v51 = vpop.f32.mrb[42].mxu0  ;;  %v1154_v53 = vpop.f32.mrb[34].mxu1  ;;  %v1323_v27 = vpack.c.bf16 %v1314_v20, %v1313_v19 }
 0x744   :  { %v1157_v61 = vadd.f32 %v1111_v31, %v2857_v58  ;;  %v1115_v0 = vpop.f32.mrb[43].mxu0  ;;  %v1717_v6 = vpop.f32.mrb[35].mxu1 }
 0x745   :  { %v1164_v12 = vadd.f32 %v1113_v48, %v2858_v10 }
 0x746   :  { %v1451_v17 = vmul.f32 -1.442695, %v1157_v61  ;;  %v2860_v61 = vld [vmem:[#allocation10_spill] sm:$0xff] }
 0x747   :  { %v1452_v22 = vmul.f32 -1.442695, %v1164_v12  ;;  %v2861_v12 = vld [vmem:[#allocation11_spill] sm:$0xff] }
 0x748   :  { %1829 = vpow2.f32 %v1451_v17 }
 0x749   :  { %1831 = vpow2.f32 %v1452_v22 }
 0x752   :  { %v1830_v23 = vpop.eup %1829 }
 0x753   :  { %v1161_v28 = vadd.f32 1.0, %v1830_v23  ;;  %v1832_v32 = vpop.eup %1831 }
 0x754   :  { %v1168_v33 = vadd.f32 1.0, %v1832_v32 }
 0x755   :  { %1833 = vrcp.f32 %v1161_v28 }
 0x756   :  { %1835 = vrcp.f32 %v1168_v33 }
 0x75f   :  { %v1834_v40 = vpop.eup %1833 }
 0x760   :  { %v1171_v15 = vmul.f32 %v1834_v40, %v1152_v36  ;;  %v1836_v34 = vpop.eup %1835  ;;  %v498_v40 = vpop.permute.xlu0 %497 }
 0x761   :  { %v1174_v43 = vsub.f32 1.0, %v1836_v34  ;;  %v1176_v44 = vmul.f32 %v1836_v34, %v2686_v13  ;;  %v726_v34 = vpop.permute.xlu1 %725  ;;  %vm499_vm9 = vcmp.eq.s32.totalorder %v498_v40, 1 }
 0x762   :  { %v1172_v24 = vadd.f32 %v1171_v15, %v2859_v21  ;;  %v2862_v21 = vld [vmem:[#allocation6_spill] sm:$0xff]  ;;  %vm727_vm11 = vcmp.eq.s32.totalorder %v726_v34, 1  ;;  %v500_v11 = vsel %vm499_vm9, %v2441_v29, 0.0 }
 0x764   :  { %1837 = vtanh.f32 %v1172_v24 }
 0x76e   :  { %v1838_v42 = vpop.eup %1837 }
 0x76f   :  { %v1175_v18 = vmul.f32 %v1838_v42, %v1174_v43  ;;  %v612_v43 = vpop.permute.xlu0 %611  ;;  %v840_v42 = vpop.permute.xlu1 %839 }
 0x770   :  { %vm613_vm10 = vcmp.eq.s32.totalorder %v612_v43, 1  ;;  %vm841_vm12 = vcmp.eq.s32.totalorder %v840_v42, 1 }
 0x771   :  { %v2734_v38 = vadd.f32 %v1176_v44, %v1175_v18  ;;  %v614_v26 = vsel %vm613_vm10, %v2489_v50, %v500_v11 }
 0x772   :  { %v728_v62 = vsel %vm727_vm11, %v2537_v60, %v614_v26  ;;  %v1372_v60 = vld [vmem:[%s2833_s8] sm:$0xff] }
 0x773   :  { %v1189_v57 = vpack.c.bf16 %v2734_v38, %v2734_v38  ;;  %v954_v18 = vpop.permute.xlu0 %953 }
 0x774   :  { %vm955_vm13 = vcmp.eq.s32.totalorder %v954_v18, 1 }
 0x775   :  { %1223 = vmatmul.mubr.bf16.vlgmr.msra.gmra.mrb[44].mxu0 %v1189_v57  ;;  %1735 = vmatmul.mubr.bf16.vlgmr.msra.gmra.mrb[36].mxu1 %v1189_v57  ;;  %v1068_v57 = vpop.permute.xlu1 %1067 }
 0x776   :  { %1754 = vmatprep.mubr.msk.bf16.mxu0 %vm1856_vm1, %v2852_v63  ;;  %1760 = vmatprep.mubr.msk.bf16.mxu1 %vm1856_vm1, %v2852_v63  ;;  %vm1069_vm14 = vcmp.eq.s32.totalorder %v1068_v57, 1  ;;  %vm1383_vm1 = vcmask 130048  }
 0x777   :  { %1739 = vmatpush3.bf16.msra.mxu0 %v1316_v4 }
 0x778   :  { %1740 = vmatprep.subr.bf16.mxu0 %v2852_v63 }
 0x77b   :  { %1741 = vmatpush3.bf16.msra.mxu0 %v1317_v45  ;;  %v842_v45 = vsel %vm841_vm12, %v2585_v14, %v728_v62  ;;  %v1373_v14 = vld [vmem:[%s2833_s8 + $0x8] sm:$0xff] }
 0x77c   :  { %1742 = vmatprep.subr.bf16.mxu0 %v2852_v63  ;;  %v956_v25 = vsel %vm955_vm13, %v2638_v54, %v842_v45  ;;  %v1375_v37 = vpack.c.bf16 %v1373_v14, %v1372_v60  ;;  %v1455_v54 = vld [vmem:[%s2834_s7] ss:$0 sm:$0xff] }
 0x77d   :  { %v1070_v29 = vsel %vm1069_vm14, %v2686_v13, %v956_v25 }
 0x77e   :  { %1759 = vmatpush3.bf16.msra.mxu1 %v1375_v37 }
 0x77f   :  { %1743 = vmatpush3.bf16.msra.mxu0 %v1318_v47  ;;  %v1296_v47 = vpop.permute.xlu1 %1295 }
 0x780   :  { %1744 = vmatprep.subr.bf16.mxu0 %v2852_v63  ;;  %vm1297_vm0 = vcmp.eq.s32.totalorder %v1296_v47, 1 }
 0x783   :  { %1745 = vmatpush3.bf16.msra.mxu0 %v1319_v5 }
 0x784   :  { %1746 = vmatprep.subr.bf16.mxu0 %v2852_v63 }
 0x787   :  { %1747 = vmatpush3.bf16.msra.mxu0 %v1320_v16 }
 0x788   :  { %1748 = vmatprep.subr.bf16.mxu0 %v2852_v63 }
 0x78b   :  { %1749 = vmatpush3.bf16.msra.mxu0 %v1321_v46 }
 0x78c   :  { %1750 = vmatprep.subr.bf16.mxu0 %v2852_v63 }
 0x78f   :  { %1751 = vmatpush3.bf16.msra.mxu0 %v1322_v59 }
 0x790   :  { %1752 = vmatprep.subr.bf16.mxu0 %v2852_v63 }
 0x793   :  { %1753 = vmatpush3.bf16.msra.mxu0 %v1323_v27 }
 0x848   :  { %v1224_v31 = vpop.f32.mrb[44].mxu0  ;;  %v1265_v39 = vpop.f32.mrb[36].mxu1 }
 0x849   :  { %v1225_v41 = vadd.f32 %v1224_v31, %v2429_v3  ;;  %v1226_v48 = vpop.f32.mrb[45].mxu0  ;;  %v1736_v51 = vpop.f32.mrb[37].mxu1  ;;  %v1266_v36 = vadd.f32 %v1265_v39, %v2437_v52 }
 0x84a   :  { %v1227_v53 = vadd.f32 %v1226_v48, %v2431_v8  ;;  %v1228_v58 = vpop.f32.mrb[46].mxu0  ;;  %v1268_v63 = vpop.f32.mrb[38].mxu1 }
 0x84b   :  { %v1271_v0 = vadd.f32 %v1225_v41, %v2860_v61  ;;  %v1229_v6 = vpop.f32.mrb[47].mxu0  ;;  %v1737_v10 = vpop.f32.mrb[39].mxu1 }
 0x84c   :  { %v1278_v17 = vadd.f32 %v1227_v53, %v2861_v12  ;;  %v1182_v52 = vpop.permute.xlu0 %1181 }
 0x84d   :  { %v1453_v22 = vmul.f32 -1.442695, %v1271_v0  ;;  %vm1183_vm15 = vcmp.eq.s32.totalorder %v1182_v52, 1 }
 0x84e   :  { %v1454_v23 = vmul.f32 -1.442695, %v1278_v17  ;;  %v1184_v50 = vsel %vm1183_vm15, %v2734_v38, %v1070_v29 }
 0x84f   :  { %1839 = vpow2.f32 %v1453_v22 }
 0x850   :  { %1841 = vpow2.f32 %v1454_v23 }
 0x859   :  { %v1840_v28 = vpop.eup %1839 }
 0x85a   :  { %v1275_v32 = vadd.f32 1.0, %v1840_v28  ;;  %v1842_v3 = vpop.eup %1841 }
 0x85b   :  { %v1282_v33 = vadd.f32 1.0, %v1842_v3 }
 0x85c   :  { %1843 = vrcp.f32 %v1275_v32 }
 0x85d   :  { %1845 = vrcp.f32 %v1282_v33 }
 0x866   :  { %v1844_v8 = vpop.eup %1843 }
 0x867   :  { %v1285_v15 = vmul.f32 %v1844_v8, %v1266_v36  ;;  %v1846_v44 = vpop.eup %1845 }
 0x868   :  { %v1288_v4 = vsub.f32 1.0, %v1846_v44  ;;  %v1290_v2 = vmul.f32 %v1846_v44, %v2734_v38 }
 0x869   :  { %v1286_v24 = vadd.f32 %v1285_v15, %v2862_v21 }
 0x86b   :  { %1847 = vtanh.f32 %v1286_v24 }
 0x875   :  { %v1848_v56 = vpop.eup %1847 }
 0x876   :  { %v1289_v49 = vmul.f32 %v1848_v56, %v1288_v4 }
 0x878   :  { %v1291_v9 = vadd.f32 %v1290_v2, %v1289_v49 }
 0x87a   :  { %v1298_v5 = vsel %vm1297_vm0, %v1291_v9, %v1184_v50 }
 0x87b   :  { %v1315_v30 = vpack.c.bf16 %v1298_v5, %v1298_v5 }
 0x87d   :  { %1755 = vmatmul.mubr.bf16.vlgmr.msra.gmra.mrb[48].mxu0 %v1315_v30 }
 0x950   :  { %v1365_v13 = vpop.f32.mrb[48].mxu0 }
 0x951   :  { %v1366_v38 = vadd.f32 %v1455_v54, %v1365_v13  ;;  %v1756_v16 = vpop.f32.mrb[49].mxu0 }
 0x952   :  { %v1368_v35 = vpop.f32.mrb[50].mxu0 }
 0x953   :  { %v1371_v55 = vmax.f32 %v1366_v38, 0.0  ;;  %v1757_v46 = vpop.f32.mrb[51].mxu0 }
 0x955   :  { %v1374_v7 = vpack.c.bf16 %v1371_v55, %v1371_v55 }
 0x957   :  { %1761 = vmatmul.mubr.msk.bf16.vlgmr.msra.gmra.mrb[40].mxu1 %vm1383_vm1, %v1374_v7 }
 0xa2a   :  { %v1421_v59 = vpop.f32.mrb[40].mxu1 }
 0xa2b   :  { %v1422_v19 = vadd.f32 %v1456_v1, %v1421_v59  ;;  %v1762_v20 = vpop.f32.mrb[41].mxu1 }
 0xa2c   :  { %v1424_v27 = vpop.f32.mrb[42].mxu1 }
 0xa2d   :  { %v1458_v31 = vmul.f32 -1.442695, %v1422_v19  ;;  %v1763_v39 = vpop.f32.mrb[43].mxu1 }
 0xa2f   :  { %1849 = vpow2.f32 %v1458_v31 }
 0xa39   :  { %v1850_v41 = vpop.eup %1849 }
 0xa3a   :  { %v1430_v48 = vadd.f32 1.0, %v1850_v41 }
 0xa3c   :  { %1851 = vrcp.f32 %v1430_v48 }
 0xa46   :  { %v1852_v51 = vpop.eup %1851 }
 0xa47   :  { %1434 = vst.msk [vmem:[%s2836_s10] sm:$0xff] %vm1433_vm2, %v1852_v51 }

// kernel: _lambda_.2
= control target key start
LH: loop header
LB: loop body
LE: loop exit
PB: predicated region body
PF: predicated region fallthrough
CT: control target
= control target key end

     0   :  { %20 = vsyncpa [#allocation3], 0  ;;  %s4799_s18 = smov [#allocation2]   ;;  %s6644_s0 = inlined_call_operand.vmem [shape: f32[30,16,43], index: 0, kind: input, shape index: {}]   ;;  %s6645_s1 = inlined_call_operand.vmem [shape: f32[3,43,64], index: 1, kind: input, shape index: {}]   ;;  %s6646_s2 = inlined_call_operand.vmem [shape: f32[1,64], index: 2, kind: input, shape index: {}]   ;;  %s6647_s3 = inlined_call_operand.vmem [shape: f32[1,64], index: 3, kind: input, shape index: {}]   ;;  %s6648_s4 = inlined_call_operand.vmem [shape: f32[1,64], index: 4, kind: input, shape index: {}]   ;;  %s6649_s5 = inlined_call_operand.vmem [shape: f32[3,64,64], index: 5, kind: input, shape index: {}]   ;;  %s6650_s6 = inlined_call_operand.vmem [shape: f32[1,64], index: 6, kind: input, shape index: {}]   ;;  %s6651_s7 = inlined_call_operand.vmem [shape: f32[1,64], index: 7, kind: input, shape index: {}]   ;;  %s6652_s8 = inlined_call_operand.vmem [shape: f32[1,64], index: 8, kind: input, shape index: {}]   ;;  %s6653_s9 = inlined_call_operand.vmem [shape: f32[3,64,128], index: 9, kind: input, shape index: {}]   ;;  %s6654_s10 = inlined_call_operand.vmem [shape: f32[1,128], index: 10, kind: input, shape index: {}]   ;;  %s6655_s11 = inlined_call_operand.vmem [shape: f32[1,128], index: 11, kind: input, shape index: {}]   ;;  %s6656_s12 = inlined_call_operand.vmem [shape: f32[1,128], index: 12, kind: input, shape index: {}]   ;;  %s6657_s13 = inlined_call_operand.hbm [shape: f32[1152,128], index: 13, kind: input, shape index: {}]   ;;  %s6658_s14 = inlined_call_operand.vmem [shape: f32[1,128], index: 14, kind: input, shape index: {}]   ;;  %s6659_s15 = inlined_call_operand.vmem [shape: f32[16,128], index: 15, kind: output, shape index: {}]  }
   0x1   :  { %s52_s19 = sshll.u32 %s4799_s18, 4  ;;  %s4775_s22 = scalar_lea.hbm %s6657_s13, 18432  ;;  %s53_s19 = int_to_ptr.vmem [resolvable:$true] %s52_s19 }
   0x2   :  { %p4776_p0 = scmp.ne.s32.totalorder %s6657_s13, %s4775_s22  ;;  %p4779_p1 = scmp.lt.u32.totalorder %s4775_s22, %s6657_s13 }
   0x4   :  { %p4781_p2 = pnand %p4779_p1, %p4776_p0 }
   0x6   :  { %4784 = shalt.err (!%p4781_p2)
}
   0x7   :  { %s4785_s27 = scalar_lea.vmem %s53_s19, 18432  ;;  %p4790_p4 = scmp.lt.s32.totalorder %s53_s19, %s53_s19 }
   0x8   :  { %p4786_p3 = scmp.ne.s32.totalorder %s53_s19, %s4785_s27  ;;  %p4791_p5 = scmp.lt.s32.totalorder %s4785_s27, %s4785_s27 }
   0xa   :  { %p4792_p6 = por %p4791_p5, %p4790_p4 }
   0xc   :  { %p4793_p7 = pnand %p4792_p6, %p4786_p3 }
   0xe   :  { %4796 = shalt.err (!%p4793_p7)
}
   0xf   :  { %s4800_s28 = smov 128   ;;  %s4801_s29 = smov 8  }
  0x10   :  { %58 = dma.hbm_to_vmem [thread:$0]  %s6657_s13, 18432, %s53_s19, [#allocation3], %s4800_s28, %s4800_s28, %s4801_s29  }
  0x11   :  { %4797 = dma.done.wait [#allocation3], 18432  }
  0x12   :  { %4798 = vsyncadd [#allocation3], 4294948864  ;;  %vm258_vm0 = vcmask 1044480   ;;  %vm259_vm1 = vcmask 1045504   ;;  %v4802_v0 = vmov 65535   ;;  %v3531_v2 = vld [vmem:[%s6645_s1 + $0x30] sm:$0xff] }
  0x13   :  { %v260_v1 = vsel %vm258_vm0, 4294967295, %v4802_v0  ;;  %v3532_v3 = vld [vmem:[%s6645_s1 + $0x38] sm:$0xff]  ;;  %v3533_v4 = vld [vmem:[%s6645_s1 + $0x40] sm:$0xff]  ;;  %v3534_v6 = vld [vmem:[%s6645_s1 + $0x48] sm:$0xff]  ;;  %vm173_vm2 = vcmask 351232   ;;  %vm1600_vm3 = vcmask 523264  }
  0x14   :  { %v170_v5 = vpack.c.bf16 %v3532_v3, %v3531_v2  ;;  %v3535_v7 = vld [vmem:[%s6645_s1 + $0x50] sm:$0xff]  ;;  %v3536_v8 = vld [vmem:[%s6645_s1 + $0x58] sm:$0x7]  ;;  %v171_v9 = vpack.c.bf16 %v3534_v6, %v3533_v4  ;;  %v4915_v11 = vsel %vm259_vm1, %v260_v1, 0  ;;  %v125_v16 = vld [vmem:[%s6645_s1] sm:$0xff]  ;;  %vm4804_vm4 = vmmov 0  }
  0x15   :  { %v172_v10 = vpack.c.bf16 %v3536_v8, %v3535_v7  ;;  %v67_v12 = vld [vmem:[%s6644_s0 + $0x10] sm:$0xff]  ;;  %v68_v13 = vld [vmem:[%s6644_s0 + $0x18] sm:$0xff]  ;;  %v126_v17 = vld [vmem:[%s6645_s1 + $0x8] sm:$0xff] }
  0x16   :  { %4069 = vmatprep.subr.bf16.mxu0 %v170_v5  ;;  %v4923_v14 = vpack.c.bf16 %v68_v13, %v67_v12  ;;  %4563 = vmatprep.subr.bf16.mxu1 %v170_v5  ;;  %v69_v18 = vld [vmem:[%s6644_s0 + $0x20] sm:$0xff]  ;;  %v70_v19 = vld [vmem:[%s6644_s0 + $0x28] sm:$0xff]  ;;  %v159_v20 = vpack.c.bf16 %v126_v17, %v125_v16  ;;  %v71_v21 = vld [vmem:[%s6644_s0 + $0x30] sm:$0xff] }
  0x17   :  { %4070 = vmatpush3.bf16.msra.mxu0 %v170_v5  ;;  %4566 = vmatpush3.bf16.msra.mxu1 %v170_v5  ;;  %v263_v15 = vand.u32 %v4915_v11, %v172_v10  ;;  %v72_v22 = vld [vmem:[%s6644_s0 + $0x38] sm:$0xff]  ;;  %v127_v23 = vld [vmem:[%s6645_s1 + $0x10] sm:$0xff]  ;;  %v4952_v25 = vpack.c.bf16 %v70_v19, %v69_v18  ;;  %v129_v28 = vld [vmem:[%s6645_s1 + $0x20] sm:$0xff] }
  0x18   :  { %4071 = vmatprep.subr.bf16.mxu0 %v171_v9  ;;  %4075 = vmatprep.mubr.msk.bf16.mxu0 %vm173_vm2, %v4923_v14  ;;  %v128_v24 = vld [vmem:[%s6645_s1 + $0x18] sm:$0xff]  ;;  %v4954_v26 = vpack.c.bf16 %v72_v22, %v71_v21  ;;  %v130_v29 = vld [vmem:[%s6645_s1 + $0x28] sm:$0x7]  ;;  %v73_v30 = vld [vmem:[%s6644_s0 + $0x40] sm:$0xff] }
  0x19   :  { %4564 = vmatprep.subr.bf16.mxu1 %v171_v9  ;;  %v160_v27 = vpack.c.bf16 %v128_v24, %v127_v23  ;;  %v74_v31 = vld [vmem:[%s6644_s0 + $0x48] sm:$0xff]  ;;  %v161_v32 = vpack.c.bf16 %v130_v29, %v129_v28  ;;  %v75_v33 = vld [vmem:[%s6644_s0 + $0x50] sm:$0xff]  ;;  %v76_v34 = vld [vmem:[%s6644_s0 + $0x58] sm:$0xff] }
  0x1a   :  { %v4979_v36 = vpack.c.bf16 %v74_v31, %v73_v30  ;;  %v4981_v37 = vpack.c.bf16 %v76_v34, %v75_v33  ;;  %v3593_v38 = vld [vmem:[%s6645_s1 + $0x60] sm:$0xff]  ;;  %v3594_v39 = vld [vmem:[%s6645_s1 + $0x68] sm:$0xff]  ;;  %v79_v43 = vld [vmem:[%s6644_s0 + $0x70] sm:$0xff] }
  0x1b   :  { %4072 = vmatpush3.bf16.msra.mxu0 %v171_v9  ;;  %4567 = vmatpush3.bf16.msra.mxu1 %v171_v9  ;;  %v526_v35 = vand.u32 %v4915_v11, %v161_v32  ;;  %v4989_v40 = vpack.c.bf16 %v3594_v39, %v3593_v38  ;;  %v77_v41 = vld [vmem:[%s6644_s0 + $0x60] sm:$0xff]  ;;  %v78_v42 = vld [vmem:[%s6644_s0 + $0x68] sm:$0xff]  ;;  %v80_v44 = vld [vmem:[%s6644_s0 + $0x78] sm:$0xff] }
  0x1c   :  { %4073 = vmatprep.subr.bf16.mxu0 %v263_v15  ;;  %4565 = vmatprep.subr.bf16.mxu1 %v263_v15  ;;  %v5008_v45 = vpack.c.bf16 %v78_v42, %v77_v41  ;;  %v5010_v46 = vpack.c.bf16 %v80_v44, %v79_v43  ;;  %v81_v47 = vld [vmem:[%s6644_s0 + $0x80] sm:$0xff]  ;;  %v82_v48 = vld [vmem:[%s6644_s0 + $0x88] sm:$0xff]  ;;  %v83_v49 = vld [vmem:[%s6644_s0 + $0x90] sm:$0xff] }
  0x1d   :  { %v84_v50 = vld [vmem:[%s6644_s0 + $0x98] sm:$0xff]  ;;  %v5028_v51 = vpack.c.bf16 %v82_v48, %v81_v47  ;;  %v85_v53 = vld [vmem:[%s6644_s0 + $0xa0] sm:$0xff]  ;;  %v86_v54 = vld [vmem:[%s6644_s0 + $0xa8] sm:$0xff] }
  0x1e   :  { %v5030_v52 = vpack.c.bf16 %v84_v50, %v83_v49  ;;  %v87_v55 = vld [vmem:[%s6644_s0 + $0xb0] sm:$0xff]  ;;  %v88_v56 = vld [vmem:[%s6644_s0 + $0xb8] sm:$0xff]  ;;  %v5048_v57 = vpack.c.bf16 %v86_v54, %v85_v53  ;;  %v89_v59 = vld [vmem:[%s6644_s0 + $0xc0] sm:$0xff] }
  0x1f   :  { %4074 = vmatpush3.bf16.msra.mxu0 %v263_v15  ;;  %4568 = vmatpush3.bf16.msra.mxu1 %v263_v15  ;;  %v5050_v58 = vpack.c.bf16 %v88_v56, %v87_v55  ;;  %v90_v60 = vld [vmem:[%s6644_s0 + $0xc8] sm:$0xff]  ;;  %v91_v61 = vld [vmem:[%s6644_s0 + $0xd0] sm:$0xff]  ;;  %v92_v62 = vld [vmem:[%s6644_s0 + $0xd8] sm:$0xff] }
  0x20   :  { %4131 = vmatprep.subr.bf16.mxu0 %v159_v20  ;;  %v5068_v63 = vpack.c.bf16 %v90_v60, %v89_v59  ;;  %v5070_v0 = vpack.c.bf16 %v92_v62, %v91_v61  ;;  %v93_v1 = vld [vmem:[%s6644_s0 + $0xe0] sm:$0xff]  ;;  %v94_v2 = vld [vmem:[%s6644_s0 + $0xe8] sm:$0xff]  ;;  %v95_v3 = vld [vmem:[%s6644_s0 + $0xf0] sm:$0xff] }
  0x21   :  { %v96_v4 = vld [vmem:[%s6644_s0 + $0xf8] sm:$0xff]  ;;  %v5088_v5 = vpack.c.bf16 %v94_v2, %v93_v1  ;;  %v97_v7 = vld [vmem:[%s6644_s0 + $0x100] sm:$0xff]  ;;  %v98_v8 = vld [vmem:[%s6644_s0 + $0x108] sm:$0xff] }
  0x22   :  { %4076 = vmatmul.mubr.msk.bf16.vlgmr.msra.gmra.mrb[0].mxu0 %vm173_vm2, %v4952_v25  ;;  %v5090_v6 = vpack.c.bf16 %v96_v4, %v95_v3  ;;  %v99_v9 = vld [vmem:[%s6644_s0 + $0x110] sm:$0xff]  ;;  %v100_v10 = vld [vmem:[%s6644_s0 + $0x118] sm:$0xff]  ;;  %v5108_v12 = vpack.c.bf16 %v98_v8, %v97_v7  ;;  %v101_v15 = vld [vmem:[%s6644_s0 + $0x120] sm:$0xff] }
  0x23   :  { %4132 = vmatpush3.bf16.msra.mxu0 %v159_v20  ;;  %4079 = vmatprep.mubr.msk.bf16.mxu0 %vm173_vm2, %v4954_v26  ;;  %v5110_v13 = vpack.c.bf16 %v100_v10, %v99_v9  ;;  %v102_v16 = vld [vmem:[%s6644_s0 + $0x128] sm:$0xff]  ;;  %v115_v17 = vld [vmem:[%s6644_s0 + $0x190] sm:$0xff]  ;;  %v116_v18 = vld [vmem:[%s6644_s0 + $0x198] sm:$0xff] }
  0x24   :  { %4133 = vmatprep.subr.bf16.mxu0 %v160_v27  ;;  %v103_v19 = vld [vmem:[%s6644_s0 + $0x130] sm:$0xff]  ;;  %v104_v20 = vld [vmem:[%s6644_s0 + $0x138] sm:$0xff]  ;;  %v5134_v21 = vpack.c.bf16 %v116_v18, %v115_v17  ;;  %v5136_v22 = vpack.c.bf16 %v102_v16, %v101_v15  ;;  %v105_v24 = vld [vmem:[%s6644_s0 + $0x140] sm:$0xff] }
  0x25   :  { %v5140_v23 = vpack.c.bf16 %v104_v20, %v103_v19  ;;  %v118_v28 = vld [vmem:[%s6644_s0 + $0x1a8] sm:$0xff]  ;;  %v119_v31 = vld [vmem:[%s6644_s0 + $0x1b0] sm:$0xff]  ;;  %v120_v32 = vld [vmem:[%s6644_s0 + $0x1b8] sm:$0xff] }
  0x26   :  { %4123 = vmatprep.mubr.msk.bf16.mxu1 %vm173_vm2, %v5134_v21  ;;  %v106_v29 = vld [vmem:[%s6644_s0 + $0x148] sm:$0xff]  ;;  %v107_v33 = vld [vmem:[%s6644_s0 + $0x150] sm:$0xff]  ;;  %v108_v34 = vld [vmem:[%s6644_s0 + $0x158] sm:$0xff] }
  0x27   :  { %4134 = vmatpush3.bf16.msra.mxu0 %v160_v27  ;;  %v117_v27 = vld [vmem:[%s6644_s0 + $0x1a0] sm:$0xff]  ;;  %v5176_v38 = vpack.c.bf16 %v106_v29, %v105_v24  ;;  %v5180_v39 = vpack.c.bf16 %v108_v34, %v107_v33  ;;  %v110_v42 = vld [vmem:[%s6644_s0 + $0x168] sm:$0xff]  ;;  %v111_v43 = vld [vmem:[%s6644_s0 + $0x170] sm:$0xff] }
  0x28   :  { %4135 = vmatprep.subr.bf16.mxu0 %v526_v35  ;;  %v5158_v30 = vpack.c.bf16 %v118_v28, %v117_v27  ;;  %v109_v41 = vld [vmem:[%s6644_s0 + $0x160] sm:$0xff]  ;;  %v112_v44 = vld [vmem:[%s6644_s0 + $0x178] sm:$0xff]  ;;  %v114_v50 = vld [vmem:[%s6644_s0 + $0x188] sm:$0xff] }
  0x29   :  { %v5198_v47 = vpack.c.bf16 %v110_v42, %v109_v41  ;;  %v5200_v48 = vpack.c.bf16 %v112_v44, %v111_v43  ;;  %v113_v49 = vld [vmem:[%s6644_s0 + $0x180] sm:$0xff]  ;;  %v66_v54 = vld [vmem:[%s6644_s0 + $0x8] sm:$0xff]  ;;  %v3595_v59 = vld [vmem:[%s6645_s1 + $0x70] sm:$0xff] }
  0x2a   :  { %4080 = vmatmul.mubr.msk.bf16.gmra.mrb[4].mxu0 %vm173_vm2, %v4979_v36  ;;  %4124 = vmatmul.mubr.msk.bf16.vlgmr.msra.gmra.mrb[0].mxu1 %vm173_vm2, %v5158_v30  ;;  %v65_v53 = vld [vmem:[%s6644_s0] sm:$0xff]  ;;  %v5218_v55 = vpack.c.bf16 %v114_v50, %v113_v49  ;;  %v3596_v60 = vld [vmem:[%s6645_s1 + $0x78] sm:$0xff]  ;;  %v3598_v62 = vld [vmem:[%s6645_s1 + $0x88] sm:$0x7] }
  0x2b   :  { %4083 = vmatprep.mubr.msk.bf16.mxu0 %vm173_vm2, %v4981_v37  ;;  %4136 = vmatpush3.bf16.msra.mxu0 %v526_v35  ;;  %v5172_v35 = vpack.c.bf16 %v120_v32, %v119_v31  ;;  %v131_v56 = vpack.c.bf16 %v66_v54, %v65_v53  ;;  %v3597_v61 = vld [vmem:[%s6645_s1 + $0x80] sm:$0xff]  ;;  %v794_v1 = vpack.c.bf16 %v3596_v60, %v3595_v59  ;;  %v3636_v4 = vld [vmem:[%s6649_s5 + $0x70] sm:$0xff]  ;;  %v1553_v8 = vld [vmem:[%s6649_s5 + $0x8] sm:$0xff] }
  0x2c   :  { %4193 = vmatprep.subr.bf16.mxu0 %v4989_v40  ;;  %v795_v2 = vpack.c.bf16 %v3598_v62, %v3597_v61  ;;  %v1552_v7 = vld [vmem:[%s6649_s5] sm:$0xff] }
  0x2d   :  { %4127 = vmatprep.mubr.msk.bf16.mxu1 %vm173_vm2, %v5172_v35  ;;  %v5388_v9 = vpack.c.bf16 %v1553_v8, %v1552_v7  ;;  %v5410_v20 = vld [vmem:[%s6646_s2] ss:$0 sm:$0xff] }
  0x2e   :  { %v800_v3 = vand.u32 %v795_v2, %v4915_v11  ;;  %v121_v11 = vld [vmem:[%s6644_s0 + $0x1c0] sm:$0xff] }
  0x2f   :  { %v5421_v27 = vld [vmem:[%s6648_s4] ss:$0 sm:$0xff] }
  0x32   :  { %4084 = vmatmul.mubr.msk.bf16.gmra.mrb[8].mxu0 %vm173_vm2, %v5008_v45 }
  0x33   :  { %4087 = vmatprep.mubr.msk.bf16.mxu0 %vm173_vm2, %v5010_v46 }
  0x3a   :  { %4088 = vmatmul.mubr.msk.bf16.gmra.mrb[12].mxu0 %vm173_vm2, %v5028_v51 }
  0x3b   :  { %4091 = vmatprep.mubr.msk.bf16.mxu0 %vm173_vm2, %v5030_v52 }
  0x42   :  { %4092 = vmatmul.mubr.msk.bf16.gmra.mrb[16].mxu0 %vm173_vm2, %v5048_v57 }
  0x43   :  { %4095 = vmatprep.mubr.msk.bf16.mxu0 %vm173_vm2, %v5050_v58 }
  0x4a   :  { %4096 = vmatmul.mubr.msk.bf16.gmra.mrb[20].mxu0 %vm173_vm2, %v5068_v63 }
  0x4b   :  { %4099 = vmatprep.mubr.msk.bf16.mxu0 %vm173_vm2, %v5070_v0 }
  0x52   :  { %4100 = vmatmul.mubr.msk.bf16.gmra.mrb[24].mxu0 %vm173_vm2, %v5088_v5 }
  0x53   :  { %4103 = vmatprep.mubr.msk.bf16.mxu0 %vm173_vm2, %v5090_v6 }
  0x5a   :  { %4104 = vmatmul.mubr.msk.bf16.gmra.mrb[28].mxu0 %vm173_vm2, %v5108_v12 }
  0x5b   :  { %4107 = vmatprep.mubr.msk.bf16.mxu0 %vm173_vm2, %v5110_v13 }
  0x62   :  { %4108 = vmatmul.mubr.msk.bf16.gmra.mrb[32].mxu0 %vm173_vm2, %v5136_v22 }
  0x63   :  { %4111 = vmatprep.mubr.msk.bf16.mxu0 %vm173_vm2, %v5140_v23 }
  0x6a   :  { %4112 = vmatmul.mubr.msk.bf16.gmra.mrb[36].mxu0 %vm173_vm2, %v5176_v38 }
  0x6b   :  { %4115 = vmatprep.mubr.msk.bf16.mxu0 %vm173_vm2, %v5180_v39 }
  0x72   :  { %4116 = vmatmul.mubr.msk.bf16.gmra.mrb[40].mxu0 %vm173_vm2, %v5198_v47 }
  0x73   :  { %4119 = vmatprep.mubr.msk.bf16.mxu0 %vm173_vm2, %v5200_v48 }
  0x7a   :  { %4120 = vmatmul.mubr.msk.bf16.gmra.mrb[44].mxu0 %vm173_vm2, %v5218_v55 }
  0x7b   :  { %4137 = vmatprep.mubr.msk.bf16.mxu0 %vm173_vm2, %v131_v56 }
  0x82   :  { %4138 = vmatmul.mubr.msk.bf16.vlgmr.msra.gmra.mrb[0].mxu0 %vm173_vm2, %v4923_v14  ;;  %v122_v14 = vld [vmem:[%s6644_s0 + $0x1c8] sm:$0xff] }
  0x83   :  { %4194 = vmatpush3.bf16.msra.mxu0 %v4989_v40  ;;  %4141 = vmatprep.mubr.msk.bf16.mxu0 %vm173_vm2, %v4952_v25  ;;  %v169_v40 = vpack.c.bf16 %v122_v14, %v121_v11 }
  0x84   :  { %4195 = vmatprep.subr.bf16.mxu0 %v794_v1 }
  0x85   :  { %4128 = vmatmul.mubr.msk.bf16.gmra.mrb[4].mxu1 %vm173_vm2, %v169_v40 }
  0x87   :  { %4196 = vmatpush3.bf16.msra.mxu0 %v794_v1 }
  0x88   :  { %4197 = vmatprep.subr.bf16.mxu0 %v800_v3 }
  0x8a   :  { %4142 = vmatmul.mubr.msk.bf16.gmra.mrb[4].mxu0 %vm173_vm2, %v4954_v26 }
  0x8b   :  { %4145 = vmatprep.mubr.msk.bf16.mxu0 %vm173_vm2, %v4979_v36  ;;  %4198 = vmatpush3.bf16.msra.mxu0 %v800_v3 }
  0x92   :  { %4146 = vmatmul.mubr.msk.bf16.gmra.mrb[8].mxu0 %vm173_vm2, %v4981_v37 }
  0x93   :  { %4149 = vmatprep.mubr.msk.bf16.mxu0 %vm173_vm2, %v5008_v45 }
  0x9a   :  { %4150 = vmatmul.mubr.msk.bf16.gmra.mrb[12].mxu0 %vm173_vm2, %v5010_v46 }
  0x9b   :  { %4153 = vmatprep.mubr.msk.bf16.mxu0 %vm173_vm2, %v5028_v51 }
  0xa2   :  { %4154 = vmatmul.mubr.msk.bf16.gmra.mrb[16].mxu0 %vm173_vm2, %v5030_v52 }
  0xa3   :  { %4157 = vmatprep.mubr.msk.bf16.mxu0 %vm173_vm2, %v5048_v57 }
  0xaa   :  { %4158 = vmatmul.mubr.msk.bf16.gmra.mrb[20].mxu0 %vm173_vm2, %v5050_v58 }
  0xab   :  { %4161 = vmatprep.mubr.msk.bf16.mxu0 %vm173_vm2, %v5068_v63 }
  0xb2   :  { %4162 = vmatmul.mubr.msk.bf16.gmra.mrb[24].mxu0 %vm173_vm2, %v5070_v0 }
  0xb3   :  { %4165 = vmatprep.mubr.msk.bf16.mxu0 %vm173_vm2, %v5088_v5 }
  0xba   :  { %4166 = vmatmul.mubr.msk.bf16.gmra.mrb[28].mxu0 %vm173_vm2, %v5090_v6 }
  0xbb   :  { %4169 = vmatprep.mubr.msk.bf16.mxu0 %vm173_vm2, %v5108_v12 }
  0xc2   :  { %4170 = vmatmul.mubr.msk.bf16.gmra.mrb[32].mxu0 %vm173_vm2, %v5110_v13 }
  0xc3   :  { %4173 = vmatprep.mubr.msk.bf16.mxu0 %vm173_vm2, %v5136_v22 }
  0xca   :  { %4174 = vmatmul.mubr.msk.bf16.gmra.mrb[36].mxu0 %vm173_vm2, %v5140_v23 }
  0xcb   :  { %4177 = vmatprep.mubr.msk.bf16.mxu0 %vm173_vm2, %v5176_v38 }
  0xd2   :  { %4178 = vmatmul.mubr.msk.bf16.gmra.mrb[40].mxu0 %vm173_vm2, %v5180_v39 }
  0xd3   :  { %4181 = vmatprep.mubr.msk.bf16.mxu0 %vm173_vm2, %v5198_v47 }
  0xda   :  { %4182 = vmatmul.mubr.msk.bf16.gmra.mrb[44].mxu0 %vm173_vm2, %v5200_v48 }
  0xdb   :  { %4185 = vmatprep.mubr.msk.bf16.mxu0 %vm173_vm2, %v5218_v55 }
  0xe2   :  { %4186 = vmatmul.mubr.msk.bf16.gmra.mrb[48].mxu0 %vm173_vm2, %v5134_v21 }
  0xe3   :  { %4189 = vmatprep.mubr.msk.bf16.mxu0 %vm173_vm2, %v5158_v30 }
  0xea   :  { %4190 = vmatmul.mubr.msk.bf16.gmra.mrb[52].mxu0 %vm173_vm2, %v5172_v35 }
  0xeb   :  { %4199 = vmatprep.mubr.msk.bf16.mxu0 %vm173_vm2, %v4952_v25  ;;  %v123_v25 = vld [vmem:[%s6644_s0 + $0x1d0] sm:$0xff] }
  0xf2   :  { %4200 = vmatmul.mubr.msk.bf16.vlgmr.msra.gmra.mrb[0].mxu0 %vm173_vm2, %v4954_v26  ;;  %v124_v26 = vld [vmem:[%s6644_s0 + $0x1d8] sm:$0xff] }
  0xf3   :  { %4203 = vmatprep.mubr.msk.bf16.mxu0 %vm173_vm2, %v4979_v36  ;;  %v792_v36 = vpack.c.bf16 %v124_v26, %v123_v25 }
  0xfa   :  { %4204 = vmatmul.mubr.msk.bf16.gmra.mrb[4].mxu0 %vm173_vm2, %v4981_v37  ;;  %v3630_v37 = vld [vmem:[%s6649_s5 + $0x40] sm:$0xff] }
  0xfb   :  { %4207 = vmatprep.mubr.msk.bf16.mxu0 %vm173_vm2, %v5008_v45  ;;  %v3631_v45 = vld [vmem:[%s6649_s5 + $0x48] sm:$0xff] }
  0xfd   :  { %v5391_v10 = vpop.f32.mrb[0].mxu1 }
 0x102   :  { %4208 = vmatmul.mubr.msk.bf16.gmra.mrb[8].mxu0 %vm173_vm2, %v5010_v46  ;;  %v1596_v46 = vpack.c.bf16 %v3631_v45, %v3630_v37 }
 0x103   :  { %4211 = vmatprep.mubr.msk.bf16.mxu0 %vm173_vm2, %v5028_v51  ;;  %v3632_v51 = vld [vmem:[%s6649_s5 + $0x50] sm:$0xff] }
 0x104   :  { %4255 = vmatprep.subr.bf16.mxu1 %v1596_v46 }
 0x105   :  { %4256 = vmatpush3.bf16.msra.mxu1 %v1596_v46 }
 0x10a   :  { %4212 = vmatmul.mubr.msk.bf16.gmra.mrb[12].mxu0 %vm173_vm2, %v5030_v52  ;;  %v3633_v52 = vld [vmem:[%s6649_s5 + $0x58] sm:$0xff] }
 0x10b   :  { %4215 = vmatprep.mubr.msk.bf16.mxu0 %vm173_vm2, %v5048_v57  ;;  %v1597_v57 = vpack.c.bf16 %v3633_v52, %v3632_v51 }
 0x10d   :  { %4257 = vmatprep.subr.bf16.mxu1 %v1597_v57 }
 0x10e   :  { %4258 = vmatpush3.bf16.msra.mxu1 %v1597_v57 }
 0x112   :  { %4216 = vmatmul.mubr.msk.bf16.gmra.mrb[16].mxu0 %vm173_vm2, %v5050_v58  ;;  %v3634_v58 = vld [vmem:[%s6649_s5 + $0x60] sm:$0xff] }
 0x113   :  { %4219 = vmatprep.mubr.msk.bf16.mxu0 %vm173_vm2, %v5068_v63  ;;  %v3635_v63 = vld [vmem:[%s6649_s5 + $0x68] sm:$0xff] }
 0x11a   :  { %4220 = vmatmul.mubr.msk.bf16.gmra.mrb[20].mxu0 %vm173_vm2, %v5070_v0  ;;  %v1598_v0 = vpack.c.bf16 %v3635_v63, %v3634_v58 }
 0x11b   :  { %4223 = vmatprep.mubr.msk.bf16.mxu0 %vm173_vm2, %v5088_v5  ;;  %v3637_v5 = vld [vmem:[%s6649_s5 + $0x78] sm:$0xff] }
 0x11c   :  { %4259 = vmatprep.subr.bf16.mxu1 %v1598_v0 }
 0x11d   :  { %4260 = vmatpush3.bf16.msra.mxu1 %v1598_v0 }
 0x122   :  { %4224 = vmatmul.mubr.msk.bf16.gmra.mrb[24].mxu0 %vm173_vm2, %v5090_v6  ;;  %v1599_v6 = vpack.c.bf16 %v3637_v5, %v3636_v4 }
 0x123   :  { %4227 = vmatprep.mubr.msk.bf16.mxu0 %vm173_vm2, %v5108_v12  ;;  %v5393_v12 = vpop.f32.mrb[1].mxu1 }
 0x124   :  { %4261 = vmatprep.subr.bf16.mxu1 %v1599_v6 }
 0x125   :  { %4262 = vmatpush3.bf16.msra.mxu1 %v1599_v6 }
 0x126   :  { %4307 = vmatprep.subr.bf16.mxu1 %v5388_v9 }
 0x12a   :  { %4228 = vmatmul.mubr.msk.bf16.gmra.mrb[28].mxu0 %vm173_vm2, %v5110_v13  ;;  %v5395_v13 = vpop.f32.mrb[2].mxu1 }
 0x12b   :  { %4231 = vmatprep.mubr.msk.bf16.mxu0 %vm173_vm2, %v5136_v22  ;;  %v5397_v15 = vpop.f32.mrb[3].mxu1  ;;  %v5415_v22 = vld [vmem:[%s6647_s3] ss:$0 sm:$0xff] }
 0x132   :  { %4232 = vmatmul.mubr.msk.bf16.gmra.mrb[32].mxu0 %vm173_vm2, %v5140_v23 }
 0x133   :  { %4235 = vmatprep.mubr.msk.bf16.mxu0 %vm173_vm2, %v5176_v38 }
 0x13a   :  { %4236 = vmatmul.mubr.msk.bf16.gmra.mrb[36].mxu0 %vm173_vm2, %v5180_v39 }
 0x13b   :  { %4239 = vmatprep.mubr.msk.bf16.mxu0 %vm173_vm2, %v5198_v47 }
 0x142   :  { %4240 = vmatmul.mubr.msk.bf16.gmra.mrb[40].mxu0 %vm173_vm2, %v5200_v48 }
 0x143   :  { %4243 = vmatprep.mubr.msk.bf16.mxu0 %vm173_vm2, %v5218_v55 }
 0x14a   :  { %4244 = vmatmul.mubr.msk.bf16.gmra.mrb[44].mxu0 %vm173_vm2, %v5134_v21 }
 0x14b   :  { %4247 = vmatprep.mubr.msk.bf16.mxu0 %vm173_vm2, %v5158_v30 }
 0x152   :  { %4248 = vmatmul.mubr.msk.bf16.gmra.mrb[48].mxu0 %vm173_vm2, %v5172_v35 }
 0x153   :  { %4251 = vmatprep.mubr.msk.bf16.mxu0 %vm173_vm2, %v169_v40 }
 0x158   :  { %v5399_v16 = vpop.f32.mrb[4].mxu1 }
 0x159   :  { %v5401_v17 = vpop.f32.mrb[5].mxu1 }
 0x15a   :  { %4252 = vmatmul.mubr.msk.bf16.gmra.mrb[52].mxu0 %vm173_vm2, %v792_v36  ;;  %v5403_v18 = vpop.f32.mrb[6].mxu1 }
 0x15b   :  { %v5405_v19 = vpop.f32.mrb[7].mxu1 }
 0x1c5   :  { %v4201_v21 = vpop.f32.mrb[0].mxu0 }
 0x1c6   :  { %v1124_v23 = vadd.f32 %v4201_v21, %v5410_v20  ;;  %v836_v24 = vpop.f32.mrb[1].mxu0 }
 0x1c7   :  { %v1122_v28 = vadd.f32 %v5410_v20, %v836_v24  ;;  %v4202_v29 = vpop.f32.mrb[2].mxu0 }
 0x1c8   :  { %v1187_v30 = vmul.f32 %v5415_v22, %v1124_v23  ;;  %v1125_v31 = vadd.f32 %v4202_v29, %v5410_v20  ;;  %v839_v32 = vpop.f32.mrb[3].mxu0 }
 0x1c9   :  { %v1185_v33 = vmul.f32 %v5415_v22, %v1122_v28  ;;  %v1123_v34 = vadd.f32 %v5410_v20, %v839_v32 }
 0x1ca   :  { %v1250_v35 = vadd.f32 %v5421_v27, %v1187_v30  ;;  %v1188_v38 = vmul.f32 %v5415_v22, %v1125_v31  ;;  %v1554_v30 = vld [vmem:[%s6649_s5 + $0x10] sm:$0xff] }
 0x1cb   :  { %v1248_v39 = vadd.f32 %v5421_v27, %v1185_v33  ;;  %v1186_v41 = vmul.f32 %v5415_v22, %v1123_v34  ;;  %v1555_v34 = vld [vmem:[%s6649_s5 + $0x18] sm:$0xff] }
 0x1cc   :  { %v1306_v42 = vmax.f32 %v1250_v35, 0.0  ;;  %v1251_v43 = vadd.f32 %v5421_v27, %v1188_v38  ;;  %v1556_v35 = vld [vmem:[%s6649_s5 + $0x20] sm:$0xff]  ;;  %v1557_v38 = vld [vmem:[%s6649_s5 + $0x28] sm:$0xff] }
 0x1cd   :  { %v1304_v44 = vmax.f32 %v1248_v39, 0.0  ;;  %v1249_v47 = vadd.f32 %v5421_v27, %v1186_v41  ;;  %v4205_v48 = vpop.f32.mrb[4].mxu0 }
 0x1ce   :  { %v1307_v49 = vmax.f32 %v1251_v43, 0.0  ;;  %v1128_v50 = vadd.f32 %v4205_v48, %v5410_v20  ;;  %v852_v53 = vpop.f32.mrb[5].mxu0  ;;  %v1559_v43 = vld [vmem:[%s6649_s5 + $0x38] sm:$0xff] }
 0x1cf   :  { %v1360_v54 = vmax.f32 %v1304_v44, %v1306_v42  ;;  %v1305_v55 = vmax.f32 %v1249_v47, 0.0  ;;  %v1126_v56 = vadd.f32 %v5410_v20, %v852_v53  ;;  %v4206_v59 = vpop.f32.mrb[6].mxu0  ;;  %v3682_v53 = vld [vmem:[%s6649_s5 + $0x80] sm:$0xff] }
 0x1d0   :  { %v1191_v60 = vmul.f32 %v5415_v22, %v1128_v50  ;;  %v1129_v61 = vadd.f32 %v4206_v59, %v5410_v20  ;;  %v855_v62 = vpop.f32.mrb[7].mxu0  ;;  %v5497_v59 = vpack.c.bf16 %v1557_v38, %v1556_v35 }
 0x1d1   :  { %v1361_v1 = vmax.f32 %v1305_v55, %v1307_v49  ;;  %v1189_v2 = vmul.f32 %v5415_v22, %v1126_v56  ;;  %v1127_v3 = vadd.f32 %v5410_v20, %v855_v62  ;;  %v5495_v56 = vpack.c.bf16 %v1555_v34, %v1554_v30 }
 0x1d2   :  { %v1254_v11 = vadd.f32 %v5421_v27, %v1191_v60  ;;  %v1192_v14 = vmul.f32 %v5415_v22, %v1129_v61 }
 0x1d3   :  { %v1252_v40 = vadd.f32 %v5421_v27, %v1189_v2  ;;  %v1190_v25 = vmul.f32 %v5415_v22, %v1127_v3 }
 0x1d4   :  { %v5444_v26 = vmax.f32 %v1254_v11, 0.0  ;;  %v1255_v36 = vadd.f32 %v5421_v27, %v1192_v14 }
 0x1d5   :  { %v1308_v37 = vmax.f32 %v1252_v40, 0.0  ;;  %v1253_v45 = vadd.f32 %v5421_v27, %v1190_v25  ;;  %v4209_v46 = vpop.f32.mrb[8].mxu0 }
 0x1d6   :  { %v5448_v51 = vmax.f32 %v1255_v36, 0.0  ;;  %v1132_v52 = vadd.f32 %v4209_v46, %v5410_v20  ;;  %v868_v57 = vpop.f32.mrb[9].mxu0 }
 0x1d7   :  { %v1362_v58 = vmax.f32 %v1306_v42, %v1308_v37  ;;  %v1364_v63 = vmax.f32 %v1308_v37, %v5444_v26  ;;  %v1408_v0 = vmax.f32 %v1360_v54, %v1308_v37  ;;  %v1309_v4 = vmax.f32 %v1253_v45, 0.0  ;;  %v4210_v5 = vpop.f32.mrb[10].mxu0  ;;  %v1558_v42 = vld [vmem:[%s6649_s5 + $0x30] sm:$0xff]  ;;  %v3683_v54 = vld [vmem:[%s6649_s5 + $0x88] sm:$0xff] }
 0x1d8   :  { %v1195_v6 = vmul.f32 %v5415_v22, %v1132_v52  ;;  %v1130_v7 = vadd.f32 %v5410_v20, %v868_v57  ;;  %v1133_v8 = vadd.f32 %v4210_v5, %v5410_v20  ;;  %v871_v21 = vpop.f32.mrb[11].mxu0  ;;  %v5503_v2 = vpack.c.bf16 %v1559_v43, %v1558_v42 }
 0x1d9   :  { %v1410_v23 = vmax.f32 %v1362_v58, %v5444_v26  ;;  %v1363_v24 = vmax.f32 %v1307_v49, %v1309_v4  ;;  %v1365_v28 = vmax.f32 %v1309_v4, %v5448_v51  ;;  %v1409_v29 = vmax.f32 %v1361_v1, %v1309_v4 }
 0x1da   :  { %v1193_v31 = vmul.f32 %v5415_v22, %v1130_v7  ;;  %v1196_v32 = vmul.f32 %v5415_v22, %v1133_v8  ;;  %v1131_v33 = vadd.f32 %v5410_v20, %v871_v21  ;;  %v1258_v41 = vadd.f32 %v5421_v27, %v1195_v6 }
 0x1db   :  { %v1411_v39 = vmax.f32 %v1363_v24, %v5448_v51  ;;  %v5481_v44 = vmax.f32 %v1408_v0, %v5444_v26  ;;  %v5484_v47 = vmax.f32 %v1409_v29, %v5448_v51  ;;  %v5510_v25 = vpack.c.bf16 %v3683_v54, %v3682_v53 }
 0x1dc   :  { %v1256_v48 = vadd.f32 %v5421_v27, %v1193_v31  ;;  %v1259_v49 = vadd.f32 %v5421_v27, %v1196_v32  ;;  %v1194_v50 = vmul.f32 %v5415_v22, %v1131_v33  ;;  %v5505_v3 = vmax.f32 %v1258_v41, 0.0 }
 0x1dd   :  { %v4213_v55 = vpop.f32.mrb[12].mxu0 }
 0x1de   :  { %v5499_v60 = vmax.f32 %v1256_v48, 0.0  ;;  %v1257_v61 = vadd.f32 %v5421_v27, %v1194_v50  ;;  %v1136_v62 = vadd.f32 %v4213_v55, %v5410_v20  ;;  %v884_v1 = vpop.f32.mrb[13].mxu0  ;;  %v5507_v11 = vmax.f32 %v1259_v49, 0.0 }
 0x1df   :  { %v1134_v14 = vadd.f32 %v5410_v20, %v884_v1  ;;  %v4214_v40 = vpop.f32.mrb[14].mxu0 }
 0x1e0   :  { %v1412_v36 = vmax.f32 %v1364_v63, %v5499_v60  ;;  %v5513_v37 = vmax.f32 %v1257_v61, 0.0  ;;  %v1199_v45 = vmul.f32 %v5415_v22, %v1136_v62  ;;  %v1137_v46 = vadd.f32 %v4214_v40, %v5410_v20  ;;  %v887_v52 = vpop.f32.mrb[15].mxu0 }
 0x1e1   :  { %v1197_v57 = vmul.f32 %v5415_v22, %v1134_v14  ;;  %v1135_v58 = vadd.f32 %v5410_v20, %v887_v52  ;;  %v1458_v0 = vmax.f32 %v1410_v23, %v5499_v60  ;;  %v1366_v4 = vmax.f32 %v5444_v26, %v5499_v60 }
 0x1e2   :  { %v1413_v5 = vmax.f32 %v1365_v28, %v5513_v37  ;;  %v1262_v63 = vadd.f32 %v5421_v27, %v1199_v45  ;;  %v1460_v6 = vmax.f32 %v1412_v36, %v5505_v3  ;;  %v1200_v7 = vmul.f32 %v5415_v22, %v1137_v46 }
 0x1e3   :  { %v1260_v8 = vadd.f32 %v5421_v27, %v1197_v57  ;;  %v1198_v21 = vmul.f32 %v5415_v22, %v1135_v58  ;;  %v1459_v24 = vmax.f32 %v1411_v39, %v5513_v37  ;;  %v1506_v29 = vmax.f32 %v1458_v0, %v5505_v3 }
 0x1e4   :  { %v5530_v23 = vmax.f32 %v1262_v63, 0.0  ;;  %v1263_v26 = vadd.f32 %v5421_v27, %v1200_v7  ;;  %v1461_v28 = vmax.f32 %v1413_v5, %v5507_v11  ;;  %v1367_v30 = vmax.f32 %v5448_v51, %v5513_v37 }
 0x1e5   :  { %v5536_v31 = vmax.f32 %v1260_v8, 0.0  ;;  %v1261_v32 = vadd.f32 %v5421_v27, %v1198_v21  ;;  %v4217_v33 = vpop.f32.mrb[16].mxu0  ;;  %v1507_v34 = vmax.f32 %v1459_v24, %v5507_v11  ;;  %v1414_v35 = vmax.f32 %v1366_v4, %v5505_v3 }
 0x1e6   :  { %v5541_v38 = vmax.f32 %v1263_v26, 0.0  ;;  %v1140_v39 = vadd.f32 %v4217_v33, %v5410_v20  ;;  %v900_v41 = vpop.f32.mrb[17].mxu0  ;;  %v1415_v42 = vmax.f32 %v1367_v30, %v5507_v11  ;;  %v1368_v43 = vmax.f32 %v5499_v60, %v5505_v3 }
 0x1e7   :  { %v1508_v51 = vmax.f32 %v1460_v6, %v5536_v31  ;;  %v5548_v48 = vmax.f32 %v1261_v32, 0.0  ;;  %v1138_v49 = vadd.f32 %v5410_v20, %v900_v41  ;;  %v4218_v50 = vpop.f32.mrb[18].mxu0  ;;  %v5551_v53 = vpack.c.bf16 %v1507_v34, %v1506_v29 }
 0x1e8   :  { %v1203_v54 = vmul.f32 %v5415_v22, %v1140_v39  ;;  %v1141_v55 = vadd.f32 %v4218_v50, %v5410_v20  ;;  %v903_v61 = vpop.f32.mrb[19].mxu0  ;;  %v1462_v62 = vmax.f32 %v1414_v35, %v5536_v31  ;;  %v1369_v1 = vmax.f32 %v5513_v37, %v5507_v11 }
 0x1e9   :  { %v1509_v14 = vmax.f32 %v1461_v28, %v5548_v48  ;;  %v1201_v40 = vmul.f32 %v5415_v22, %v1138_v49  ;;  %4263 = vmatprep.mubr.msk.bf16.mxu1 %vm1600_vm3, %v5551_v53  ;;  %v1139_v36 = vadd.f32 %v5410_v20, %v903_v61  ;;  %v1463_v45 = vmax.f32 %v1415_v42, %v5548_v48 }
 0x1ea   :  { %v1266_v46 = vadd.f32 %v5421_v27, %v1203_v54  ;;  %v1204_v52 = vmul.f32 %v5415_v22, %v1141_v55  ;;  %v1510_v57 = vmax.f32 %v1462_v62, %v5530_v23  ;;  %v1416_v58 = vmax.f32 %v1368_v43, %v5536_v31 }
 0x1eb   :  { %v1264_v0 = vadd.f32 %v5421_v27, %v1201_v40  ;;  %v1202_v4 = vmul.f32 %v5415_v22, %v1139_v36  ;;  %v5570_v5 = vpack.c.bf16 %v1509_v14, %v1508_v51  ;;  %v1511_v63 = vmax.f32 %v1463_v45, %v5541_v38 }
 0x1ec   :  { %v5573_v6 = vmax.f32 %v1266_v46, 0.0  ;;  %v1267_v7 = vadd.f32 %v5421_v27, %v1204_v52  ;;  %v1417_v8 = vmax.f32 %v1369_v1, %v5548_v48  ;;  %v1464_v21 = vmax.f32 %v1416_v58, %v5530_v23 }
 0x1ed   :  { %v5578_v24 = vmax.f32 %v1264_v0, 0.0  ;;  %v1265_v29 = vadd.f32 %v5421_v27, %v1202_v4  ;;  %v4221_v26 = vpop.f32.mrb[20].mxu0  ;;  %4264 = vmatmul.mubr.msk.bf16.vlgmr.msra.gmra.mrb[8].mxu1 %vm1600_vm3, %v5570_v5  ;;  %v5583_v28 = vpack.c.bf16 %v1511_v63, %v1510_v57  ;;  %v1370_v30 = vmax.f32 %v5505_v3, %v5536_v31 }
 0x1ee   :  { %v5587_v32 = vmax.f32 %v1267_v7, 0.0  ;;  %v1144_v33 = vadd.f32 %v4221_v26, %v5410_v20  ;;  %v916_v34 = vpop.f32.mrb[21].mxu0  ;;  %4308 = vmatpush3.bf16.msra.mxu1 %v5388_v9  ;;  %v1465_v35 = vmax.f32 %v1417_v8, %v5541_v38  ;;  %v1371_v39 = vmax.f32 %v5507_v11, %v5548_v48 }
 0x1ef   :  { %v5594_v41 = vmax.f32 %v1265_v29, 0.0  ;;  %v1142_v42 = vadd.f32 %v5410_v20, %v916_v34  ;;  %v4222_v43 = vpop.f32.mrb[22].mxu0  ;;  %4267 = vmatprep.mubr.msk.bf16.mxu1 %vm1600_vm3, %v5583_v28  ;;  %v1512_v3 = vmax.f32 %v1464_v21, %v5578_v24  ;;  %v1418_v51 = vmax.f32 %v1370_v30, %v5530_v23  ;;  %4309 = vmatprep.subr.bf16.mxu1 %v5495_v56 }
 0x1f0   :  { %v1207_v9 = vmul.f32 %v5415_v22, %v1144_v33  ;;  %v1145_v49 = vadd.f32 %v4222_v43, %v5410_v20  ;;  %v919_v50 = vpop.f32.mrb[23].mxu0  ;;  %v1419_v11 = vmax.f32 %v1371_v39, %v5541_v38  ;;  %v1372_v54 = vmax.f32 %v5536_v31, %v5530_v23 }
 0x1f1   :  { %v1205_v55 = vmul.f32 %v5415_v22, %v1142_v42  ;;  %v1143_v61 = vadd.f32 %v5410_v20, %v919_v50  ;;  %v1513_v62 = vmax.f32 %v1465_v35, %v5594_v41  ;;  %v1466_v1 = vmax.f32 %v1418_v51, %v5578_v24 }
 0x1f2   :  { %v1270_v14 = vadd.f32 %v5421_v27, %v1207_v9  ;;  %v1208_v40 = vmul.f32 %v5415_v22, %v1145_v49  ;;  %v1467_v36 = vmax.f32 %v1419_v11, %v5594_v41  ;;  %v1373_v45 = vmax.f32 %v5548_v48, %v5541_v38  ;;  %4310 = vmatpush3.bf16.msra.mxu1 %v5495_v56 }
 0x1f3   :  { %v1268_v31 = vadd.f32 %v5421_v27, %v1205_v55  ;;  %v1206_v46 = vmul.f32 %v5415_v22, %v1143_v61  ;;  %v5619_v52 = vpack.c.bf16 %v1513_v62, %v1512_v3  ;;  %v1514_v57 = vmax.f32 %v1466_v1, %v5573_v6  ;;  %4311 = vmatprep.subr.bf16.mxu1 %v5497_v59 }
 0x1f4   :  { %v5623_v58 = vmax.f32 %v1270_v14, 0.0  ;;  %v1271_v0 = vadd.f32 %v5421_v27, %v1208_v40  ;;  %v1515_v4 = vmax.f32 %v1467_v36, %v5587_v32  ;;  %v1420_v48 = vmax.f32 %v1372_v54, %v5578_v24 }
 0x1f5   :  { %v5628_v63 = vmax.f32 %v1268_v31, 0.0  ;;  %v1269_v56 = vadd.f32 %v5421_v27, %v1206_v46  ;;  %v4225_v7 = vpop.f32.mrb[24].mxu0  ;;  %4268 = vmatmul.mubr.msk.bf16.gmra.mrb[12].mxu1 %vm1600_vm3, %v5619_v52  ;;  %v1421_v8 = vmax.f32 %v1373_v45, %v5594_v41  ;;  %v1374_v21 = vmax.f32 %v5530_v23, %v5578_v24 }
 0x1f6   :  { %v5636_v29 = vmax.f32 %v1271_v0, 0.0  ;;  %v1148_v26 = vadd.f32 %v4225_v7, %v5410_v20  ;;  %v932_v30 = vpop.f32.mrb[25].mxu0  ;;  %v5639_v33 = vpack.c.bf16 %v1515_v4, %v1514_v57  ;;  %v1468_v34 = vmax.f32 %v1420_v48, %v5573_v6  ;;  %4312 = vmatpush3.bf16.msra.mxu1 %v5497_v59 }
 0x1f7   :  { %v5643_v35 = vmax.f32 %v1269_v56, 0.0  ;;  %v1146_v39 = vadd.f32 %v5410_v20, %v932_v30  ;;  %v4226_v42 = vpop.f32.mrb[26].mxu0  ;;  %v1469_v43 = vmax.f32 %v1421_v8, %v5587_v32  ;;  %v1375_v23 = vmax.f32 %v5541_v38, %v5594_v41  ;;  %4313 = vmatprep.subr.bf16.mxu1 %v5503_v2 }
 0x1f8   :  { %v1211_v3 = vmul.f32 %v5415_v22, %v1148_v26  ;;  %v1149_v51 = vadd.f32 %v4226_v42, %v5410_v20  ;;  %4271 = vmatprep.mubr.msk.bf16.mxu1 %vm1600_vm3, %v5639_v33  ;;  %v935_v59 = vpop.f32.mrb[27].mxu0  ;;  %v1516_v9 = vmax.f32 %v1468_v34, %v5628_v63  ;;  %v1422_v49 = vmax.f32 %v1374_v21, %v5573_v6 }
 0x1f9   :  { %v1209_v50 = vmul.f32 %v5415_v22, %v1146_v39  ;;  %v1147_v11 = vadd.f32 %v5410_v20, %v935_v59  ;;  %v1517_v38 = vmax.f32 %v1469_v43, %v5643_v35  ;;  %v1423_v54 = vmax.f32 %v1375_v23, %v5587_v32 }
 0x1fa   :  { %v1274_v55 = vadd.f32 %v5421_v27, %v1211_v3  ;;  %v1212_v61 = vmul.f32 %v5415_v22, %v1149_v51  ;;  %v1470_v62 = vmax.f32 %v1422_v49, %v5628_v63  ;;  %v1376_v1 = vmax.f32 %v5578_v24, %v5573_v6  ;;  %4314 = vmatpush3.bf16.msra.mxu1 %v5503_v2 }
 0x1fb   :  { %v1272_v14 = vadd.f32 %v5421_v27, %v1209_v50  ;;  %v1210_v40 = vmul.f32 %v5415_v22, %v1147_v11  ;;  %v5668_v36 = vpack.c.bf16 %v1517_v38, %v1516_v9  ;;  %v1471_v45 = vmax.f32 %v1423_v54, %v5643_v35  ;;  %4359 = vmatprep.subr.bf16.mxu1 %v5510_v25 }
 0x1fc   :  { %v5672_v31 = vmax.f32 %v1274_v55, 0.0  ;;  %v1518_v46 = vmax.f32 %v1470_v62, %v5623_v58  ;;  %v1377_v57 = vmax.f32 %v5594_v41, %v5587_v32  ;;  %v1424_v48 = vmax.f32 %v1376_v1, %v5628_v63 }
 0x1fd   :  { %v5677_v24 = vmax.f32 %v1272_v14, 0.0  ;;  %v1273_v2 = vadd.f32 %v5421_v27, %v1210_v40  ;;  %v4229_v0 = vpop.f32.mrb[28].mxu0  ;;  %4272 = vmatmul.mubr.msk.bf16.gmra.mrb[16].mxu1 %vm1600_vm3, %v5668_v36  ;;  %v1519_v4 = vmax.f32 %v1471_v45, %v5636_v29  ;;  %v1275_v56 = vadd.f32 %v5421_v27, %v1212_v61 }
 0x1fe   :  { %v1152_v7 = vadd.f32 %v4229_v0, %v5410_v20  ;;  %v948_v8 = vpop.f32.mrb[29].mxu0  ;;  %v1425_v21 = vmax.f32 %v1377_v57, %v5643_v35  ;;  %v1378_v41 = vmax.f32 %v5573_v6, %v5628_v63  ;;  %v1472_v42 = vmax.f32 %v1424_v48, %v5623_v58 }
 0x1ff   :  { %v5689_v26 = vmax.f32 %v1273_v2, 0.0  ;;  %v1150_v30 = vadd.f32 %v5410_v20, %v948_v8  ;;  %v4230_v34 = vpop.f32.mrb[30].mxu0  ;;  %v5692_v39 = vpack.c.bf16 %v1519_v4, %v1518_v46  ;;  %v1379_v59 = vmax.f32 %v5587_v32, %v5643_v35 }
 0x200   :  { %v1215_v43 = vmul.f32 %v5415_v22, %v1152_v7  ;;  %v1153_v23 = vadd.f32 %v4230_v34, %v5410_v20  ;;  %v951_v3 = vpop.f32.mrb[31].mxu0  ;;  %v1473_v51 = vmax.f32 %v1425_v21, %v5636_v29  ;;  %v1520_v49 = vmax.f32 %v1472_v42, %v5677_v24 }
 0x201   :  { %v1213_v6 = vmul.f32 %v5415_v22, %v1150_v30  ;;  %4275 = vmatprep.mubr.msk.bf16.mxu1 %vm1600_vm3, %v5692_v39  ;;  %v1151_v9 = vadd.f32 %v5410_v20, %v951_v3  ;;  %v1426_v50 = vmax.f32 %v1378_v41, %v5623_v58  ;;  %v1427_v55 = vmax.f32 %v1379_v59, %v5636_v29 }
 0x202   :  { %v1278_v11 = vadd.f32 %v5421_v27, %v1215_v43  ;;  %v1216_v38 = vmul.f32 %v5415_v22, %v1153_v23  ;;  %v1521_v54 = vmax.f32 %v1473_v51, %v5689_v26  ;;  %v1380_v1 = vmax.f32 %v5628_v63, %v5623_v58 }
 0x203   :  { %v1276_v32 = vadd.f32 %v5421_v27, %v1213_v6  ;;  %v1214_v61 = vmul.f32 %v5415_v22, %v1151_v9  ;;  %v1474_v62 = vmax.f32 %v1426_v50, %v5677_v24  ;;  %v5715_v14 = vmax.f32 %v1275_v56, 0.0 }
 0x204   :  { %v5717_v40 = vmax.f32 %v1278_v11, 0.0  ;;  %v5719_v45 = vpack.c.bf16 %v1521_v54, %v1520_v49  ;;  %v1475_v46 = vmax.f32 %v1427_v55, %v5689_v26  ;;  %v1279_v57 = vadd.f32 %v5421_v27, %v1216_v38 }
 0x205   :  { %v1277_v2 = vadd.f32 %v5421_v27, %v1214_v61  ;;  %v4233_v0 = vpop.f32.mrb[32].mxu0  ;;  %v1522_v4 = vmax.f32 %v1474_v62, %v5672_v31  ;;  %v1381_v48 = vmax.f32 %v5643_v35, %v5636_v29  ;;  %v5727_v7 = vmax.f32 %v1276_v32, 0.0 }
 0x206   :  { %v1156_v63 = vadd.f32 %v4233_v0, %v5410_v20  ;;  %4276 = vmatmul.mubr.msk.bf16.gmra.mrb[20].mxu1 %vm1600_vm3, %v5719_v45  ;;  %v964_v56 = vpop.f32.mrb[33].mxu0  ;;  %v1523_v8 = vmax.f32 %v1475_v46, %v5715_v14  ;;  %v1428_v21 = vmax.f32 %v1380_v1, %v5677_v24  ;;  %v1382_v35 = vmax.f32 %v5623_v58, %v5677_v24 }
 0x207   :  { %v5734_v41 = vmax.f32 %v1277_v2, 0.0  ;;  %v1154_v30 = vadd.f32 %v5410_v20, %v964_v56  ;;  %v4234_v34 = vpop.f32.mrb[34].mxu0  ;;  %v1429_v42 = vmax.f32 %v1381_v48, %v5689_v26  ;;  %v1383_v50 = vmax.f32 %v5636_v29, %v5689_v26 }
 0x208   :  { %v1219_v43 = vmul.f32 %v5415_v22, %v1156_v63  ;;  %v1157_v23 = vadd.f32 %v4234_v34, %v5410_v20  ;;  %v5742_v3 = vpack.c.bf16 %v1523_v8, %v1522_v4  ;;  %v967_v51 = vpop.f32.mrb[35].mxu0  ;;  %v1476_v59 = vmax.f32 %v1428_v21, %v5672_v31 }
 0x209   :  { %v1217_v6 = vmul.f32 %v5415_v22, %v1154_v30  ;;  %v1155_v9 = vadd.f32 %v5410_v20, %v967_v51  ;;  %v1477_v49 = vmax.f32 %v1429_v42, %v5715_v14  ;;  %v1430_v54 = vmax.f32 %v1382_v35, %v5672_v31 }
 0x20a   :  { %v1282_v58 = vadd.f32 %v5421_v27, %v1219_v43  ;;  %v1220_v11 = vmul.f32 %v5415_v22, %v1157_v23  ;;  %4279 = vmatprep.mubr.msk.bf16.mxu1 %vm1600_vm3, %v5742_v3  ;;  %v1524_v38 = vmax.f32 %v1476_v59, %v5727_v7  ;;  %v1431_v62 = vmax.f32 %v1383_v50, %v5715_v14 }
 0x20b   :  { %v1280_v55 = vadd.f32 %v5421_v27, %v1217_v6  ;;  %v1218_v32 = vmul.f32 %v5415_v22, %v1155_v9  ;;  %v1525_v61 = vmax.f32 %v1477_v49, %v5734_v41  ;;  %v5760_v29 = vmax.f32 %v1279_v57, 0.0 }
 0x20c   :  { %v5762_v1 = vmax.f32 %v1282_v58, 0.0  ;;  %v1478_v46 = vmax.f32 %v1430_v54, %v5727_v7  ;;  %v1384_v2 = vmax.f32 %v5677_v24, %v5672_v31  ;;  %v1283_v0 = vadd.f32 %v5421_v27, %v1220_v11 }
 0x20d   :  { %v1281_v4 = vadd.f32 %v5421_v27, %v1218_v32  ;;  %v4237_v48 = vpop.f32.mrb[36].mxu0  ;;  %v5769_v63 = vpack.c.bf16 %v1525_v61, %v1524_v38  ;;  %v1479_v56 = vmax.f32 %v1431_v62, %v5734_v41  ;;  %v5772_v8 = vmax.f32 %v1280_v55, 0.0 }
 0x20e   :  { %v1160_v57 = vadd.f32 %v4237_v48, %v5410_v20  ;;  %v980_v21 = vpop.f32.mrb[37].mxu0  ;;  %v1526_v30 = vmax.f32 %v1478_v46, %v5717_v40  ;;  %v1385_v34 = vmax.f32 %v5689_v26, %v5715_v14  ;;  %v1432_v23 = vmax.f32 %v1384_v2, %v5727_v7 }
 0x20f   :  { %v5778_v24 = vmax.f32 %v1281_v4, 0.0  ;;  %4280 = vmatmul.mubr.msk.bf16.gmra.mrb[24].mxu1 %vm1600_vm3, %v5769_v63  ;;  %v1158_v42 = vadd.f32 %v5410_v20, %v980_v21  ;;  %v4238_v35 = vpop.f32.mrb[38].mxu0  ;;  %v1527_v43 = vmax.f32 %v1479_v56, %v5760_v29  ;;  %v1386_v26 = vmax.f32 %v5672_v31, %v5727_v7 }
 0x210   :  { %v1223_v51 = vmul.f32 %v5415_v22, %v1160_v57  ;;  %v1161_v59 = vadd.f32 %v4238_v35, %v5410_v20  ;;  %v983_v6 = vpop.f32.mrb[39].mxu0  ;;  %v1433_v9 = vmax.f32 %v1385_v34, %v5734_v41  ;;  %v1480_v11 = vmax.f32 %v1432_v23, %v5717_v40 }
 0x211   :  { %v1221_v49 = vmul.f32 %v5415_v22, %v1158_v42  ;;  %v5791_v50 = vpack.c.bf16 %v1527_v43, %v1526_v30  ;;  %v1159_v58 = vadd.f32 %v5410_v20, %v983_v6  ;;  %v1387_v32 = vmax.f32 %v5715_v14, %v5734_v41 }
 0x212   :  { %v1286_v38 = vadd.f32 %v5421_v27, %v1223_v51  ;;  %v1224_v54 = vmul.f32 %v5415_v22, %v1161_v59  ;;  %v1481_v55 = vmax.f32 %v1433_v9, %v5760_v29  ;;  %v1528_v62 = vmax.f32 %v1480_v11, %v5772_v8 }
 0x213   :  { %v1284_v61 = vadd.f32 %v5421_v27, %v1221_v49  ;;  %4283 = vmatprep.mubr.msk.bf16.mxu1 %vm1600_vm3, %v5791_v50  ;;  %v1222_v31 = vmul.f32 %v5415_v22, %v1159_v58  ;;  %v1434_v46 = vmax.f32 %v1386_v26, %v5717_v40  ;;  %v5806_v2 = vmax.f32 %v1283_v0, 0.0 }
 0x214   :  { %v5808_v4 = vmax.f32 %v1286_v38, 0.0  ;;  %v1529_v48 = vmax.f32 %v1481_v55, %v5778_v24  ;;  %v1435_v56 = vmax.f32 %v1387_v32, %v5760_v29  ;;  %v1287_v14 = vadd.f32 %v5421_v27, %v1224_v54 }
 0x215   :  { %v1285_v57 = vadd.f32 %v5421_v27, %v1222_v31  ;;  %v4241_v21 = vpop.f32.mrb[40].mxu0  ;;  %v1482_v30 = vmax.f32 %v1434_v46, %v5772_v8  ;;  %v1388_v34 = vmax.f32 %v5727_v7, %v5717_v40  ;;  %v5817_v42 = vmax.f32 %v1284_v61, 0.0 }
 0x216   :  { %v1164_v0 = vadd.f32 %v4241_v21, %v5410_v20  ;;  %v5820_v35 = vpack.c.bf16 %v1529_v48, %v1528_v62  ;;  %v996_v43 = vpop.f32.mrb[41].mxu0  ;;  %v1483_v23 = vmax.f32 %v1435_v56, %v5778_v24  ;;  %v1389_v26 = vmax.f32 %v5734_v41, %v5760_v29 }
 0x217   :  { %v5823_v51 = vmax.f32 %v1285_v57, 0.0  ;;  %v1162_v59 = vadd.f32 %v5410_v20, %v996_v43  ;;  %v4242_v6 = vpop.f32.mrb[42].mxu0  ;;  %v1530_v9 = vmax.f32 %v1482_v30, %v5762_v1  ;;  %v1436_v38 = vmax.f32 %v1388_v34, %v5772_v8 }
 0x218   :  { %v1227_v7 = vmul.f32 %v5415_v22, %v1164_v0  ;;  %4284 = vmatmul.mubr.msk.bf16.gmra.mrb[28].mxu1 %vm1600_vm3, %v5820_v35  ;;  %v1165_v49 = vadd.f32 %v4242_v6, %v5410_v20  ;;  %v1531_v58 = vmax.f32 %v1483_v23, %v5806_v2  ;;  %v999_v11 = vpop.f32.mrb[43].mxu0  ;;  %v1437_v32 = vmax.f32 %v1389_v26, %v5778_v24 }
 0x219   :  { %v1225_v54 = vmul.f32 %v5415_v22, %v1162_v59  ;;  %v1163_v55 = vadd.f32 %v5410_v20, %v999_v11  ;;  %v1390_v41 = vmax.f32 %v5717_v40, %v5772_v8  ;;  %v1484_v46 = vmax.f32 %v1436_v38, %v5762_v1 }
 0x21a   :  { %v1290_v61 = vadd.f32 %v5421_v27, %v1227_v7  ;;  %v1228_v31 = vmul.f32 %v5415_v22, %v1165_v49  ;;  %v5842_v62 = vpack.c.bf16 %v1531_v58, %v1530_v9  ;;  %v1485_v57 = vmax.f32 %v1437_v32, %v5806_v2 }
 0x21b   :  { %v1288_v48 = vadd.f32 %v5421_v27, %v1225_v54  ;;  %v1226_v56 = vmul.f32 %v5415_v22, %v1163_v55  ;;  %v1391_v21 = vmax.f32 %v5760_v29, %v5778_v24  ;;  %v5850_v30 = vmax.f32 %v1287_v14, 0.0 }
 0x21c   :  { %v5852_v40 = vmax.f32 %v1290_v61, 0.0  ;;  %4287 = vmatprep.mubr.msk.bf16.mxu1 %vm1600_vm3, %v5842_v62  ;;  %v1532_v34 = vmax.f32 %v1484_v46, %v5817_v42  ;;  %v1438_v0 = vmax.f32 %v1390_v41, %v5762_v1  ;;  %v1291_v43 = vadd.f32 %v5421_v27, %v1228_v31 }
 0x21d   :  { %v1289_v23 = vadd.f32 %v5421_v27, %v1226_v56  ;;  %v4245_v59 = vpop.f32.mrb[44].mxu0  ;;  %v1533_v6 = vmax.f32 %v1485_v57, %v5823_v51  ;;  %v1439_v29 = vmax.f32 %v1391_v21, %v5806_v2  ;;  %v5862_v14 = vmax.f32 %v1288_v48, 0.0 }
 0x21e   :  { %v1168_v9 = vadd.f32 %v4245_v59, %v5410_v20  ;;  %v1012_v26 = vpop.f32.mrb[45].mxu0  ;;  %v1486_v7 = vmax.f32 %v1438_v0, %v5817_v42  ;;  %v1392_v49 = vmax.f32 %v5772_v8, %v5762_v1  ;;  %v1393_v46 = vmax.f32 %v5778_v24, %v5806_v2 }
 0x21f   :  { %v5868_v58 = vmax.f32 %v1289_v23, 0.0  ;;  %v5870_v11 = vpack.c.bf16 %v1533_v6, %v1532_v34  ;;  %v1166_v38 = vadd.f32 %v5410_v20, %v1012_v26  ;;  %v4246_v54 = vpop.f32.mrb[46].mxu0  ;;  %v1487_v55 = vmax.f32 %v1439_v29, %v5823_v51 }
 0x220   :  { %v1231_v32 = vmul.f32 %v5415_v22, %v1168_v9  ;;  %v1169_v41 = vadd.f32 %v4246_v54, %v5410_v20  ;;  %v1534_v61 = vmax.f32 %v1486_v7, %v5808_v4  ;;  %v1015_v31 = vpop.f32.mrb[47].mxu0  ;;  %v1440_v57 = vmax.f32 %v1392_v49, %v5817_v42 }
 0x221   :  { %4288 = vmatmul.mubr.msk.bf16.gmra.mrb[32].mxu1 %vm1600_vm3, %v5870_v11  ;;  %v1229_v8 = vmul.f32 %v5415_v22, %v1166_v38  ;;  %v1535_v48 = vmax.f32 %v1487_v55, %v5850_v30  ;;  %v1167_v56 = vadd.f32 %v5410_v20, %v1015_v31  ;;  %v1441_v0 = vmax.f32 %v1393_v46, %v5823_v51 }
 0x222   :  { %v1294_v21 = vadd.f32 %v5421_v27, %v1231_v32  ;;  %v1232_v34 = vmul.f32 %v5415_v22, %v1169_v41  ;;  %v1394_v24 = vmax.f32 %v5762_v1, %v5817_v42  ;;  %v1488_v29 = vmax.f32 %v1440_v57, %v5808_v4 }
 0x223   :  { %v1292_v23 = vadd.f32 %v5421_v27, %v1229_v8  ;;  %v5891_v59 = vpack.c.bf16 %v1535_v48, %v1534_v61  ;;  %v1230_v6 = vmul.f32 %v5415_v22, %v1167_v56  ;;  %v5895_v9 = vmax.f32 %v1291_v43, 0.0 }
 0x224   :  { %v5897_v26 = vmax.f32 %v1294_v21, 0.0  ;;  %v1489_v7 = vmax.f32 %v1441_v0, %v5850_v30  ;;  %v1395_v49 = vmax.f32 %v5806_v2, %v5823_v51  ;;  %v1295_v38 = vadd.f32 %v5421_v27, %v1232_v34 }
 0x225   :  { %4291 = vmatprep.mubr.msk.bf16.mxu1 %vm1600_vm3, %v5891_v59  ;;  %v1293_v1 = vadd.f32 %v5421_v27, %v1230_v6  ;;  %v4249_v54 = vpop.f32.mrb[48].mxu0  ;;  %v1536_v55 = vmax.f32 %v1488_v29, %v5862_v14  ;;  %v1442_v43 = vmax.f32 %v1394_v24, %v5808_v4  ;;  %v5908_v32 = vmax.f32 %v1292_v23, 0.0 }
 0x226   :  { %v4569_v41 = vadd.f32 %v4249_v54, %v5391_v10  ;;  %v1537_v61 = vmax.f32 %v1489_v7, %v5868_v58  ;;  %v1028_v31 = vpop.f32.mrb[49].mxu0  ;;  %v1443_v2 = vmax.f32 %v1395_v49, %v5850_v30  ;;  %v1396_v57 = vmax.f32 %v5817_v42, %v5808_v4 }
 0x227   :  { %v5913_v46 = vmax.f32 %v1293_v1, 0.0  ;;  %v4570_v8 = vadd.f32 %v1028_v31, %v5393_v12  ;;  %v4250_v48 = vpop.f32.mrb[50].mxu0  ;;  %v1490_v56 = vmax.f32 %v1442_v43, %v5862_v14  ;;  %v1397_v29 = vmax.f32 %v5823_v51, %v5850_v30 }
 0x228   :  { %v1172_v21 = vadd.f32 %v4569_v41, %v5410_v20  ;;  %v5920_v34 = vpack.c.bf16 %v1537_v61, %v1536_v55  ;;  %v4571_v10 = vadd.f32 %v4250_v48, %v5395_v13  ;;  %v1491_v0 = vmax.f32 %v1443_v2, %v5868_v58  ;;  %v1031_v24 = vpop.f32.mrb[51].mxu0 }
 0x229   :  { %v1170_v23 = vadd.f32 %v4570_v8, %v5410_v20  ;;  %v1538_v6 = vmax.f32 %v1490_v56, %v5852_v40  ;;  %v4572_v12 = vadd.f32 %v1031_v24, %v5397_v15  ;;  %v1444_v49 = vmax.f32 %v1396_v57, %v5862_v14 }
 0x22a   :  { %v1235_v42 = vmul.f32 %v5415_v22, %v1172_v21  ;;  %4292 = vmatmul.mubr.msk.bf16.gmra.mrb[36].mxu1 %vm1600_vm3, %v5920_v34  ;;  %v1173_v7 = vadd.f32 %v4571_v10, %v5410_v20  ;;  %v1539_v13 = vmax.f32 %v1491_v0, %v5895_v9  ;;  %v1445_v15 = vmax.f32 %v1397_v29, %v5868_v58 }
 0x22b   :  { %v1233_v1 = vmul.f32 %v5415_v22, %v1170_v23  ;;  %v1171_v54 = vadd.f32 %v4572_v12, %v5410_v20  ;;  %v1404_v51 = vmax.f32 %v5908_v32, %v5897_v26  ;;  %v1492_v61 = vmax.f32 %v1444_v49, %v5852_v40 }
 0x22c   :  { %v1298_v55 = vadd.f32 %v5421_v27, %v1235_v42  ;;  %v1236_v43 = vmul.f32 %v5415_v22, %v1173_v7  ;;  %v5942_v41 = vpack.c.bf16 %v1539_v13, %v1538_v6  ;;  %v1493_v48 = vmax.f32 %v1445_v15, %v5895_v9 }
 0x22d   :  { %v1296_v31 = vadd.f32 %v5421_v27, %v1233_v1  ;;  %v1234_v2 = vmul.f32 %v5415_v22, %v1171_v54  ;;  %v4253_v8 = vpop.f32.mrb[52].mxu0  ;;  %v1398_v56 = vmax.f32 %v5808_v4, %v5862_v14  ;;  %v5950_v57 = vmax.f32 %v1295_v38, 0.0 }
 0x22e   :  { %v5952_v21 = vmax.f32 %v1298_v55, 0.0  ;;  %4295 = vmatprep.mubr.msk.bf16.mxu1 %vm1600_vm3, %v5942_v41  ;;  %v4573_v10 = vadd.f32 %v4253_v8, %v5399_v16  ;;  %v1540_v0 = vmax.f32 %v1492_v61, %v5908_v32  ;;  %v1044_v24 = vpop.f32.mrb[53].mxu0  ;;  %v1541_v12 = vmax.f32 %v1493_v48, %v5913_v46 }
 0x22f   :  { %v5958_v23 = vmax.f32 %v1296_v31, 0.0  ;;  %v1297_v6 = vadd.f32 %v5421_v27, %v1234_v2  ;;  %v4574_v4 = vadd.f32 %v1044_v24, %v5401_v17  ;;  %v4254_v38 = vpop.f32.mrb[54].mxu0  ;;  %v1299_v29 = vadd.f32 %v5421_v27, %v1236_v43 }
 0x230   :  { %v1176_v42 = vadd.f32 %v4573_v10, %v5410_v20  ;;  %v4575_v7 = vadd.f32 %v4254_v38, %v5403_v18  ;;  %v1399_v16 = vmax.f32 %v5850_v30, %v5868_v58  ;;  %v1047_v13 = vpop.f32.mrb[55].mxu0  ;;  %v5970_v1 = vpack.c.bf16 %v1541_v12, %v1540_v0 }
 0x231   :  { %v5968_v49 = vmax.f32 %v1297_v6, 0.0  ;;  %v1174_v54 = vadd.f32 %v4574_v4, %v5410_v20  ;;  %v1406_v17 = vmax.f32 %v5897_v26, %v5958_v23  ;;  %v1452_v55 = vmax.f32 %v1404_v51, %v5958_v23 }
 0x232   :  { %v1239_v15 = vmul.f32 %v5415_v22, %v1176_v42  ;;  %v1177_v43 = vadd.f32 %v4575_v7, %v5410_v20  ;;  %v1446_v18 = vmax.f32 %v1398_v56, %v5852_v40  ;;  %4296 = vmatmul.mubr.msk.bf16.gmra.mrb[40].mxu1 %vm1600_vm3, %v5970_v1  ;;  %v1447_v31 = vmax.f32 %v1399_v16, %v5895_v9 }
 0x233   :  { %v1237_v30 = vmul.f32 %v5415_v22, %v1174_v54  ;;  %v1454_v61 = vmax.f32 %v1406_v17, %v5952_v21  ;;  %v4576_v2 = vadd.f32 %v1047_v13, %v5405_v19  ;;  %v1500_v8 = vmax.f32 %v1452_v55, %v5952_v21 }
 0x234   :  { %v1240_v48 = vmul.f32 %v5415_v22, %v1177_v43  ;;  %v1494_v51 = vmax.f32 %v1446_v18, %v5908_v32  ;;  %v1495_v56 = vmax.f32 %v1447_v31, %v5913_v46  ;;  %v1405_v24 = vmax.f32 %v5913_v46, %v5950_v57 }
 0x235   :  { %v1300_v10 = vadd.f32 %v5421_v27, %v1237_v30  ;;  %v1175_v0 = vadd.f32 %v4576_v2, %v5410_v20  ;;  %v1355_v6 = vmax.f32 %v1299_v29, 0.0  ;;  %v1302_v12 = vadd.f32 %v5421_v27, %v1239_v15 }
 0x236   :  { %v1542_v19 = vmax.f32 %v1494_v51, %v5897_v26  ;;  %v1407_v4 = vmax.f32 %v5950_v57, %v5968_v49  ;;  %v1543_v42 = vmax.f32 %v1495_v56, %v5950_v57  ;;  %v1453_v16 = vmax.f32 %v1405_v24, %v5968_v49 }
 0x237   :  { %v1356_v38 = vmax.f32 %v1300_v10, 0.0  ;;  %v1238_v7 = vmul.f32 %v5415_v22, %v1175_v0  ;;  %v1303_v20 = vadd.f32 %v5421_v27, %v1240_v48  ;;  %v1400_v29 = vmax.f32 %v5862_v14, %v5852_v40 }
 0x238   :  { %v1455_v13 = vmax.f32 %v1407_v4, %v1355_v6  ;;  %v1401_v54 = vmax.f32 %v5868_v58, %v5895_v9  ;;  %v6005_v55 = vpack.c.bf16 %v1543_v42, %v1542_v19  ;;  %v1501_v18 = vmax.f32 %v1453_v16, %v1355_v6  ;;  %v3686_v4 = vld [vmem:[%s6649_s5 + $0xa0] sm:$0xff]  ;;  %v3689_v16 = vld [vmem:[%s6649_s5 + $0xb8] sm:$0xff] }
 0x239   :  { %v1502_v17 = vmax.f32 %v1454_v61, %v1356_v38  ;;  %v1548_v15 = vmax.f32 %v1500_v8, %v1356_v38  ;;  %v1301_v43 = vadd.f32 %v5421_v27, %v1238_v7  ;;  %v1448_v22 = vmax.f32 %v1400_v29, %v5908_v32  ;;  %v3687_v38 = vld [vmem:[%s6649_s5 + $0xa8] sm:$0xff]  ;;  %v3688_v7 = vld [vmem:[%s6649_s5 + $0xb0] sm:$0xff] }
 0x23a   :  { %v1449_v30 = vmax.f32 %v1401_v54, %v5913_v46  ;;  %v1402_v31 = vmax.f32 %v5852_v40, %v5908_v32  ;;  %4299 = vmatprep.mubr.msk.bf16.mxu1 %vm1600_vm3, %v6005_v55  ;;  %v1403_v58 = vmax.f32 %v5895_v9, %v5913_v46  ;;  %v1504_v61 = vmax.f32 %v5481_v44, %v5499_v60  ;;  %v3715_v54 = vld [vmem:[%s6653_s9 + $0x40] sm:$0xff] }
 0x23b   :  { %v1357_v14 = vmax.f32 %v1301_v43, 0.0  ;;  %v1505_v27 = vmax.f32 %v5484_v47, %v5513_v37  ;;  %v1358_v2 = vmax.f32 %v1302_v12, 0.0  ;;  %v1496_v8 = vmax.f32 %v1448_v22, %v5897_v26  ;;  %v3717_v43 = vld [vmem:[%s6653_s9 + $0x50] sm:$0xff]  ;;  %v3719_v22 = vld [vmem:[%s6653_s9 + $0x60] sm:$0xff] }
 0x23c   :  { %v1497_v48 = vmax.f32 %v1449_v30, %v5950_v57  ;;  %v1450_v40 = vmax.f32 %v1402_v31, %v5897_v26  ;;  %v1451_v10 = vmax.f32 %v1403_v58, %v5950_v57  ;;  %v1359_v0 = vmax.f32 %v1303_v20, 0.0  ;;  %v3720_v30 = vld [vmem:[%s6653_s9 + $0x68] sm:$0xff] }
 0x23d   :  { %v1503_v32 = vmax.f32 %v1455_v13, %v1357_v14  ;;  %v1549_v51 = vmax.f32 %v1501_v18, %v1357_v14  ;;  %v1560_v56 = vpack.c.bf16 %v1505_v27, %v1504_v61  ;;  %v1544_v9 = vmax.f32 %v1496_v8, %v5958_v23  ;;  %v2578_v13 = vld [vmem:[%s6653_s9 + $0x8] sm:$0xff]  ;;  %v3718_v18 = vld [vmem:[%s6653_s9 + $0x58] sm:$0xff]  ;;  %v6230_v14 = vld [vmem:[%s6652_s8] ss:$0 sm:$0xff] }
 0x23e   :  { %v1545_v44 = vmax.f32 %v1497_v48, %v5968_v49  ;;  %v1498_v60 = vmax.f32 %v1450_v40, %v5958_v23  ;;  %v1499_v47 = vmax.f32 %v1451_v10, %v5968_v49  ;;  %v6030_v46 = vmax.f32 %v1502_v17, %v1358_v2  ;;  %v3685_v49 = vld [vmem:[%s6649_s5 + $0x98] sm:$0xff]  ;;  %v3716_v17 = vld [vmem:[%s6653_s9 + $0x48] sm:$0xff] }
 0x23f   :  { %v6028_v37 = vpack.c.bf16 %v1549_v51, %v1548_v15  ;;  %v6035_v12 = vmax.f32 %v1503_v32, %v1359_v0  ;;  %v2100_v42 = vpack.c.bf16 %v3687_v38, %v3686_v4  ;;  %v2101_v20 = vpack.c.bf16 %v3689_v16, %v3688_v7 }
 0x240   :  { %v6032_v24 = vpack.c.bf16 %v1545_v44, %v1544_v9  ;;  %v1546_v26 = vmax.f32 %v1498_v60, %v5952_v21  ;;  %v1547_v57 = vmax.f32 %v1499_v47, %v1355_v6  ;;  %v3684_v21 = vld [vmem:[%s6649_s5 + $0x90] sm:$0xff]  ;;  %v2608_v15 = vpack.c.bf16 %v3716_v17, %v3715_v54 }
 0x241   :  { %v2097_v19 = vpack.c.bf16 %v6035_v12, %v6030_v46  ;;  %v2099_v6 = vpack.c.bf16 %v3685_v49, %v3684_v21  ;;  %v2610_v31 = vpack.c.bf16 %v3720_v30, %v3719_v22 }
 0x242   :  { %4300 = vmatmul.mubr.msk.bf16.gmra.mrb[44].mxu1 %vm1600_vm3, %v6032_v24  ;;  %v6041_v23 = vpack.c.bf16 %v1547_v57, %v1546_v26 }
 0x244   :  { %4303 = vmatprep.mubr.msk.bf16.mxu1 %vm1600_vm3, %v6041_v23 }
 0x24a   :  { %4304 = vmatmul.mubr.msk.bf16.gmra.mrb[48].mxu1 %vm1600_vm3, %v6028_v37 }
 0x24b   :  { %4315 = vmatprep.mubr.msk.bf16.mxu1 %vm1600_vm3, %v1560_v56 }
 0x252   :  { %4316 = vmatmul.mubr.msk.bf16.vlgmr.msra.gmra.mrb[8].mxu1 %vm1600_vm3, %v5551_v53  ;;  %v2577_v53 = vld [vmem:[%s6653_s9] sm:$0xff] }
 0x253   :  { %4319 = vmatprep.mubr.msk.bf16.mxu1 %vm1600_vm3, %v5570_v5  ;;  %4360 = vmatpush3.bf16.msra.mxu1 %v5510_v25  ;;  %v4803_v25 = vmov 0.0   ;;  %v2594_v29 = vpack.c.bf16 %v2578_v13, %v2577_v53 }
 0x254   :  { %4361 = vmatprep.subr.bf16.mxu1 %v2099_v6  ;;  %4455 = vmatprep.subr.bf16.mxu0 %v4803_v25 }
 0x255   :  { %4456 = vmatpush3.bf16.msra.mxu0 %v2594_v29  ;;  %4463 = vmatprep.mubr.msk.bf16.mxu0 %vm4804_vm4, %v4803_v25 }
 0x256   :  { %4457 = vmatprep.subr.bf16.mxu0 %v4803_v25 }
 0x257   :  { %4362 = vmatpush3.bf16.msra.mxu1 %v2099_v6 }
 0x258   :  { %4363 = vmatprep.subr.bf16.mxu1 %v2100_v42 }
 0x25a   :  { %4320 = vmatmul.mubr.msk.bf16.gmra.mrb[12].mxu1 %vm1600_vm3, %v5583_v28 }
 0x25b   :  { %4323 = vmatprep.mubr.msk.bf16.mxu1 %vm1600_vm3, %v5619_v52  ;;  %4364 = vmatpush3.bf16.msra.mxu1 %v2100_v42 }
 0x25c   :  { %4365 = vmatprep.subr.bf16.mxu1 %v2101_v20 }
 0x25f   :  { %4366 = vmatpush3.bf16.msra.mxu1 %v2101_v20 }
 0x260   :  { %4411 = vmatprep.subr.bf16.mxu1 %v4803_v25 }
 0x262   :  { %4324 = vmatmul.mubr.msk.bf16.gmra.mrb[16].mxu1 %vm1600_vm3, %v5639_v33 }
 0x263   :  { %4327 = vmatprep.mubr.msk.bf16.mxu1 %vm1600_vm3, %v5668_v36 }
 0x26a   :  { %4328 = vmatmul.mubr.msk.bf16.gmra.mrb[20].mxu1 %vm1600_vm3, %v5692_v39 }
 0x26b   :  { %4331 = vmatprep.mubr.msk.bf16.mxu1 %vm1600_vm3, %v5719_v45 }
 0x272   :  { %4332 = vmatmul.mubr.msk.bf16.gmra.mrb[24].mxu1 %vm1600_vm3, %v5742_v3 }
 0x273   :  { %4335 = vmatprep.mubr.msk.bf16.mxu1 %vm1600_vm3, %v5769_v63 }
 0x27a   :  { %4336 = vmatmul.mubr.msk.bf16.gmra.mrb[28].mxu1 %vm1600_vm3, %v5791_v50 }
 0x27b   :  { %4339 = vmatprep.mubr.msk.bf16.mxu1 %vm1600_vm3, %v5820_v35 }
 0x282   :  { %4340 = vmatmul.mubr.msk.bf16.gmra.mrb[32].mxu1 %vm1600_vm3, %v5842_v62 }
 0x283   :  { %4343 = vmatprep.mubr.msk.bf16.mxu1 %vm1600_vm3, %v5870_v11 }
 0x28a   :  { %4344 = vmatmul.mubr.msk.bf16.gmra.mrb[36].mxu1 %vm1600_vm3, %v5891_v59 }
 0x28b   :  { %4347 = vmatprep.mubr.msk.bf16.mxu1 %vm1600_vm3, %v5920_v34 }
 0x292   :  { %4348 = vmatmul.mubr.msk.bf16.gmra.mrb[40].mxu1 %vm1600_vm3, %v5942_v41 }
 0x293   :  { %4351 = vmatprep.mubr.msk.bf16.mxu1 %vm1600_vm3, %v5970_v1 }
 0x29a   :  { %4352 = vmatmul.mubr.msk.bf16.gmra.mrb[44].mxu1 %vm1600_vm3, %v6005_v55 }
 0x29b   :  { %4355 = vmatprep.mubr.msk.bf16.mxu1 %vm1600_vm3, %v6032_v24 }
 0x2a2   :  { %4356 = vmatmul.mubr.msk.bf16.gmra.mrb[48].mxu1 %vm1600_vm3, %v6041_v23 }
 0x2a3   :  { %4367 = vmatprep.mubr.msk.bf16.mxu1 %vm1600_vm3, %v5570_v5  ;;  %v2609_v5 = vpack.c.bf16 %v3718_v18, %v3717_v43 }
 0x2aa   :  { %4368 = vmatmul.mubr.msk.bf16.vlgmr.msra.gmra.mrb[8].mxu1 %vm1600_vm3, %v5583_v28  ;;  %v3721_v28 = vld [vmem:[%s6653_s9 + $0x70] sm:$0xff] }
 0x2ab   :  { %4371 = vmatprep.mubr.msk.bf16.mxu1 %vm1600_vm3, %v5619_v52  ;;  %4412 = vmatpush3.bf16.msra.mxu1 %v2608_v15  ;;  %v3722_v52 = vld [vmem:[%s6653_s9 + $0x78] sm:$0xff] }
 0x2ac   :  { %4413 = vmatprep.subr.bf16.mxu1 %v4803_v25 }
 0x2af   :  { %4414 = vmatpush3.bf16.msra.mxu1 %v2609_v5 }
 0x2b0   :  { %4415 = vmatprep.subr.bf16.mxu1 %v4803_v25 }
 0x2b2   :  { %4372 = vmatmul.mubr.msk.bf16.gmra.mrb[12].mxu1 %vm1600_vm3, %v5639_v33  ;;  %v2579_v33 = vld [vmem:[%s6653_s9 + $0x10] sm:$0xff] }
 0x2b3   :  { %4375 = vmatprep.mubr.msk.bf16.mxu1 %vm1600_vm3, %v5668_v36  ;;  %4416 = vmatpush3.bf16.msra.mxu1 %v2610_v31  ;;  %v2611_v36 = vpack.c.bf16 %v3722_v52, %v3721_v28  ;;  %v3741_v52 = vld [vmem:[%s6653_s9 + $0x80] sm:$0xff] }
 0x2b4   :  { %4417 = vmatprep.subr.bf16.mxu1 %v4803_v25 }
 0x2b7   :  { %4418 = vmatpush3.bf16.msra.mxu1 %v2611_v36 }
 0x2b8   :  { %4499 = vmatprep.subr.bf16.mxu1 %v4803_v25 }
 0x2ba   :  { %4376 = vmatmul.mubr.msk.bf16.gmra.mrb[16].mxu1 %vm1600_vm3, %v5692_v39  ;;  %v2580_v39 = vld [vmem:[%s6653_s9 + $0x18] sm:$0xff] }
 0x2bb   :  { %4379 = vmatprep.mubr.msk.bf16.mxu1 %vm1600_vm3, %v5719_v45  ;;  %v2595_v45 = vpack.c.bf16 %v2580_v39, %v2579_v33  ;;  %v3742_v33 = vld [vmem:[%s6653_s9 + $0x88] sm:$0xff] }
 0x2bd   :  { %4458 = vmatpush3.bf16.msra.mxu0 %v2595_v45 }
 0x2be   :  { %4459 = vmatprep.subr.bf16.mxu0 %v4803_v25 }
 0x2c2   :  { %4380 = vmatmul.mubr.msk.bf16.gmra.mrb[20].mxu1 %vm1600_vm3, %v5742_v3  ;;  %v2581_v3 = vld [vmem:[%s6653_s9 + $0x20] sm:$0xff] }
 0x2c3   :  { %4383 = vmatprep.mubr.msk.bf16.mxu1 %vm1600_vm3, %v5769_v63  ;;  %v2582_v63 = vld [vmem:[%s6653_s9 + $0x28] sm:$0xff] }
 0x2ca   :  { %4384 = vmatmul.mubr.msk.bf16.gmra.mrb[24].mxu1 %vm1600_vm3, %v5791_v50  ;;  %v2596_v50 = vpack.c.bf16 %v2582_v63, %v2581_v3 }
 0x2cb   :  { %4387 = vmatprep.mubr.msk.bf16.mxu1 %vm1600_vm3, %v5820_v35  ;;  %v2583_v35 = vld [vmem:[%s6653_s9 + $0x30] sm:$0xff] }
 0x2cc   :  { %4460 = vmatpush3.bf16.msra.mxu0 %v2596_v50 }
 0x2cd   :  { %4461 = vmatprep.subr.bf16.mxu0 %v4803_v25 }
 0x2d2   :  { %4388 = vmatmul.mubr.msk.bf16.gmra.mrb[28].mxu1 %vm1600_vm3, %v5842_v62  ;;  %v2584_v62 = vld [vmem:[%s6653_s9 + $0x38] sm:$0xff] }
 0x2d3   :  { %4391 = vmatprep.mubr.msk.bf16.mxu1 %vm1600_vm3, %v5870_v11  ;;  %v2597_v11 = vpack.c.bf16 %v2584_v62, %v2583_v35 }
 0x2d5   :  { %4462 = vmatpush3.bf16.msra.mxu0 %v2597_v11  ;;  %v2862_v11 = vpack.c.bf16 %v3742_v33, %v3741_v52 }
 0x2da   :  { %4392 = vmatmul.mubr.msk.bf16.gmra.mrb[32].mxu1 %vm1600_vm3, %v5891_v59  ;;  %v6219_v59 = vld [vmem:[%s6650_s6] ss:$0 sm:$0xff] }
 0x2db   :  { %4395 = vmatprep.mubr.msk.bf16.mxu1 %vm1600_vm3, %v5920_v34 }
 0x2e2   :  { %4396 = vmatmul.mubr.msk.bf16.gmra.mrb[36].mxu1 %vm1600_vm3, %v5942_v41  ;;  %v6224_v41 = vld [vmem:[%s6651_s7] ss:$0 sm:$0xff] }
 0x2e3   :  { %4399 = vmatprep.mubr.msk.bf16.mxu1 %vm1600_vm3, %v5970_v1 }
 0x2ea   :  { %4400 = vmatmul.mubr.msk.bf16.gmra.mrb[40].mxu1 %vm1600_vm3, %v6005_v55 }
 0x2eb   :  { %4403 = vmatprep.mubr.msk.bf16.mxu1 %vm1600_vm3, %v6032_v24 }
 0x2f2   :  { %4404 = vmatmul.mubr.msk.bf16.gmra.mrb[44].mxu1 %vm1600_vm3, %v6041_v23 }
 0x2f3   :  { %4407 = vmatprep.mubr.msk.bf16.mxu1 %vm1600_vm3, %v6028_v37 }
 0x2fa   :  { %4408 = vmatmul.mubr.msk.bf16.gmra.mrb[48].mxu1 %vm1600_vm3, %v2097_v19 }
 0x2fb   :  { %4419 = vmatprep.mubr.msk.bf16.mxu1 %vm4804_vm4, %v4803_v25 }
 0x37d   :  { %v4369_v34 = vpop.f32.mrb[8].mxu1 }
 0x37e   :  { %v2367_v1 = vadd.f32 %v4369_v34, %v6219_v59  ;;  %v2139_v55 = vpop.f32.mrb[9].mxu1 }
 0x37f   :  { %v2365_v58 = vadd.f32 %v6219_v59, %v2139_v55  ;;  %v4370_v61 = vpop.f32.mrb[10].mxu1 }
 0x380   :  { %v2418_v27 = vmul.f32 %v6224_v41, %v2367_v1  ;;  %v2368_v2 = vadd.f32 %v4370_v61, %v6219_v59  ;;  %v2142_v8 = vpop.f32.mrb[11].mxu1  ;;  %v3744_v61 = vld [vmem:[%s6653_s9 + $0x98] sm:$0xff] }
 0x381   :  { %v2416_v48 = vmul.f32 %v6224_v41, %v2365_v58  ;;  %v2366_v40 = vadd.f32 %v6219_v59, %v2142_v8  ;;  %v3743_v58 = vld [vmem:[%s6653_s9 + $0x90] sm:$0xff] }
 0x382   :  { %v2469_v32 = vadd.f32 %v6230_v14, %v2418_v27  ;;  %v2419_v51 = vmul.f32 %v6224_v41, %v2368_v2 }
 0x383   :  { %v2467_v10 = vadd.f32 %v6230_v14, %v2416_v48  ;;  %v2417_v56 = vmul.f32 %v6224_v41, %v2366_v40 }
 0x384   :  { %v2513_v0 = vmax.f32 %v2469_v32, 0.0  ;;  %v2470_v9 = vadd.f32 %v6230_v14, %v2419_v51 }
 0x385   :  { %v2511_v44 = vmax.f32 %v2467_v10, 0.0  ;;  %v2468_v60 = vadd.f32 %v6230_v14, %v2417_v56  ;;  %v4373_v47 = vpop.f32.mrb[12].mxu1  ;;  %v2863_v56 = vpack.c.bf16 %v3744_v61, %v3743_v58 }
 0x386   :  { %v2514_v37 = vmax.f32 %v2470_v9, 0.0  ;;  %v2371_v46 = vadd.f32 %v4373_v47, %v6219_v59  ;;  %v2155_v24 = vpop.f32.mrb[13].mxu1 }
 0x387   :  { %v2555_v26 = vmax.f32 %v2511_v44, %v2513_v0  ;;  %v2512_v12 = vmax.f32 %v2468_v60, 0.0  ;;  %v2369_v57 = vadd.f32 %v6219_v59, %v2155_v24  ;;  %v4374_v19 = vpop.f32.mrb[14].mxu1  ;;  %v3745_v24 = vld [vmem:[%s6653_s9 + $0xa0] sm:$0xff] }
 0x388   :  { %v2422_v23 = vmul.f32 %v6224_v41, %v2371_v46  ;;  %v2372_v21 = vadd.f32 %v4374_v19, %v6219_v59  ;;  %v2158_v49 = vpop.f32.mrb[15].mxu1 }
 0x389   :  { %v2556_v6 = vmax.f32 %v2512_v12, %v2514_v37  ;;  %v2420_v4 = vmul.f32 %v6224_v41, %v2369_v57  ;;  %v2370_v38 = vadd.f32 %v6219_v59, %v2158_v49 }
 0x38a   :  { %v2473_v42 = vadd.f32 %v6230_v14, %v2422_v23  ;;  %v2423_v7 = vmul.f32 %v6224_v41, %v2372_v21 }
 0x38b   :  { %v2585_v16 = vpack.c.bf16 %v2556_v6, %v2555_v26  ;;  %v2471_v20 = vadd.f32 %v6230_v14, %v2420_v4  ;;  %v2421_v53 = vmul.f32 %v6224_v41, %v2370_v38  ;;  %v3746_v26 = vld [vmem:[%s6653_s9 + $0xa8] sm:$0xff] }
 0x38c   :  { %v2517_v13 = vmax.f32 %v2473_v42, 0.0  ;;  %v2474_v29 = vadd.f32 %v6230_v14, %v2423_v7  ;;  %v2864_v38 = vpack.c.bf16 %v3746_v26, %v3745_v24 }
 0x38d   :  { %v2515_v54 = vmax.f32 %v2471_v20, 0.0  ;;  %v2472_v17 = vadd.f32 %v6230_v14, %v2421_v53  ;;  %v4377_v15 = vpop.f32.mrb[16].mxu1  ;;  %4464 = vmatmul.mubr.msk.bf16.vlgmr.msra.gmra.mrb[56].mxu0 %vm1600_vm3, %v2585_v16  ;;  %v3747_v16 = vld [vmem:[%s6653_s9 + $0xb0] sm:$0xff]  ;;  %v3748_v20 = vld [vmem:[%s6653_s9 + $0xb8] sm:$0xff] }
 0x38e   :  { %v2518_v43 = vmax.f32 %v2474_v29, 0.0  ;;  %v2375_v18 = vadd.f32 %v4377_v15, %v6219_v59  ;;  %v2171_v5 = vpop.f32.mrb[17].mxu1  ;;  %4467 = vmatprep.mubr.msk.bf16.mxu0 %vm4804_vm4, %v4803_v25 }
 0x38f   :  { %v2557_v22 = vmax.f32 %v2515_v54, %v2517_v13  ;;  %v2516_v30 = vmax.f32 %v2472_v17, 0.0  ;;  %v2373_v31 = vadd.f32 %v6219_v59, %v2171_v5  ;;  %v4378_v28 = vpop.f32.mrb[18].mxu1 }
 0x390   :  { %v2426_v36 = vmul.f32 %v6224_v41, %v2375_v18  ;;  %v2376_v39 = vadd.f32 %v4378_v28, %v6219_v59  ;;  %v2174_v45 = vpop.f32.mrb[19].mxu1 }
 0x391   :  { %v2558_v3 = vmax.f32 %v2516_v30, %v2518_v43  ;;  %v2424_v63 = vmul.f32 %v6224_v41, %v2373_v31  ;;  %v2374_v50 = vadd.f32 %v6219_v59, %v2174_v45  ;;  %v2865_v30 = vpack.c.bf16 %v3748_v20, %v3747_v16 }
 0x392   :  { %v2477_v35 = vadd.f32 %v6230_v14, %v2426_v36  ;;  %v2427_v62 = vmul.f32 %v6224_v41, %v2376_v39 }
 0x393   :  { %v2586_v34 = vpack.c.bf16 %v2558_v3, %v2557_v22  ;;  %v2475_v1 = vadd.f32 %v6230_v14, %v2424_v63  ;;  %v2425_v55 = vmul.f32 %v6224_v41, %v2374_v50 }
 0x394   :  { %v2521_v27 = vmax.f32 %v2477_v35, 0.0  ;;  %v2478_v2 = vadd.f32 %v6230_v14, %v2427_v62 }
 0x395   :  { %v2519_v8 = vmax.f32 %v2475_v1, 0.0  ;;  %v2476_v48 = vadd.f32 %v6230_v14, %v2425_v55  ;;  %v4381_v40 = vpop.f32.mrb[20].mxu1  ;;  %4420 = vmatmul.mubr.msk.bf16.vlgmr.msra.gmra.mrb[52].mxu1 %vm1600_vm3, %v2586_v34  ;;  %4468 = vmatmul.mubr.msk.bf16.gmra.mrb[60].mxu0 %vm1600_vm3, %v2586_v34 }
 0x396   :  { %v2522_v32 = vmax.f32 %v2478_v2, 0.0  ;;  %v2379_v51 = vadd.f32 %v4381_v40, %v6219_v59  ;;  %v2187_v10 = vpop.f32.mrb[21].mxu1  ;;  %4500 = vmatpush3.bf16.msra.mxu1 %v2862_v11  ;;  %4423 = vmatprep.mubr.msk.bf16.mxu1 %vm4804_vm4, %v4803_v25 }
 0x397   :  { %v2559_v0 = vmax.f32 %v2519_v8, %v2521_v27  ;;  %v2520_v9 = vmax.f32 %v2476_v48, 0.0  ;;  %v2377_v44 = vadd.f32 %v6219_v59, %v2187_v10  ;;  %v4382_v60 = vpop.f32.mrb[22].mxu1  ;;  %4471 = vmatprep.mubr.msk.bf16.mxu0 %vm4804_vm4, %v4803_v25  ;;  %4501 = vmatprep.subr.bf16.mxu1 %v4803_v25 }
 0x398   :  { %v2430_v47 = vmul.f32 %v6224_v41, %v2379_v51  ;;  %v2380_v37 = vadd.f32 %v4382_v60, %v6219_v59  ;;  %v2190_v46 = vpop.f32.mrb[23].mxu1 }
 0x399   :  { %v2560_v12 = vmax.f32 %v2520_v9, %v2522_v32  ;;  %v2428_v57 = vmul.f32 %v6224_v41, %v2377_v44  ;;  %v2378_v19 = vadd.f32 %v6219_v59, %v2190_v46 }
 0x39a   :  { %v2481_v23 = vadd.f32 %v6230_v14, %v2430_v47  ;;  %v2431_v21 = vmul.f32 %v6224_v41, %v2380_v37  ;;  %4502 = vmatpush3.bf16.msra.mxu1 %v2863_v56 }
 0x39b   :  { %v2479_v49 = vadd.f32 %v6230_v14, %v2428_v57  ;;  %v2429_v6 = vmul.f32 %v6224_v41, %v2378_v19  ;;  %v6305_v4 = vpack.c.bf16 %v2560_v12, %v2559_v0  ;;  %4503 = vmatprep.subr.bf16.mxu1 %v4803_v25 }
 0x39c   :  { %v2525_v42 = vmax.f32 %v2481_v23, 0.0  ;;  %v2482_v7 = vadd.f32 %v6230_v14, %v2431_v21 }
 0x39d   :  { %v2523_v53 = vmax.f32 %v2479_v49, 0.0  ;;  %v2480_v13 = vadd.f32 %v6230_v14, %v2429_v6  ;;  %v4385_v29 = vpop.f32.mrb[24].mxu1  ;;  %4424 = vmatmul.mubr.msk.bf16.gmra.mrb[56].mxu1 %vm1600_vm3, %v6305_v4  ;;  %4472 = vmatmul.mubr.msk.bf16.gmra.mrb[64].mxu0 %vm1600_vm3, %v6305_v4 }
 0x39e   :  { %v2526_v54 = vmax.f32 %v2482_v7, 0.0  ;;  %v2383_v17 = vadd.f32 %v4385_v29, %v6219_v59  ;;  %v2203_v15 = vpop.f32.mrb[25].mxu1  ;;  %4427 = vmatprep.mubr.msk.bf16.mxu1 %vm4804_vm4, %v4803_v25  ;;  %4475 = vmatprep.mubr.msk.bf16.mxu0 %vm4804_vm4, %v4803_v25 }
 0x39f   :  { %v2561_v43 = vmax.f32 %v2523_v53, %v2525_v42  ;;  %v2524_v18 = vmax.f32 %v2480_v13, 0.0  ;;  %v2381_v5 = vadd.f32 %v6219_v59, %v2203_v15  ;;  %v4386_v22 = vpop.f32.mrb[26].mxu1  ;;  %4504 = vmatpush3.bf16.msra.mxu1 %v2864_v38 }
 0x3a0   :  { %v2434_v31 = vmul.f32 %v6224_v41, %v2383_v17  ;;  %v2384_v28 = vadd.f32 %v4386_v22, %v6219_v59  ;;  %v2206_v52 = vpop.f32.mrb[27].mxu1  ;;  %4505 = vmatprep.subr.bf16.mxu1 %v4803_v25 }
 0x3a1   :  { %v2562_v33 = vmax.f32 %v2524_v18, %v2526_v54  ;;  %v2432_v36 = vmul.f32 %v6224_v41, %v2381_v5  ;;  %v2382_v39 = vadd.f32 %v6219_v59, %v2206_v52 }
 0x3a2   :  { %v2485_v45 = vadd.f32 %v6230_v14, %v2434_v31  ;;  %v2435_v3 = vmul.f32 %v6224_v41, %v2384_v28 }
 0x3a3   :  { %v2483_v63 = vadd.f32 %v6230_v14, %v2432_v36  ;;  %v2433_v50 = vmul.f32 %v6224_v41, %v2382_v39  ;;  %v6335_v35 = vpack.c.bf16 %v2562_v33, %v2561_v43  ;;  %4506 = vmatpush3.bf16.msra.mxu1 %v2865_v30 }
 0x3a4   :  { %v2529_v62 = vmax.f32 %v2485_v45, 0.0  ;;  %v2486_v11 = vadd.f32 %v6230_v14, %v2435_v3 }
 0x3a5   :  { %v2527_v34 = vmax.f32 %v2483_v63, 0.0  ;;  %v2484_v1 = vadd.f32 %v6230_v14, %v2433_v50  ;;  %v4389_v55 = vpop.f32.mrb[28].mxu1  ;;  %4428 = vmatmul.mubr.msk.bf16.gmra.mrb[60].mxu1 %vm1600_vm3, %v6335_v35  ;;  %4476 = vmatmul.mubr.msk.bf16.gmra.mrb[68].mxu0 %vm1600_vm3, %v6335_v35 }
 0x3a6   :  { %v2530_v58 = vmax.f32 %v2486_v11, 0.0  ;;  %v2387_v61 = vadd.f32 %v4389_v55, %v6219_v59  ;;  %v2219_v27 = vpop.f32.mrb[29].mxu1  ;;  %4431 = vmatprep.mubr.msk.bf16.mxu1 %vm4804_vm4, %v4803_v25  ;;  %4479 = vmatprep.mubr.msk.bf16.mxu0 %vm4804_vm4, %v4803_v25 }
 0x3a7   :  { %v2563_v2 = vmax.f32 %v2527_v34, %v2529_v62  ;;  %v2528_v8 = vmax.f32 %v2484_v1, 0.0  ;;  %v2385_v48 = vadd.f32 %v6219_v59, %v2219_v27  ;;  %v4390_v40 = vpop.f32.mrb[30].mxu1 }
 0x3a8   :  { %v2438_v32 = vmul.f32 %v6224_v41, %v2387_v61  ;;  %v2388_v51 = vadd.f32 %v4390_v40, %v6219_v59  ;;  %v2222_v10 = vpop.f32.mrb[31].mxu1 }
 0x3a9   :  { %v2564_v56 = vmax.f32 %v2528_v8, %v2530_v58  ;;  %v2436_v0 = vmul.f32 %v6224_v41, %v2385_v48  ;;  %v2386_v9 = vadd.f32 %v6219_v59, %v2222_v10 }
 0x3aa   :  { %v2489_v44 = vadd.f32 %v6230_v14, %v2438_v32  ;;  %v2439_v60 = vmul.f32 %v6224_v41, %v2388_v51 }
 0x3ab   :  { %v2487_v47 = vadd.f32 %v6230_v14, %v2436_v0  ;;  %v2437_v37 = vmul.f32 %v6224_v41, %v2386_v9  ;;  %v6357_v46 = vpack.c.bf16 %v2564_v56, %v2563_v2 }
 0x3ac   :  { %v2533_v24 = vmax.f32 %v2489_v44, 0.0  ;;  %v2490_v26 = vadd.f32 %v6230_v14, %v2439_v60 }
 0x3ad   :  { %v2531_v12 = vmax.f32 %v2487_v47, 0.0  ;;  %v2488_v57 = vadd.f32 %v6230_v14, %v2437_v37  ;;  %v4393_v19 = vpop.f32.mrb[32].mxu1  ;;  %4432 = vmatmul.mubr.msk.bf16.gmra.mrb[64].mxu1 %vm1600_vm3, %v6357_v46  ;;  %4480 = vmatmul.mubr.msk.bf16.gmra.mrb[72].mxu0 %vm1600_vm3, %v6357_v46 }
 0x3ae   :  { %v2534_v23 = vmax.f32 %v2490_v26, 0.0  ;;  %v2391_v21 = vadd.f32 %v4393_v19, %v6219_v59  ;;  %v2235_v49 = vpop.f32.mrb[33].mxu1  ;;  %4435 = vmatprep.mubr.msk.bf16.mxu1 %vm4804_vm4, %v4803_v25  ;;  %4483 = vmatprep.mubr.msk.bf16.mxu0 %vm4804_vm4, %v4803_v25 }
 0x3af   :  { %v2565_v6 = vmax.f32 %v2531_v12, %v2533_v24  ;;  %v2532_v38 = vmax.f32 %v2488_v57, 0.0  ;;  %v2389_v42 = vadd.f32 %v6219_v59, %v2235_v49  ;;  %v4394_v7 = vpop.f32.mrb[34].mxu1 }
 0x3b0   :  { %v2442_v16 = vmul.f32 %v6224_v41, %v2391_v21  ;;  %v2392_v20 = vadd.f32 %v4394_v7, %v6219_v59  ;;  %v2238_v53 = vpop.f32.mrb[35].mxu1 }
 0x3b1   :  { %v2566_v13 = vmax.f32 %v2532_v38, %v2534_v23  ;;  %v2440_v29 = vmul.f32 %v6224_v41, %v2389_v42  ;;  %v2390_v54 = vadd.f32 %v6219_v59, %v2238_v53 }
 0x3b2   :  { %v2493_v17 = vadd.f32 %v6230_v14, %v2442_v16  ;;  %v2443_v15 = vmul.f32 %v6224_v41, %v2392_v20 }
 0x3b3   :  { %v2491_v43 = vadd.f32 %v6230_v14, %v2440_v29  ;;  %v2441_v18 = vmul.f32 %v6224_v41, %v2390_v54  ;;  %v6379_v5 = vpack.c.bf16 %v2566_v13, %v2565_v6 }
 0x3b4   :  { %v2537_v22 = vmax.f32 %v2493_v17, 0.0  ;;  %v2494_v30 = vadd.f32 %v6230_v14, %v2443_v15 }
 0x3b5   :  { %v2535_v31 = vmax.f32 %v2491_v43, 0.0  ;;  %v2492_v28 = vadd.f32 %v6230_v14, %v2441_v18  ;;  %v4397_v52 = vpop.f32.mrb[36].mxu1  ;;  %4436 = vmatmul.mubr.msk.bf16.gmra.mrb[68].mxu1 %vm1600_vm3, %v6379_v5  ;;  %4484 = vmatmul.mubr.msk.bf16.gmra.mrb[76].mxu0 %vm1600_vm3, %v6379_v5 }
 0x3b6   :  { %v2538_v33 = vmax.f32 %v2494_v30, 0.0  ;;  %v2395_v36 = vadd.f32 %v4397_v52, %v6219_v59  ;;  %v2251_v39 = vpop.f32.mrb[37].mxu1  ;;  %4439 = vmatprep.mubr.msk.bf16.mxu1 %vm4804_vm4, %v4803_v25  ;;  %4487 = vmatprep.mubr.msk.bf16.mxu0 %vm4804_vm4, %v4803_v25 }
 0x3b7   :  { %v2567_v45 = vmax.f32 %v2535_v31, %v2537_v22  ;;  %v2536_v3 = vmax.f32 %v2492_v28, 0.0  ;;  %v2393_v63 = vadd.f32 %v6219_v59, %v2251_v39  ;;  %v4398_v50 = vpop.f32.mrb[38].mxu1 }
 0x3b8   :  { %v2446_v62 = vmul.f32 %v6224_v41, %v2395_v36  ;;  %v2396_v11 = vadd.f32 %v4398_v50, %v6219_v59  ;;  %v2254_v34 = vpop.f32.mrb[39].mxu1 }
 0x3b9   :  { %v2568_v1 = vmax.f32 %v2536_v3, %v2538_v33  ;;  %v2444_v55 = vmul.f32 %v6224_v41, %v2393_v63  ;;  %v2394_v58 = vadd.f32 %v6219_v59, %v2254_v34 }
 0x3ba   :  { %v2497_v61 = vadd.f32 %v6230_v14, %v2446_v62  ;;  %v2447_v27 = vmul.f32 %v6224_v41, %v2396_v11 }
 0x3bb   :  { %v2495_v2 = vadd.f32 %v6230_v14, %v2444_v55  ;;  %v2445_v8 = vmul.f32 %v6224_v41, %v2394_v58  ;;  %v6401_v48 = vpack.c.bf16 %v2568_v1, %v2567_v45 }
 0x3bc   :  { %v2541_v40 = vmax.f32 %v2497_v61, 0.0  ;;  %v2498_v32 = vadd.f32 %v6230_v14, %v2447_v27 }
 0x3bd   :  { %v2539_v51 = vmax.f32 %v2495_v2, 0.0  ;;  %v2496_v10 = vadd.f32 %v6230_v14, %v2445_v8  ;;  %v4401_v56 = vpop.f32.mrb[40].mxu1  ;;  %4440 = vmatmul.mubr.msk.bf16.gmra.mrb[72].mxu1 %vm1600_vm3, %v6401_v48  ;;  %4488 = vmatmul.mubr.msk.bf16.gmra.mrb[80].mxu0 %vm1600_vm3, %v6401_v48 }
 0x3be   :  { %v2542_v0 = vmax.f32 %v2498_v32, 0.0  ;;  %v2399_v9 = vadd.f32 %v4401_v56, %v6219_v59  ;;  %v2267_v44 = vpop.f32.mrb[41].mxu1  ;;  %4443 = vmatprep.mubr.msk.bf16.mxu1 %vm4804_vm4, %v4803_v25  ;;  %4491 = vmatprep.mubr.msk.bf16.mxu0 %vm4804_vm4, %v4803_v25 }
 0x3bf   :  { %v2569_v60 = vmax.f32 %v2539_v51, %v2541_v40  ;;  %v2540_v47 = vmax.f32 %v2496_v10, 0.0  ;;  %v2397_v37 = vadd.f32 %v6219_v59, %v2267_v44  ;;  %v4402_v24 = vpop.f32.mrb[42].mxu1 }
 0x3c0   :  { %v2450_v26 = vmul.f32 %v6224_v41, %v2399_v9  ;;  %v2400_v12 = vadd.f32 %v4402_v24, %v6219_v59  ;;  %v2270_v57 = vpop.f32.mrb[43].mxu1 }
 0x3c1   :  { %v2570_v19 = vmax.f32 %v2540_v47, %v2542_v0  ;;  %v2448_v23 = vmul.f32 %v6224_v41, %v2397_v37  ;;  %v2398_v21 = vadd.f32 %v6219_v59, %v2270_v57 }
 0x3c2   :  { %v2501_v49 = vadd.f32 %v6230_v14, %v2450_v26  ;;  %v2451_v6 = vmul.f32 %v6224_v41, %v2400_v12 }
 0x3c3   :  { %v2499_v38 = vadd.f32 %v6230_v14, %v2448_v23  ;;  %v2449_v42 = vmul.f32 %v6224_v41, %v2398_v21  ;;  %v6423_v7 = vpack.c.bf16 %v2570_v19, %v2569_v60 }
 0x3c4   :  { %v2545_v16 = vmax.f32 %v2501_v49, 0.0  ;;  %v2502_v20 = vadd.f32 %v6230_v14, %v2451_v6 }
 0x3c5   :  { %v2543_v53 = vmax.f32 %v2499_v38, 0.0  ;;  %v2500_v13 = vadd.f32 %v6230_v14, %v2449_v42  ;;  %v4405_v29 = vpop.f32.mrb[44].mxu1  ;;  %4444 = vmatmul.mubr.msk.bf16.gmra.mrb[76].mxu1 %vm1600_vm3, %v6423_v7  ;;  %4492 = vmatmul.mubr.msk.bf16.gmra.mrb[84].mxu0 %vm1600_vm3, %v6423_v7 }
 0x3c6   :  { %v2546_v54 = vmax.f32 %v2502_v20, 0.0  ;;  %v2403_v17 = vadd.f32 %v4405_v29, %v6219_v59  ;;  %v2283_v15 = vpop.f32.mrb[45].mxu1  ;;  %4447 = vmatprep.mubr.msk.bf16.mxu1 %vm4804_vm4, %v4803_v25  ;;  %4495 = vmatprep.mubr.msk.bf16.mxu0 %vm4804_vm4, %v4803_v25  ;;  %v3104_v20 = vld [vmem:[#allocation2 + $0x98] sm:$0xff] }
 0x3c7   :  { %v2571_v43 = vmax.f32 %v2543_v53, %v2545_v16  ;;  %v2544_v18 = vmax.f32 %v2500_v13, 0.0  ;;  %v2401_v22 = vadd.f32 %v6219_v59, %v2283_v15  ;;  %v4406_v30 = vpop.f32.mrb[46].mxu1  ;;  %v3087_v53 = vld [vmem:[#allocation2 + $0x10] sm:$0xff]  ;;  %v3088_v13 = vld [vmem:[#allocation2 + $0x18] sm:$0xff] }
 0x3c8   :  { %v2454_v31 = vmul.f32 %v6224_v41, %v2403_v17  ;;  %v2404_v28 = vadd.f32 %v4406_v30, %v6219_v59  ;;  %v2286_v52 = vpop.f32.mrb[47].mxu1  ;;  %v3239_v29 = vpack.c.bf16 %v3088_v13, %v3087_v53  ;;  %v3089_v17 = vld [vmem:[#allocation2 + $0x20] sm:$0xff]  ;;  %v3108_v30 = vld [vmem:[#allocation2 + $0xb8] sm:$0xff]  ;;  %v3099_v53 = vld [vmem:[#allocation2 + $0x70] sm:$0xff] }
 0x3c9   :  { %v2572_v33 = vmax.f32 %v2544_v18, %v2546_v54  ;;  %v2452_v36 = vmul.f32 %v6224_v41, %v2401_v22  ;;  %v2402_v39 = vadd.f32 %v6219_v59, %v2286_v52  ;;  %v3105_v54 = vld [vmem:[#allocation2 + $0xa0] sm:$0xff]  ;;  %v3107_v22 = vld [vmem:[#allocation2 + $0xb0] sm:$0xff]  ;;  %v3134_v52 = vld [vmem:[#allocation2 + $0x188] sm:$0xff] }
 0x3ca   :  { %v2505_v45 = vadd.f32 %v6230_v14, %v2454_v31  ;;  %v2455_v3 = vmul.f32 %v6224_v41, %v2404_v28  ;;  %v3133_v31 = vld [vmem:[#allocation2 + $0x180] sm:$0xff]  ;;  %v3249_v28 = vpack.c.bf16 %v3108_v30, %v3107_v22  ;;  %v3100_v13 = vld [vmem:[#allocation2 + $0x78] sm:$0xff] }
 0x3cb   :  { %v2503_v63 = vadd.f32 %v6230_v14, %v2452_v36  ;;  %v2453_v50 = vmul.f32 %v6224_v41, %v2402_v39  ;;  %v6445_v62 = vpack.c.bf16 %v2572_v33, %v2571_v43  ;;  %v3090_v43 = vld [vmem:[#allocation2 + $0x28] sm:$0xff]  ;;  %v3091_v33 = vld [vmem:[#allocation2 + $0x30] sm:$0xff]  ;;  %v3092_v36 = vld [vmem:[#allocation2 + $0x38] sm:$0xff]  ;;  %v3262_v39 = vpack.c.bf16 %v3134_v52, %v3133_v31 }
 0x3cc   :  { %v2549_v11 = vmax.f32 %v2505_v45, 0.0  ;;  %v2506_v34 = vadd.f32 %v6230_v14, %v2455_v3  ;;  %v3240_v18 = vpack.c.bf16 %v3090_v43, %v3089_v17  ;;  %v3241_v45 = vpack.c.bf16 %v3092_v36, %v3091_v33  ;;  %v3117_v3 = vld [vmem:[#allocation2 + $0x100] sm:$0xff]  ;;  %v3166_v43 = vld [vmem:[#allocation2 + $0x288] sm:$0xff]  ;;  %v3144_v30 = vld [vmem:[#allocation2 + $0x1d8] sm:$0xff] }
 0x3cd   :  { %v2547_v1 = vmax.f32 %v2503_v63, 0.0  ;;  %v2504_v55 = vadd.f32 %v6230_v14, %v2453_v50  ;;  %v4409_v58 = vpop.f32.mrb[48].mxu1  ;;  %4448 = vmatmul.mubr.msk.bf16.gmra.mrb[80].mxu1 %vm1600_vm3, %v6445_v62  ;;  %4496 = vmatmul.mubr.msk.bf16.gmra.mrb[88].mxu0 %vm1600_vm3, %v6445_v62  ;;  %v3118_v63 = vld [vmem:[#allocation2 + $0x108] sm:$0xff]  ;;  %v3128_v52 = vld [vmem:[#allocation2 + $0x158] sm:$0xff]  ;;  %v3145_v36 = vld [vmem:[#allocation2 + $0x1e0] sm:$0xff] }
 0x3ce   :  { %v2550_v61 = vmax.f32 %v2506_v34, 0.0  ;;  %v2407_v27 = vadd.f32 %v4409_v58, %v6219_v59  ;;  %v2299_v2 = vpop.f32.mrb[49].mxu1  ;;  %4451 = vmatprep.mubr.msk.bf16.mxu1 %vm4804_vm4, %v4803_v25  ;;  %v3254_v50 = vpack.c.bf16 %v3118_v63, %v3117_v3  ;;  %3994 = vmatprep.subr.bf16.mxu1 %v3262_v39  ;;  %v3135_v34 = vld [vmem:[#allocation2 + $0x190] sm:$0xff]  ;;  %v3093_v58 = vld [vmem:[#allocation2 + $0x40] sm:$0xff]  ;;  %v3146_v39 = vld [vmem:[#allocation2 + $0x1e8] sm:$0xff] }
 0x3cf   :  { %v2573_v8 = vmax.f32 %v2547_v1, %v2549_v11  ;;  %v2548_v40 = vmax.f32 %v2504_v55, 0.0  ;;  %v2405_v32 = vadd.f32 %v6219_v59, %v2299_v2  ;;  %v4410_v51 = vpop.f32.mrb[50].mxu1  ;;  %v3110_v11 = vld [vmem:[#allocation2 + $0xc8] sm:$0xff]  ;;  %v3136_v55 = vld [vmem:[#allocation2 + $0x198] sm:$0xff]  ;;  %v3129_v3 = vld [vmem:[#allocation2 + $0x160] sm:$0xff] }
 0x3d0   :  { %v2458_v10 = vmul.f32 %v6224_v41, %v2407_v27  ;;  %v2408_v56 = vadd.f32 %v4410_v51, %v6219_v59  ;;  %v2302_v0 = vpop.f32.mrb[51].mxu1  ;;  %v3263_v27 = vpack.c.bf16 %v3136_v55, %v3135_v34  ;;  %v3111_v51 = vld [vmem:[#allocation2 + $0xd0] sm:$0xff]  ;;  %v3130_v63 = vld [vmem:[#allocation2 + $0x168] sm:$0xff]  ;;  %v3132_v55 = vld [vmem:[#allocation2 + $0x178] sm:$0xff] }
 0x3d1   :  { %v2574_v9 = vmax.f32 %v2548_v40, %v2550_v61  ;;  %v2456_v44 = vmul.f32 %v6224_v41, %v2405_v32  ;;  %v2406_v60 = vadd.f32 %v6219_v59, %v2302_v0  ;;  %v3094_v61 = vld [vmem:[#allocation2 + $0x48] sm:$0xff]  ;;  %v3120_v40 = vld [vmem:[#allocation2 + $0x118] sm:$0xff] }
 0x3d2   :  { %v2509_v47 = vadd.f32 %v6230_v14, %v2458_v10  ;;  %v2459_v37 = vmul.f32 %v6224_v41, %v2408_v56  ;;  %v3242_v2 = vpack.c.bf16 %v3094_v61, %v3093_v58  ;;  %v3112_v10 = vld [vmem:[#allocation2 + $0xd8] sm:$0xff]  ;;  %v3137_v56 = vld [vmem:[#allocation2 + $0x1a0] sm:$0xff] }
 0x3d3   :  { %v2507_v24 = vadd.f32 %v6230_v14, %v2456_v44  ;;  %v2457_v26 = vmul.f32 %v6224_v41, %v2406_v60  ;;  %v2607_v12 = vpack.c.bf16 %v2574_v9, %v2573_v8  ;;  %v3101_v41 = vld [vmem:[#allocation2 + $0x80] sm:$0xff]  ;;  %v3119_v8 = vld [vmem:[#allocation2 + $0x110] sm:$0xff]  ;;  %v3251_v0 = vpack.c.bf16 %v3112_v10, %v3111_v51  ;;  %v3138_v9 = vld [vmem:[#allocation2 + $0x1a8] sm:$0xff] }
 0x3d4   :  { %v2553_v57 = vmax.f32 %v2509_v47, 0.0  ;;  %v2510_v19 = vadd.f32 %v6230_v14, %v2459_v37  ;;  %v3255_v32 = vpack.c.bf16 %v3120_v40, %v3119_v8  ;;  %v3095_v44 = vld [vmem:[#allocation2 + $0x50] sm:$0xff]  ;;  %v3096_v60 = vld [vmem:[#allocation2 + $0x58] sm:$0xff]  ;;  %v3264_v47 = vpack.c.bf16 %v3138_v9, %v3137_v56  ;;  %v3197_v61 = vld [vmem:[#allocation2 + $0x380] sm:$0xff] }
 0x3d5   :  { %v2551_v23 = vmax.f32 %v2507_v24, 0.0  ;;  %v2508_v21 = vadd.f32 %v6230_v14, %v2457_v26  ;;  %4452 = vmatmul.mubr.msk.bf16.gmra.mrb[84].mxu1 %vm1600_vm3, %v2607_v12  ;;  %v3102_v14 = vld [vmem:[#allocation2 + $0x88] sm:$0xff]  ;;  %v3243_v37 = vpack.c.bf16 %v3096_v60, %v3095_v44  ;;  %v3121_v24 = vld [vmem:[#allocation2 + $0x120] sm:$0xff] }
 0x3d6   :  { %v2554_v49 = vmax.f32 %v2510_v19, 0.0  ;;  %4507 = vmatprep.mubr.msk.bf16.mxu1 %vm4804_vm4, %v4803_v25  ;;  %v3122_v26 = vld [vmem:[#allocation2 + $0x128] sm:$0xff] }
 0x3d7   :  { %v2575_v59 = vmax.f32 %v2551_v23, %v2553_v57  ;;  %v2552_v6 = vmax.f32 %v2508_v21, 0.0  ;;  %v3113_v57 = vld [vmem:[#allocation2 + $0xe0] sm:$0xff]  ;;  %v3114_v19 = vld [vmem:[#allocation2 + $0xe8] sm:$0xff]  ;;  %v3139_v23 = vld [vmem:[#allocation2 + $0x1b0] sm:$0xff] }
 0x3d8   :  { %v3252_v21 = vpack.c.bf16 %v3114_v19, %v3113_v57 }
 0x3d9   :  { %v2576_v38 = vmax.f32 %v2552_v6, %v2554_v49  ;;  %v3140_v49 = vld [vmem:[#allocation2 + $0x1b8] sm:$0xff]  ;;  %v3098_v6 = vld [vmem:[#allocation2 + $0x68] sm:$0xff] }
 0x3db   :  { %v2861_v42 = vpack.c.bf16 %v2576_v38, %v2575_v59  ;;  %v3097_v59 = vld [vmem:[#allocation2 + $0x60] sm:$0xff]  ;;  %v3265_v38 = vpack.c.bf16 %v3140_v49, %v3139_v23 }
 0x3dd   :  { %4508 = vmatmul.mubr.msk.bf16.vlgmr.msra.gmra.mrb[88].mxu1 %vm1600_vm3, %v6305_v4  ;;  %v3085_v4 = vld [vmem:[#allocation2] sm:$0xff] }
 0x3de   :  { %4511 = vmatprep.mubr.msk.bf16.mxu1 %vm4804_vm4, %v4803_v25  ;;  %3995 = vmatpush3.bf16.msra.mxu1 %v3254_v50  ;;  %v3260_v50 = vpack.c.bf16 %v3130_v63, %v3129_v3 }
 0x3df   :  { %3996 = vmatprep.subr.bf16.mxu1 %v3263_v27  ;;  %v3198_v27 = vld [vmem:[#allocation2 + $0x388] sm:$0xff] }
 0x3e0   :  { %v3294_v8 = vpack.c.bf16 %v3198_v27, %v3197_v61 }
 0x3e2   :  { %3997 = vmatpush3.bf16.msra.mxu1 %v3255_v32 }
 0x3e3   :  { %3998 = vmatprep.subr.bf16.mxu1 %v3264_v47 }
 0x3e5   :  { %4512 = vmatmul.mubr.msk.bf16.gmra.mrb[92].mxu1 %vm1600_vm3, %v6335_v35  ;;  %v3246_v35 = vpack.c.bf16 %v3102_v14, %v3101_v41  ;;  %v3123_v41 = vld [vmem:[#allocation2 + $0x130] sm:$0xff]  ;;  %v3124_v14 = vld [vmem:[#allocation2 + $0x138] sm:$0xff] }
 0x3e6   :  { %4515 = vmatprep.mubr.msk.bf16.mxu1 %vm4804_vm4, %v4803_v25 }
 0x3e7   :  { %3972 = vmatprep.subr.bf16.mxu0 %v3246_v35  ;;  %v3257_v35 = vpack.c.bf16 %v3124_v14, %v3123_v41 }
 0x3ed   :  { %4516 = vmatmul.mubr.msk.bf16.gmra.mrb[96].mxu1 %vm1600_vm3, %v6357_v46  ;;  %v3086_v46 = vld [vmem:[#allocation2 + $0x8] sm:$0xff] }
 0x3ee   :  { %4519 = vmatprep.mubr.msk.bf16.mxu1 %vm4804_vm4, %v4803_v25  ;;  %v3238_v16 = vpack.c.bf16 %v3086_v46, %v3085_v4  ;;  %v3115_v4 = vld [vmem:[#allocation2 + $0xf0] sm:$0xff]  ;;  %v3116_v46 = vld [vmem:[#allocation2 + $0xf8] sm:$0xff] }
 0x3f0   :  { %3973 = vmatpush3.bf16.msra.mxu0 %v3238_v16  ;;  %v3141_v16 = vld [vmem:[#allocation2 + $0x1c0] sm:$0xff] }
 0x3f5   :  { %4520 = vmatmul.mubr.msk.bf16.gmra.mrb[100].mxu1 %vm1600_vm3, %v6379_v5  ;;  %v3103_v5 = vld [vmem:[#allocation2 + $0x90] sm:$0xff] }
 0x3f6   :  { %4523 = vmatprep.mubr.msk.bf16.mxu1 %vm4804_vm4, %v4803_v25 }
 0x3fd   :  { %4524 = vmatmul.mubr.msk.bf16.gmra.mrb[104].mxu1 %vm1600_vm3, %v6401_v48  ;;  %v3247_v48 = vpack.c.bf16 %v3104_v20, %v3103_v5  ;;  %v3142_v5 = vld [vmem:[#allocation2 + $0x1c8] sm:$0xff]  ;;  %v3253_v20 = vpack.c.bf16 %v3116_v46, %v3115_v4 }
 0x3fe   :  { %4527 = vmatprep.mubr.msk.bf16.mxu1 %vm4804_vm4, %v4803_v25 }
 0x3ff   :  { %3974 = vmatprep.subr.bf16.mxu0 %v3247_v48  ;;  %v3266_v48 = vpack.c.bf16 %v3142_v5, %v3141_v16 }
 0x400   :  { %3975 = vmatpush3.bf16.msra.mxu0 %v3239_v29  ;;  %v3125_v29 = vld [vmem:[#allocation2 + $0x140] sm:$0xff] }
 0x405   :  { %4528 = vmatmul.mubr.msk.bf16.gmra.mrb[108].mxu1 %vm1600_vm3, %v6423_v7  ;;  %v3106_v7 = vld [vmem:[#allocation2 + $0xa8] sm:$0xff] }
 0x406   :  { %4531 = vmatprep.mubr.msk.bf16.mxu1 %vm4804_vm4, %v4803_v25  ;;  %v3248_v15 = vpack.c.bf16 %v3106_v7, %v3105_v54  ;;  %v3245_v54 = vpack.c.bf16 %v3100_v13, %v3099_v53  ;;  %v3126_v7 = vld [vmem:[#allocation2 + $0x148] sm:$0xff] }
 0x407   :  { %v3258_v17 = vpack.c.bf16 %v3126_v7, %v3125_v29 }
 0x408   :  { %3976 = vmatprep.subr.bf16.mxu0 %v3248_v15  ;;  %v3165_v15 = vld [vmem:[#allocation2 + $0x280] sm:$0xff] }
 0x409   :  { %3977 = vmatpush3.bf16.msra.mxu0 %v3240_v18  ;;  %v3143_v18 = vld [vmem:[#allocation2 + $0x1d0] sm:$0xff]  ;;  %v3278_v22 = vpack.c.bf16 %v3166_v43, %v3165_v15 }
 0x40a   :  { %3978 = vmatprep.subr.bf16.mxu0 %v3249_v28  ;;  %v3267_v31 = vpack.c.bf16 %v3144_v30, %v3143_v18  ;;  %v3127_v28 = vld [vmem:[#allocation2 + $0x150] sm:$0xff] }
 0x40b   :  { %v3259_v33 = vpack.c.bf16 %v3128_v52, %v3127_v28 }
 0x40d   :  { %4532 = vmatmul.mubr.msk.bf16.gmra.mrb[112].mxu1 %vm1600_vm3, %v6445_v62  ;;  %3979 = vmatpush3.bf16.msra.mxu0 %v3241_v45  ;;  %v3109_v62 = vld [vmem:[#allocation2 + $0xc0] sm:$0xff]  ;;  %v3268_v45 = vpack.c.bf16 %v3146_v39, %v3145_v36 }
 0x40e   :  { %4535 = vmatprep.mubr.msk.bf16.mxu1 %vm4804_vm4, %v4803_v25  ;;  %v3250_v1 = vpack.c.bf16 %v3110_v11, %v3109_v62  ;;  %v3147_v62 = vld [vmem:[#allocation2 + $0x1f0] sm:$0xff]  ;;  %v3148_v11 = vld [vmem:[#allocation2 + $0x1f8] sm:$0xff] }
 0x40f   :  { %v3269_v34 = vpack.c.bf16 %v3148_v11, %v3147_v62 }
 0x410   :  { %3980 = vmatprep.subr.bf16.mxu0 %v3250_v1  ;;  %v3131_v1 = vld [vmem:[#allocation2 + $0x170] sm:$0xff] }
 0x411   :  { %3981 = vmatpush3.bf16.msra.mxu0 %v3242_v2  ;;  %v3261_v58 = vpack.c.bf16 %v3132_v55, %v3131_v1 }
 0x412   :  { %3982 = vmatprep.subr.bf16.mxu0 %v3251_v0 }
 0x415   :  { %4536 = vmatmul.mubr.msk.bf16.gmra.mrb[116].mxu1 %vm1600_vm3, %v2607_v12  ;;  %v3256_v12 = vpack.c.bf16 %v3122_v26, %v3121_v24  ;;  %3983 = vmatpush3.bf16.msra.mxu0 %v3243_v37 }
 0x416   :  { %4539 = vmatprep.mubr.msk.bf16.mxu1 %vm4804_vm4, %v4803_v25  ;;  %3984 = vmatprep.subr.bf16.mxu0 %v3252_v21 }
 0x417   :  { %3999 = vmatpush3.bf16.msra.mxu1 %v3256_v12 }
 0x418   :  { %4000 = vmatprep.subr.bf16.mxu1 %v3265_v38 }
 0x41b   :  { %4001 = vmatpush3.bf16.msra.mxu1 %v3257_v35 }
 0x41c   :  { %4002 = vmatprep.subr.bf16.mxu1 %v3266_v48 }
 0x41d   :  { %4540 = vmatmul.mubr.msk.bf16.gmra.mrb[120].mxu1 %vm1600_vm3, %v2861_v42  ;;  %v3244_v42 = vpack.c.bf16 %v3098_v6, %v3097_v59 }
 0x41f   :  { %3985 = vmatpush3.bf16.msra.mxu0 %v3244_v42  ;;  %4003 = vmatpush3.bf16.msra.mxu1 %v3258_v17 }
 0x420   :  { %3986 = vmatprep.subr.bf16.mxu0 %v3253_v20  ;;  %4004 = vmatprep.subr.bf16.mxu1 %v3267_v31 }
 0x423   :  { %3987 = vmatpush3.bf16.msra.mxu0 %v3245_v54  ;;  %4005 = vmatpush3.bf16.msra.mxu1 %v3259_v33 }
 0x424   :  { %4016 = vmatprep.subr.bf16.mxu0 %v3278_v22  ;;  %4006 = vmatprep.subr.bf16.mxu1 %v3268_v45 }
 0x427   :  { %4007 = vmatpush3.bf16.msra.mxu1 %v3260_v50 }
 0x428   :  { %4008 = vmatprep.subr.bf16.mxu1 %v3269_v34 }
 0x42b   :  { %4009 = vmatpush3.bf16.msra.mxu1 %v3261_v58 }
 0x42c   :  { %4038 = vmatprep.subr.bf16.mxu1 %v3294_v8 }
 0x460   :  { %v2781_v2 = vpop.f32.mrb[56].mxu0 }
 0x461   :  { %v4465_v40 = vpop.f32.mrb[57].mxu0 }
 0x462   :  { %v2784_v32 = vpop.f32.mrb[58].mxu0 }
 0x463   :  { %v4466_v51 = vpop.f32.mrb[59].mxu0 }
 0x468   :  { %v2673_v10 = vpop.f32.mrb[52].mxu1  ;;  %v2789_v56 = vpop.f32.mrb[60].mxu0 }
 0x469   :  { %v6502_v0 = vadd.f32 %v2781_v2, %v2673_v10  ;;  %v4421_v9 = vpop.f32.mrb[53].mxu1  ;;  %v4469_v44 = vpop.f32.mrb[61].mxu0 }
 0x46a   :  { %v2676_v60 = vpop.f32.mrb[54].mxu1  ;;  %v2792_v47 = vpop.f32.mrb[62].mxu0 }
 0x46b   :  { %v6504_v37 = vadd.f32 %v2784_v32, %v2676_v60  ;;  %v4422_v24 = vpop.f32.mrb[55].mxu1  ;;  %v4470_v26 = vpop.f32.mrb[63].mxu0 }
 0x470   :  { %v2681_v12 = vpop.f32.mrb[56].mxu1  ;;  %v2797_v57 = vpop.f32.mrb[64].mxu0 }
 0x471   :  { %v6506_v19 = vadd.f32 %v2789_v56, %v2681_v12  ;;  %v4425_v23 = vpop.f32.mrb[57].mxu1  ;;  %v4473_v21 = vpop.f32.mrb[65].mxu0 }
 0x472   :  { %v2684_v49 = vpop.f32.mrb[58].mxu1  ;;  %v2800_v59 = vpop.f32.mrb[66].mxu0 }
 0x473   :  { %v6508_v6 = vadd.f32 %v2792_v47, %v2684_v49  ;;  %v4426_v38 = vpop.f32.mrb[59].mxu1  ;;  %v4474_v42 = vpop.f32.mrb[67].mxu0 }
 0x478   :  { %v2689_v41 = vpop.f32.mrb[60].mxu1  ;;  %v2805_v14 = vpop.f32.mrb[68].mxu0 }
 0x479   :  { %v6510_v4 = vadd.f32 %v2797_v57, %v2689_v41  ;;  %v4429_v35 = vpop.f32.mrb[61].mxu1  ;;  %v4477_v46 = vpop.f32.mrb[69].mxu0 }
 0x47a   :  { %v2692_v16 = vpop.f32.mrb[62].mxu1  ;;  %v2808_v5 = vpop.f32.mrb[70].mxu0 }
 0x47b   :  { %v6512_v20 = vadd.f32 %v2800_v59, %v2692_v16  ;;  %v4430_v48 = vpop.f32.mrb[63].mxu1  ;;  %v4478_v53 = vpop.f32.mrb[71].mxu0 }
 0x480   :  { %v2697_v13 = vpop.f32.mrb[64].mxu1  ;;  %v2813_v29 = vpop.f32.mrb[72].mxu0 }
 0x481   :  { %v6514_v54 = vadd.f32 %v2805_v14, %v2697_v13  ;;  %v4433_v7 = vpop.f32.mrb[65].mxu1  ;;  %v4481_v17 = vpop.f32.mrb[73].mxu0  ;;  %v6541_v13 = vld [vmem:[%s6654_s10] ss:$0 sm:$0xff] }
 0x482   :  { %v2700_v15 = vpop.f32.mrb[66].mxu1  ;;  %v2816_v43 = vpop.f32.mrb[74].mxu0  ;;  %v6547_v17 = vld [vmem:[%s6655_s11] ss:$0 sm:$0xff] }
 0x483   :  { %v6516_v18 = vadd.f32 %v2808_v5, %v2700_v15  ;;  %v4434_v22 = vpop.f32.mrb[67].mxu1  ;;  %v4482_v30 = vpop.f32.mrb[75].mxu0 }
 0x488   :  { %v2705_v31 = vpop.f32.mrb[68].mxu1  ;;  %v2821_v28 = vpop.f32.mrb[76].mxu0 }
 0x489   :  { %v6518_v52 = vadd.f32 %v2813_v29, %v2705_v31  ;;  %v4437_v33 = vpop.f32.mrb[69].mxu1  ;;  %v4485_v36 = vpop.f32.mrb[77].mxu0  ;;  %v6554_v31 = vld [vmem:[%s6656_s12] ss:$0 sm:$0xff] }
 0x48a   :  { %v2708_v39 = vpop.f32.mrb[70].mxu1  ;;  %v2824_v45 = vpop.f32.mrb[78].mxu0 }
 0x48b   :  { %v6520_v3 = vadd.f32 %v2816_v43, %v2708_v39  ;;  %v4438_v63 = vpop.f32.mrb[71].mxu1  ;;  %v4486_v50 = vpop.f32.mrb[79].mxu0 }
 0x490   :  { %v2713_v62 = vpop.f32.mrb[72].mxu1  ;;  %v2829_v11 = vpop.f32.mrb[80].mxu0 }
 0x491   :  { %v6522_v34 = vadd.f32 %v2821_v28, %v2713_v62  ;;  %v4441_v1 = vpop.f32.mrb[73].mxu1  ;;  %v4489_v55 = vpop.f32.mrb[81].mxu0 }
 0x492   :  { %v2716_v58 = vpop.f32.mrb[74].mxu1  ;;  %v2832_v61 = vpop.f32.mrb[82].mxu0 }
 0x493   :  { %v6524_v27 = vadd.f32 %v2824_v45, %v2716_v58  ;;  %v4442_v2 = vpop.f32.mrb[75].mxu1  ;;  %v4490_v8 = vpop.f32.mrb[83].mxu0 }
 0x498   :  { %v2721_v40 = vpop.f32.mrb[76].mxu1  ;;  %v2837_v32 = vpop.f32.mrb[84].mxu0 }
 0x499   :  { %v6526_v51 = vadd.f32 %v2829_v11, %v2721_v40  ;;  %v4445_v10 = vpop.f32.mrb[77].mxu1  ;;  %v4493_v56 = vpop.f32.mrb[85].mxu0 }
 0x49a   :  { %v2724_v9 = vpop.f32.mrb[78].mxu1  ;;  %v2840_v44 = vpop.f32.mrb[86].mxu0 }
 0x49b   :  { %v6528_v60 = vadd.f32 %v2832_v61, %v2724_v9  ;;  %v4446_v47 = vpop.f32.mrb[79].mxu1  ;;  %v4494_v24 = vpop.f32.mrb[87].mxu0 }
 0x49c   :  { %v3149_v47 = vld [vmem:[#allocation2 + $0x200] sm:$0xff]  ;;  %v3150_v24 = vld [vmem:[#allocation2 + $0x208] sm:$0xff] }
 0x4a0   :  { %v2729_v26 = vpop.f32.mrb[80].mxu1  ;;  %v2845_v12 = vpop.f32.mrb[88].mxu0 }
 0x4a1   :  { %v6530_v57 = vadd.f32 %v2837_v32, %v2729_v26  ;;  %v4449_v23 = vpop.f32.mrb[81].mxu1  ;;  %v4497_v21 = vpop.f32.mrb[89].mxu0 }
 0x4a2   :  { %v2732_v49 = vpop.f32.mrb[82].mxu1  ;;  %v2848_v59 = vpop.f32.mrb[90].mxu0 }
 0x4a3   :  { %v6532_v38 = vadd.f32 %v2840_v44, %v2732_v49  ;;  %v4450_v42 = vpop.f32.mrb[83].mxu1  ;;  %v4498_v41 = vpop.f32.mrb[91].mxu0  ;;  %v3167_v49 = vld [vmem:[#allocation2 + $0x290] sm:$0xff] }
 0x4a8   :  { %v2737_v14 = vpop.f32.mrb[84].mxu1 }
 0x4a9   :  { %v6534_v35 = vadd.f32 %v2845_v12, %v2737_v14  ;;  %v4453_v46 = vpop.f32.mrb[85].mxu1  ;;  %v3270_v14 = vpack.c.bf16 %v3150_v24, %v3149_v47 }
 0x4aa   :  { %v2740_v16 = vpop.f32.mrb[86].mxu1 }
 0x4ab   :  { %v6536_v5 = vadd.f32 %v2848_v59, %v2740_v16  ;;  %v4454_v48 = vpop.f32.mrb[87].mxu1  ;;  %v3168_v59 = vld [vmem:[#allocation2 + $0x298] sm:$0xff]  ;;  %v3151_v16 = vld [vmem:[#allocation2 + $0x210] sm:$0xff] }
 0x4ac   :  { %v3279_v46 = vpack.c.bf16 %v3168_v59, %v3167_v49  ;;  %v3152_v48 = vld [vmem:[#allocation2 + $0x218] sm:$0xff]  ;;  %v3182_v49 = vld [vmem:[#allocation2 + $0x308] sm:$0xff]  ;;  %v3175_v59 = vld [vmem:[#allocation2 + $0x2d0] sm:$0xff] }
 0x4b0   :  { %v2903_v53 = vpop.f32.mrb[88].mxu1 }
 0x4b1   :  { %v2974_v29 = vadd.f32 %v2903_v53, %v6502_v0  ;;  %v4509_v7 = vpop.f32.mrb[89].mxu1 }
 0x4b2   :  { %v2906_v15 = vpop.f32.mrb[90].mxu1  ;;  %v3170_v7 = vld [vmem:[#allocation2 + $0x2a8] sm:$0xff] }
 0x4b3   :  { %v2999_v43 = vadd.f32 %v6541_v13, %v2974_v29  ;;  %v2975_v22 = vadd.f32 %v2906_v15, %v6504_v37  ;;  %v4510_v30 = vpop.f32.mrb[91].mxu1 }
 0x4b5   :  { %v3024_v28 = vmul.f32 %v6547_v17, %v2999_v43  ;;  %v3000_v0 = vadd.f32 %v6541_v13, %v2975_v22 }
 0x4b7   :  { %v3049_v33 = vadd.f32 %v6554_v31, %v3024_v28  ;;  %v3025_v36 = vmul.f32 %v6547_v17, %v3000_v0  ;;  %v3271_v28 = vpack.c.bf16 %v3152_v48, %v3151_v16  ;;  %v3199_v16 = vld [vmem:[#allocation2 + $0x390] sm:$0xff]  ;;  %v3200_v48 = vld [vmem:[#allocation2 + $0x398] sm:$0xff] }
 0x4b8   :  { %v2911_v39 = vpop.f32.mrb[92].mxu1 }
 0x4b9   :  { %v3050_v45 = vadd.f32 %v6554_v31, %v3025_v36  ;;  %v2976_v63 = vadd.f32 %v2911_v39, %v6506_v19  ;;  %v4513_v37 = vpop.f32.mrb[93].mxu1  ;;  %v3067_v62 = vmax.f32 %v3049_v33, 0.0  ;;  %v3153_v36 = vld [vmem:[#allocation2 + $0x220] sm:$0xff]  ;;  %v3154_v39 = vld [vmem:[#allocation2 + $0x228] sm:$0xff] }
 0x4ba   :  { %v2914_v50 = vpop.f32.mrb[94].mxu1 }
 0x4bb   :  { %v3068_v11 = vmax.f32 %v3050_v45, 0.0  ;;  %v3001_v1 = vadd.f32 %v6541_v13, %v2976_v63  ;;  %v2977_v55 = vadd.f32 %v2914_v50, %v6508_v6  ;;  %v4514_v58 = vpop.f32.mrb[95].mxu1 }
 0x4bd   :  { %v3229_v61 = vpack.c.bf16 %v3068_v11, %v3067_v62  ;;  %v3026_v2 = vmul.f32 %v6547_v17, %v3001_v1  ;;  %v3002_v8 = vadd.f32 %v6541_v13, %v2977_v55  ;;  %v3171_v11 = vld [vmem:[#allocation2 + $0x2b0] sm:$0xff]  ;;  %v3172_v1 = vld [vmem:[#allocation2 + $0x2b8] sm:$0xff] }
 0x4bf   :  { %v3027_v40 = vmul.f32 %v6547_v17, %v3002_v8  ;;  %v3051_v32 = vadd.f32 %v6554_v31, %v3026_v2  ;;  %v3281_v2 = vpack.c.bf16 %v3172_v1, %v3171_v11  ;;  %v3155_v8 = vld [vmem:[#allocation2 + $0x230] sm:$0xff]  ;;  %v3161_v11 = vld [vmem:[#allocation2 + $0x260] sm:$0xff] }
 0x4c0   :  { %v2919_v10 = vpop.f32.mrb[96].mxu1 }
 0x4c1   :  { %v2978_v19 = vadd.f32 %v2919_v10, %v6510_v4  ;;  %v4517_v56 = vpop.f32.mrb[97].mxu1  ;;  %v3052_v9 = vadd.f32 %v6554_v31, %v3027_v40  ;;  %v3069_v23 = vmax.f32 %v3051_v32, 0.0  ;;  %v3156_v40 = vld [vmem:[#allocation2 + $0x238] sm:$0xff] }
 0x4c2   :  { %v2922_v44 = vpop.f32.mrb[98].mxu1  ;;  %v3273_v47 = vpack.c.bf16 %v3156_v40, %v3155_v8  ;;  %v3185_v8 = vld [vmem:[#allocation2 + $0x320] sm:$0xff]  ;;  %v3186_v40 = vld [vmem:[#allocation2 + $0x328] sm:$0xff] }
 0x4c3   :  { %v3003_v6 = vadd.f32 %v6541_v13, %v2978_v19  ;;  %v2979_v26 = vadd.f32 %v2922_v44, %v6512_v20  ;;  %v4518_v12 = vpop.f32.mrb[99].mxu1  ;;  %v3070_v21 = vmax.f32 %v3052_v9, 0.0  ;;  %v3169_v20 = vld [vmem:[#allocation2 + $0x2a0] sm:$0xff] }
 0x4c4   :  { %v3280_v33 = vpack.c.bf16 %v3170_v7, %v3169_v20  ;;  %v3173_v19 = vld [vmem:[#allocation2 + $0x2c0] sm:$0xff] }
 0x4c5   :  { %v3028_v42 = vmul.f32 %v6547_v17, %v3003_v6  ;;  %v3004_v41 = vadd.f32 %v6541_v13, %v2979_v26  ;;  %v3230_v4 = vpack.c.bf16 %v3070_v21, %v3069_v23  ;;  %v3157_v6 = vld [vmem:[#allocation2 + $0x240] sm:$0xff]  ;;  %v3158_v26 = vld [vmem:[#allocation2 + $0x248] sm:$0xff] }
 0x4c6   :  { %v3181_v21 = vld [vmem:[#allocation2 + $0x300] sm:$0xff] }
 0x4c7   :  { %v3053_v53 = vadd.f32 %v6554_v31, %v3028_v42  ;;  %v3029_v29 = vmul.f32 %v6547_v17, %v3004_v41  ;;  %3349 = vmatprep.mubr.bf16.mxu0 %v3230_v4 }
 0x4c8   :  { %v2927_v15 = vpop.f32.mrb[100].mxu1  ;;  %3350 = vmatmul.mubr.bf16.vlgmr.msra.gmra.mrb[92].mxu0 %v3229_v61  ;;  %v3272_v61 = vpack.c.bf16 %v3154_v39, %v3153_v36 }
 0x4c9   :  { %v3054_v43 = vadd.f32 %v6554_v31, %v3029_v29  ;;  %v2980_v22 = vadd.f32 %v2927_v15, %v6514_v54  ;;  %4017 = vmatpush3.bf16.msra.mxu0 %v3270_v14  ;;  %v4521_v30 = vpop.f32.mrb[101].mxu1  ;;  %v3071_v45 = vmax.f32 %v3053_v53, 0.0  ;;  %v3274_v53 = vpack.c.bf16 %v3158_v26, %v3157_v6  ;;  %v3204_v6 = vld [vmem:[#allocation2 + $0x3b8] sm:$0xff] }
 0x4ca   :  { %v2930_v0 = vpop.f32.mrb[102].mxu1  ;;  %4018 = vmatprep.subr.bf16.mxu0 %v3279_v46  ;;  %v3176_v46 = vld [vmem:[#allocation2 + $0x2d8] sm:$0xff]  ;;  %v3286_v15 = vpack.c.bf16 %v3182_v49, %v3181_v21  ;;  %v3163_v49 = vld [vmem:[#allocation2 + $0x270] sm:$0xff] }
 0x4cb   :  { %v3072_v63 = vmax.f32 %v3054_v43, 0.0  ;;  %v3005_v37 = vadd.f32 %v6541_v13, %v2980_v22  ;;  %v2981_v50 = vadd.f32 %v2930_v0, %v6516_v18  ;;  %v4522_v62 = vpop.f32.mrb[103].mxu1  ;;  %v3174_v18 = vld [vmem:[#allocation2 + $0x2c8] sm:$0xff]  ;;  %v3159_v43 = vld [vmem:[#allocation2 + $0x250] sm:$0xff]  ;;  %v3160_v22 = vld [vmem:[#allocation2 + $0x258] sm:$0xff]  ;;  %v3283_v30 = vpack.c.bf16 %v3176_v46, %v3175_v59 }
 0x4cc   :  { %v3282_v23 = vpack.c.bf16 %v3174_v18, %v3173_v19  ;;  %v3184_v0 = vld [vmem:[#allocation2 + $0x318] sm:$0xff]  ;;  %v3275_v62 = vpack.c.bf16 %v3160_v22, %v3159_v43  ;;  %v3179_v18 = vld [vmem:[#allocation2 + $0x2f0] sm:$0xff] }
 0x4cd   :  { %v3231_v55 = vpack.c.bf16 %v3072_v63, %v3071_v45  ;;  %v3030_v54 = vmul.f32 %v6547_v17, %v3005_v37  ;;  %v3006_v58 = vadd.f32 %v6541_v13, %v2981_v50  ;;  %4019 = vmatpush3.bf16.msra.mxu0 %v3271_v28  ;;  %v3295_v28 = vpack.c.bf16 %v3200_v48, %v3199_v16  ;;  %v3178_v45 = vld [vmem:[#allocation2 + $0x2e8] sm:$0xff]  ;;  %v3201_v63 = vld [vmem:[#allocation2 + $0x3a0] sm:$0xff]  ;;  %v3164_v59 = vld [vmem:[#allocation2 + $0x278] sm:$0xff] }
 0x4ce   :  { %4020 = vmatprep.subr.bf16.mxu0 %v3280_v33  ;;  %v3177_v33 = vld [vmem:[#allocation2 + $0x2e0] sm:$0xff]  ;;  %v3202_v37 = vld [vmem:[#allocation2 + $0x3a8] sm:$0xff] }
 0x4cf   :  { %v3031_v32 = vmul.f32 %v6547_v17, %v3006_v58  ;;  %v3055_v10 = vadd.f32 %v6554_v31, %v3030_v54  ;;  %v3296_v19 = vpack.c.bf16 %v3202_v37, %v3201_v63  ;;  %v3205_v16 = vld [vmem:[#allocation2 + $0x3c0] sm:$0xff]  ;;  %v3206_v48 = vld [vmem:[#allocation2 + $0x3c8] sm:$0xff]  ;;  %v3207_v37 = vld [vmem:[#allocation2 + $0x3d0] sm:$0xff] }
 0x4d0   :  { %v2935_v56 = vpop.f32.mrb[104].mxu1 }
 0x4d1   :  { %v2982_v9 = vadd.f32 %v2935_v56, %v6518_v52  ;;  %4021 = vmatpush3.bf16.msra.mxu0 %v3272_v61  ;;  %v4525_v44 = vpop.f32.mrb[105].mxu1  ;;  %v3056_v24 = vadd.f32 %v6554_v31, %v3031_v32  ;;  %v3073_v14 = vmax.f32 %v3055_v10, 0.0  ;;  %v3284_v10 = vpack.c.bf16 %v3178_v45, %v3177_v33 }
 0x4d2   :  { %v2938_v12 = vpop.f32.mrb[106].mxu1  ;;  %4022 = vmatprep.subr.bf16.mxu0 %v3281_v2  ;;  %v3162_v2 = vld [vmem:[#allocation2 + $0x268] sm:$0xff]  ;;  %v3298_v33 = vpack.c.bf16 %v3206_v48, %v3205_v16  ;;  %v3219_v48 = vld [vmem:[#allocation2 + $0x430] sm:$0xff] }
 0x4d3   :  { %v3007_v42 = vadd.f32 %v6541_v13, %v2982_v9  ;;  %v2983_v41 = vadd.f32 %v2938_v12, %v6520_v3  ;;  %v4526_v4 = vpop.f32.mrb[107].mxu1  ;;  %v3074_v52 = vmax.f32 %v3056_v24, 0.0  ;;  %v3183_v3 = vld [vmem:[#allocation2 + $0x310] sm:$0xff]  ;;  %v3276_v26 = vpack.c.bf16 %v3162_v2, %v3161_v11  ;;  %v3216_v2 = vld [vmem:[#allocation2 + $0x418] sm:$0xff] }
 0x4d4   :  { %v3287_v61 = vpack.c.bf16 %v3184_v0, %v3183_v3  ;;  %v3203_v24 = vld [vmem:[#allocation2 + $0x3b0] sm:$0xff]  ;;  %v3288_v12 = vpack.c.bf16 %v3186_v40, %v3185_v8  ;;  %v3190_v3 = vld [vmem:[#allocation2 + $0x348] sm:$0xff]  ;;  %v3192_v40 = vld [vmem:[#allocation2 + $0x358] sm:$0xff] }
 0x4d5   :  { %v3032_v29 = vmul.f32 %v6547_v17, %v3007_v42  ;;  %v3008_v20 = vadd.f32 %v6541_v13, %v2983_v41  ;;  %4023 = vmatpush3.bf16.msra.mxu0 %v3273_v47  ;;  %v3232_v7 = vpack.c.bf16 %v3074_v52, %v3073_v14  ;;  %v3180_v47 = vld [vmem:[#allocation2 + $0x2f8] sm:$0xff]  ;;  %v3297_v4 = vpack.c.bf16 %v3204_v6, %v3203_v24  ;;  %v3191_v8 = vld [vmem:[#allocation2 + $0x350] sm:$0xff]  ;;  %v3218_v6 = vld [vmem:[#allocation2 + $0x428] sm:$0xff] }
 0x4d6   :  { %4024 = vmatprep.subr.bf16.mxu0 %v3282_v23  ;;  %v3285_v41 = vpack.c.bf16 %v3180_v47, %v3179_v18  ;;  %v3188_v14 = vld [vmem:[#allocation2 + $0x338] sm:$0xff]  ;;  %v3210_v18 = vld [vmem:[#allocation2 + $0x3e8] sm:$0xff]  ;;  %v3291_v24 = vpack.c.bf16 %v3192_v40, %v3191_v8 }
 0x4d7   :  { %v3057_v36 = vadd.f32 %v6554_v31, %v3032_v29  ;;  %v3033_v39 = vmul.f32 %v6547_v17, %v3008_v20  ;;  %3390 = vmatprep.mubr.bf16.mxu1 %v3232_v7  ;;  %v3277_v29 = vpack.c.bf16 %v3164_v59, %v3163_v49  ;;  %v3213_v20 = vld [vmem:[#allocation2 + $0x400] sm:$0xff]  ;;  %v3226_v40 = vld [vmem:[#allocation2 + $0x468] sm:$0xff] }
 0x4d8   :  { %v2943_v50 = vpop.f32.mrb[108].mxu1  ;;  %3391 = vmatmul.mubr.bf16.vlgmr.msra.gmra.mrb[124].mxu1 %v3231_v55 }
 0x4d9   :  { %v3058_v1 = vadd.f32 %v6554_v31, %v3033_v39  ;;  %v2984_v54 = vadd.f32 %v2943_v50, %v6522_v34  ;;  %4025 = vmatpush3.bf16.msra.mxu0 %v3274_v53  ;;  %v4529_v58 = vpop.f32.mrb[109].mxu1  ;;  %4039 = vmatpush3.bf16.msra.mxu1 %v3286_v15  ;;  %v3075_v55 = vmax.f32 %v3057_v36, 0.0  ;;  %v3208_v50 = vld [vmem:[#allocation2 + $0x3d8] sm:$0xff] }
 0x4da   :  { %v2946_v32 = vpop.f32.mrb[110].mxu1  ;;  %4026 = vmatprep.subr.bf16.mxu0 %v3283_v30  ;;  %4040 = vmatprep.subr.bf16.mxu1 %v3295_v28  ;;  %v3214_v30 = vld [vmem:[#allocation2 + $0x408] sm:$0xff]  ;;  %v3189_v28 = vld [vmem:[#allocation2 + $0x340] sm:$0xff] }
 0x4db   :  { %v3076_v56 = vmax.f32 %v3058_v1, 0.0  ;;  %v3009_v9 = vadd.f32 %v6541_v13, %v2984_v54  ;;  %v2985_v44 = vadd.f32 %v2946_v32, %v6524_v27  ;;  %v4530_v34 = vpop.f32.mrb[111].mxu1  ;;  %v3187_v27 = vld [vmem:[#allocation2 + $0x330] sm:$0xff]  ;;  %v3290_v11 = vpack.c.bf16 %v3190_v3, %v3189_v28 }
 0x4dc   :  { %v3289_v43 = vpack.c.bf16 %v3188_v14, %v3187_v27  ;;  %v3212_v27 = vld [vmem:[#allocation2 + $0x3f8] sm:$0xff] }
 0x4dd   :  { %v3034_v23 = vmul.f32 %v6547_v17, %v3009_v9  ;;  %v3010_v21 = vadd.f32 %v6541_v13, %v2985_v44  ;;  %4027 = vmatpush3.bf16.msra.mxu0 %v3275_v62  ;;  %4041 = vmatpush3.bf16.msra.mxu1 %v3287_v61  ;;  %v3233_v42 = vpack.c.bf16 %v3076_v56, %v3075_v55  ;;  %v3215_v61 = vld [vmem:[#allocation2 + $0x410] sm:$0xff]  ;;  %v3217_v9 = vld [vmem:[#allocation2 + $0x420] sm:$0xff] }
 0x4de   :  { %4028 = vmatprep.subr.bf16.mxu0 %v3284_v10  ;;  %4042 = vmatprep.subr.bf16.mxu1 %v3296_v19  ;;  %v3302_v62 = vpack.c.bf16 %v3214_v30, %v3213_v20  ;;  %v3209_v19 = vld [vmem:[#allocation2 + $0x3e0] sm:$0xff]  ;;  %v3303_v56 = vpack.c.bf16 %v3216_v2, %v3215_v61  ;;  %v3304_v14 = vpack.c.bf16 %v3218_v6, %v3217_v9  ;;  %v3195_v20 = vld [vmem:[#allocation2 + $0x370] sm:$0xff]  ;;  %v3224_v61 = vld [vmem:[#allocation2 + $0x458] sm:$0xff] }
 0x4df   :  { %v3035_v52 = vmul.f32 %v6547_v17, %v3010_v21  ;;  %v3059_v46 = vadd.f32 %v6554_v31, %v3034_v23  ;;  %v3300_v21 = vpack.c.bf16 %v3210_v18, %v3209_v19  ;;  %v3761_v6 = vld [vmem:[%s6658_s14] ss:$0 sm:$0xff] }
 0x4e0   :  { %v2951_v53 = vpop.f32.mrb[112].mxu1 }
 0x4e1   :  { %v2986_v7 = vadd.f32 %v2951_v53, %v6526_v51  ;;  %4029 = vmatpush3.bf16.msra.mxu0 %v3276_v26  ;;  %v4533_v15 = vpop.f32.mrb[113].mxu1  ;;  %4043 = vmatpush3.bf16.msra.mxu1 %v3288_v12  ;;  %v3060_v22 = vadd.f32 %v6554_v31, %v3035_v52  ;;  %v3077_v63 = vmax.f32 %v3059_v46, 0.0  ;;  %v3193_v26 = vld [vmem:[#allocation2 + $0x360] sm:$0xff]  ;;  %v3194_v12 = vld [vmem:[#allocation2 + $0x368] sm:$0xff]  ;;  %v3220_v53 = vld [vmem:[#allocation2 + $0x438] sm:$0xff] }
 0x4e2   :  { %v2954_v0 = vpop.f32.mrb[114].mxu1  ;;  %4030 = vmatprep.subr.bf16.mxu0 %v3285_v41  ;;  %4044 = vmatprep.subr.bf16.mxu1 %v3297_v4  ;;  %v3292_v52 = vpack.c.bf16 %v3194_v12, %v3193_v26  ;;  %v3305_v30 = vpack.c.bf16 %v3220_v53, %v3219_v48 }
 0x4e3   :  { %v3011_v36 = vadd.f32 %v6541_v13, %v2986_v7  ;;  %v2987_v39 = vadd.f32 %v2954_v0, %v6528_v60  ;;  %v4534_v45 = vpop.f32.mrb[115].mxu1  ;;  %v3078_v51 = vmax.f32 %v3060_v22, 0.0  ;;  %v3299_v60 = vpack.c.bf16 %v3208_v50, %v3207_v37  ;;  %v3196_v7 = vld [vmem:[#allocation2 + $0x378] sm:$0xff] }
 0x4e4   :  { %v3293_v0 = vpack.c.bf16 %v3196_v7, %v3195_v20 }
 0x4e5   :  { %v3036_v1 = vmul.f32 %v6547_v17, %v3011_v36  ;;  %v3012_v54 = vadd.f32 %v6541_v13, %v2987_v39  ;;  %4031 = vmatpush3.bf16.msra.mxu0 %v3277_v29  ;;  %4045 = vmatpush3.bf16.msra.mxu1 %v3289_v43  ;;  %v3234_v58 = vpack.c.bf16 %v3078_v51, %v3077_v63  ;;  %v3221_v36 = vld [vmem:[#allocation2 + $0x440] sm:$0xff]  ;;  %v3222_v39 = vld [vmem:[#allocation2 + $0x448] sm:$0xff] }
 0x4e6   :  { %4543 = vmatprep.subr.bf16.mxu0 %v4803_v25  ;;  %4046 = vmatprep.subr.bf16.mxu1 %v3298_v33 }
 0x4e7   :  { %v3061_v32 = vadd.f32 %v6554_v31, %v3036_v1  ;;  %v3037_v10 = vmul.f32 %v6547_v17, %v3012_v54  ;;  %3431 = vmatprep.mubr.bf16.mxu0 %v3234_v58  ;;  %v3223_v58 = vld [vmem:[#allocation2 + $0x450] sm:$0xff] }
 0x4e8   :  { %v2959_v55 = vpop.f32.mrb[116].mxu1  ;;  %3432 = vmatmul.mubr.bf16.vlgmr.msra.gmra.mrb[96].mxu0 %v3233_v42  ;;  %v3307_v8 = vpack.c.bf16 %v3224_v61, %v3223_v58 }
 0x4e9   :  { %v3062_v44 = vadd.f32 %v6554_v31, %v3037_v10  ;;  %v2988_v34 = vadd.f32 %v2959_v55, %v6530_v57  ;;  %4544 = vmatpush3.bf16.msra.mxu0 %v3302_v62  ;;  %v4537_v47 = vpop.f32.mrb[117].mxu1  ;;  %4047 = vmatpush3.bf16.msra.mxu1 %v3290_v11  ;;  %v3079_v49 = vmax.f32 %v3061_v32, 0.0  ;;  %v3211_v57 = vld [vmem:[#allocation2 + $0x3f0] sm:$0xff] }
 0x4ea   :  { %v2962_v23 = vpop.f32.mrb[118].mxu1  ;;  %4545 = vmatprep.subr.bf16.mxu0 %v4803_v25  ;;  %4048 = vmatprep.subr.bf16.mxu1 %v3299_v60  ;;  %v3227_v55 = vld [vmem:[#allocation2 + $0x470] sm:$0xff] }
 0x4eb   :  { %v3080_v59 = vmax.f32 %v3062_v44, 0.0  ;;  %v3013_v42 = vadd.f32 %v6541_v13, %v2988_v34  ;;  %v2989_v41 = vadd.f32 %v2962_v23, %v6532_v38  ;;  %v4538_v4 = vpop.f32.mrb[119].mxu1  ;;  %4559 = vmatprep.mubr.msk.bf16.mxu0 %vm4804_vm4, %v4803_v25  ;;  %v3301_v38 = vpack.c.bf16 %v3212_v27, %v3211_v57 }
 0x4ed   :  { %v3038_v46 = vmul.f32 %v6547_v17, %v3013_v42  ;;  %v3014_v16 = vadd.f32 %v6541_v13, %v2989_v41  ;;  %4546 = vmatpush3.bf16.msra.mxu0 %v3303_v56  ;;  %4049 = vmatpush3.bf16.msra.mxu1 %v3291_v24  ;;  %v3235_v29 = vpack.c.bf16 %v3080_v59, %v3079_v49  ;;  %v3228_v56 = vld [vmem:[#allocation2 + $0x478] sm:$0xff] }
 0x4ee   :  { %4547 = vmatprep.subr.bf16.mxu0 %v4803_v25  ;;  %4050 = vmatprep.subr.bf16.mxu1 %v3300_v21 }
 0x4ef   :  { %v3039_v15 = vmul.f32 %v6547_v17, %v3014_v16  ;;  %v3063_v43 = vadd.f32 %v6554_v31, %v3038_v46 }
 0x4f0   :  { %v2967_v22 = vpop.f32.mrb[120].mxu1 }
 0x4f1   :  { %v2990_v28 = vadd.f32 %v2967_v22, %v6534_v35  ;;  %4548 = vmatpush3.bf16.msra.mxu0 %v3304_v14  ;;  %v4541_v3 = vpop.f32.mrb[121].mxu1  ;;  %4051 = vmatpush3.bf16.msra.mxu1 %v3292_v52  ;;  %v3064_v33 = vadd.f32 %v6554_v31, %v3039_v15  ;;  %v3081_v50 = vmax.f32 %v3063_v43, 0.0  ;;  %v3306_v35 = vpack.c.bf16 %v3222_v39, %v3221_v36 }
 0x4f2   :  { %v2970_v45 = vpop.f32.mrb[122].mxu1  ;;  %4549 = vmatprep.subr.bf16.mxu0 %v4803_v25  ;;  %4052 = vmatprep.subr.bf16.mxu1 %v3301_v38 }
 0x4f3   :  { %v3015_v63 = vadd.f32 %v6541_v13, %v2990_v28  ;;  %v2991_v51 = vadd.f32 %v2970_v45, %v6536_v5  ;;  %v4542_v37 = vpop.f32.mrb[123].mxu1  ;;  %v3082_v62 = vmax.f32 %v3064_v33, 0.0 }
 0x4f5   :  { %v3040_v11 = vmul.f32 %v6547_v17, %v3015_v63  ;;  %v3016_v1 = vadd.f32 %v6541_v13, %v2991_v51  ;;  %4550 = vmatpush3.bf16.msra.mxu0 %v3305_v30  ;;  %4053 = vmatpush3.bf16.msra.mxu1 %v3293_v0  ;;  %v3236_v54 = vpack.c.bf16 %v3082_v62, %v3081_v50  ;;  %v3225_v13 = vld [vmem:[#allocation2 + $0x460] sm:$0xff] }
 0x4f6   :  { %4551 = vmatprep.subr.bf16.mxu0 %v4803_v25  ;;  %v3308_v19 = vpack.c.bf16 %v3226_v40, %v3225_v13 }
 0x4f7   :  { %v3065_v2 = vadd.f32 %v6554_v31, %v3040_v11  ;;  %v3041_v60 = vmul.f32 %v6547_v17, %v3016_v1  ;;  %3472 = vmatprep.mubr.bf16.mxu1 %v3236_v54  ;;  %v3309_v17 = vpack.c.bf16 %v3228_v56, %v3227_v55 }
 0x4f8   :  { %3473 = vmatmul.mubr.bf16.vlgmr.msra.gmra.mrb[128].mxu1 %v3235_v29 }
 0x4f9   :  { %v3066_v5 = vadd.f32 %v6554_v31, %v3041_v60  ;;  %4552 = vmatpush3.bf16.msra.mxu0 %v3306_v35  ;;  %v3083_v32 = vmax.f32 %v3065_v2, 0.0 }
 0x4fa   :  { %4553 = vmatprep.subr.bf16.mxu0 %v4803_v25 }
 0x4fb   :  { %v3084_v10 = vmax.f32 %v3066_v5, 0.0 }
 0x4fd   :  { %4554 = vmatpush3.bf16.msra.mxu0 %v3307_v8  ;;  %v3237_v18 = vpack.c.bf16 %v3084_v10, %v3083_v32 }
 0x4fe   :  { %4555 = vmatprep.subr.bf16.mxu0 %v4803_v25 }
 0x501   :  { %4556 = vmatpush3.bf16.msra.mxu0 %v3308_v19 }
 0x502   :  { %4557 = vmatprep.subr.bf16.mxu0 %v4803_v25 }
 0x505   :  { %4558 = vmatpush3.bf16.msra.mxu0 %v3309_v17 }
 0x508   :  { %4560 = vmatmul.mubr.bf16.vlgmr.msra.gmra.mrb[100].mxu0 %v3237_v18 }
 0x59b   :  { %v3988_v31 = vpop.f32.mrb[92].mxu0 }
 0x59c   :  { %v3989_v9 = vpop.f32.mrb[93].mxu0 }
 0x59d   :  { %v3990_v44 = vadd.f32 %v3989_v9, %v3988_v31  ;;  %v3991_v34 = vpop.f32.mrb[94].mxu0 }
 0x59e   :  { %v3992_v47 = vpop.f32.mrb[95].mxu0 }
 0x59f   :  { %v3993_v24 = vadd.f32 %v3992_v47, %v3991_v34  ;;  %v3352_v23 = vadd.f32 %v3990_v44, %v3761_v6 }
 0x5a1   :  { %v3355_v42 = vadd.f32 %v3993_v24, %v3761_v6 }
 0x5ab   :  { %v4010_v26 = vpop.f32.mrb[124].mxu1 }
 0x5ac   :  { %v4011_v12 = vpop.f32.mrb[125].mxu1 }
 0x5ad   :  { %v4012_v21 = vadd.f32 %v4011_v12, %v4010_v26  ;;  %v4013_v49 = vpop.f32.mrb[126].mxu1 }
 0x5ae   :  { %v4014_v59 = vpop.f32.mrb[127].mxu1 }
 0x5af   :  { %v3393_v25 = vadd.f32 %v4012_v21, %v3352_v23  ;;  %v4015_v41 = vadd.f32 %v4014_v59, %v4013_v49 }
 0x5b1   :  { %v3396_v4 = vadd.f32 %v4015_v41, %v3355_v42 }
 0x5bb   :  { %v4032_v57 = vpop.f32.mrb[96].mxu0 }
 0x5bc   :  { %v4033_v27 = vpop.f32.mrb[97].mxu0 }
 0x5bd   :  { %v4034_v14 = vadd.f32 %v4033_v27, %v4032_v57  ;;  %v4035_v52 = vpop.f32.mrb[98].mxu0 }
 0x5be   :  { %v4036_v46 = vpop.f32.mrb[99].mxu0 }
 0x5bf   :  { %v3434_v16 = vadd.f32 %v4034_v14, %v3393_v25  ;;  %v4037_v48 = vadd.f32 %v4036_v46, %v4035_v52 }
 0x5c1   :  { %v3437_v53 = vadd.f32 %v4037_v48, %v3396_v4 }
 0x5cb   :  { %v4054_v29 = vpop.f32.mrb[128].mxu1 }
 0x5cc   :  { %v4055_v38 = vpop.f32.mrb[129].mxu1 }
 0x5cd   :  { %v4056_v20 = vadd.f32 %v4055_v38, %v4054_v29  ;;  %v4057_v7 = vpop.f32.mrb[130].mxu1 }
 0x5ce   :  { %v4058_v15 = vpop.f32.mrb[131].mxu1 }
 0x5cf   :  { %v4059_v43 = vadd.f32 %v4058_v15, %v4057_v7  ;;  %v3475_v22 = vadd.f32 %v4056_v20, %v3434_v16 }
 0x5d1   :  { %v3478_v30 = vadd.f32 %v4059_v43, %v3437_v53 }
 0x5db   :  { %v3515_v28 = vpop.f32.mrb[100].mxu0 }
 0x5dc   :  { %v3516_v3 = vadd.f32 %v3515_v28, %v3475_v22  ;;  %v4561_v0 = vpop.f32.mrb[101].mxu0 }
 0x5dd   :  { %v3518_v33 = vpop.f32.mrb[102].mxu0 }
 0x5de   :  { %v3522_v36 = vmax.f32 %v3516_v3, 0.0  ;;  %v3519_v39 = vadd.f32 %v3518_v33, %v3478_v30  ;;  %v4562_v45 = vpop.f32.mrb[103].mxu0 }
 0x5e0   :  { %3524 = vst [vmem:[%s6659_s15] sm:$0xff] %v3522_v36  ;;  %v3523_v63 = vmax.f32 %v3519_v39, 0.0 }
 0x5e2   :  { %3525 = vst [vmem:[%s6659_s15 + $0x8] sm:$0xff] %v3523_v63 }
 0x5e3   :  { %3530 = vsyncpa [#allocation3], 1 }

</bundles_post_ra>
